<compile_context>
chip_gen: v7x
topology: tpu7x:2x2x1
jax: 0.10.0
libtpu: 0.0.40
codegen_flags: <defaults>
</compile_context>

<pallas_src>
import numpy as np
import jax
import jax.numpy as jnp
from jax import lax
from jax.experimental import pallas as pl
from jax.experimental.pallas import tpu as pltpu

KS = 3                      # kernel_size
N_PTS = KS * KS             # number of sampling points per output location


def _lane_shift(v, d, size):
    """out[:, m] = v[:, (m + d) mod size] for static int d (wrap-around; callers
    mask out the wrapped entries)."""
    i = d % size
    if i == 0:
        return v
    return jnp.concatenate([v[:, i:], v[:, :i]], axis=1)


# ----------------------------------------------------------------------------
# Pallas deformable conv (p_conv -> separable bilinear gather -> fused conv)
# ----------------------------------------------------------------------------
def deform_conv2d_pallas(x, p_w, p_b, conv_w):
    """x: (B, C, H, W) f32.  p_w: (2*9, C, 3, 3), p_b: (2*9,), conv_w: (Cout, C, 3, 3).
    Returns (B, Cout, H*W) f32 (spatial flattened; caller reshapes)."""
    B, C, H, W = x.shape
    M = H * W
    Cout = conv_w.shape[0]
    N = N_PTS
    CH = C * H

    # ---- host glue: pure reshapes + tiny constants (no data expansion) ------
    xf = x.reshape(B, C, M).astype(jnp.float32)               # (B, C, M)
    xr = x.reshape(B, CH, W).astype(jnp.float32)              # (B, C*H, W)

    # offset-conv weight, split per-tap: pw3[t, o, c] = p_w[o, c, t//3, t%3]
    pwt = jnp.transpose(p_w, (0, 2, 3, 1)).reshape(2 * N, N * C).astype(jnp.float32)
    pwx3 = pwt[:N].reshape(N, N, C).transpose(1, 0, 2)         # (tap, out, C)
    pwy3 = pwt[N:].reshape(N, N, C).transpose(1, 0, 2)         # (tap, out, C)
    pbx = p_b[:N].reshape(N, 1).astype(jnp.float32)
    pby = p_b[N:].reshape(N, 1).astype(jnp.float32)

    # base sampling grid p_0 + p_n (matches torch meshgrid order, 1-indexed)
    p0x = np.repeat(np.arange(1, H + 1, dtype=np.float32), W)
    p0y = np.tile(np.arange(1, W + 1, dtype=np.float32), H)
    pnx = np.repeat(np.arange(-(KS - 1) // 2, (KS - 1) // 2 + 1, dtype=np.float32), KS)
    pny = np.tile(np.arange(-(KS - 1) // 2, (KS - 1) // 2 + 1, dtype=np.float32), KS)
    base_x = jnp.asarray(p0x[None, :] + pnx[:, None])          # (9, M) row coords
    base_y = jnp.asarray(p0y[None, :] + pny[:, None])          # (9, M) col coords

    # validity masks for the 9 in-kernel im2col taps of the 3x3/pad-1 p_conv
    hh = np.repeat(np.arange(H), W)
    ww = np.tile(np.arange(W), H)
    masks_np = np.zeros((N, M), np.float32)
    for t in range(N):
        dy, dx = t // KS - 1, t % KS - 1
        ok = (hh + dy >= 0) & (hh + dy <= H - 1) & (ww + dx >= 0) & (ww + dx <= W - 1)
        masks_np[t] = ok.astype(np.float32)
    masks = jnp.asarray(masks_np)

    # per-point final-conv weight, broadcast over h:
    #   cwh[n, cout, c*H + h] = conv_w[cout, c, n//3, n%3]
    cwn = jnp.transpose(conv_w, (2, 3, 0, 1)).reshape(N, Cout, C).astype(jnp.float32)
    cwh = jnp.broadcast_to(cwn[:, :, :, None], (N, Cout, C, H)).reshape(N, Cout, CH)

    hmax = float(H - 1)
    wmax = float(W - 1)

    def kernel(xf_ref, xr_ref, pwx_ref, pwy_ref, pbx_ref, pby_ref,
               bx_ref, by_ref, mask_ref, cwh_ref, out_ref):
        x_b = xf_ref[0]                                       # (C, M)
        x_r = xr_ref[0]                                       # (C*H, W)
        masks_v = mask_ref[...]                               # (9, M)

        # -- p_conv: 9 im2col taps built in-kernel (lane shift + edge mask),
        #    accumulated with one tiny matmul per tap (weight plane per tap).
        offx = jnp.zeros((N, M), jnp.float32)
        offy = jnp.zeros((N, M), jnp.float32)
        for t in range(N):
            d = (t // KS - 1) * W + (t % KS - 1)              # flat source offset
            tap = _lane_shift(x_b, d, M) * masks_v[t:t + 1, :]   # (C, M)
            offx = offx + jnp.dot(pwx_ref[t], tap, preferred_element_type=jnp.float32)
            offy = offy + jnp.dot(pwy_ref[t], tap, preferred_element_type=jnp.float32)
        offx = offx + pbx_ref[...]
        offy = offy + pby_ref[...]

        # -- sampling positions + separable bilinear corner weights (all 9 pts)
        px = bx_ref[...] + offx                               # (9, M) sample rows
        py = by_ref[...] + offy                               # (9, M) sample cols
        fx = jnp.floor(px)
        fy = jnp.floor(py)
        ltx = jnp.clip(fx, 0.0, hmax)
        rbx = jnp.clip(fx + 1.0, 0.0, hmax)
        lty = jnp.clip(fy, 0.0, wmax)
        rby = jnp.clip(fy + 1.0, 0.0, wmax)
        pxc = jnp.clip(px, 0.0, hmax)
        pyc = jnp.clip(py, 0.0, wmax)
        wx_l = 1.0 + (ltx - pxc)       # bilinear weight factors: g_lt = wx_l*wy_l,
        wx_r = 1.0 - (rbx - pxc)       # g_rb = wx_r*wy_r, g_lb = wx_l*wy_r,
        wy_l = 1.0 + (lty - pyc)       # g_rt = wx_r*wy_l  (exactly the reference)
        wy_r = 1.0 - (rby - pyc)
        ltx_i = ltx.astype(jnp.int32)
        rbx_i = rbx.astype(jnp.int32)
        lty_i = lty.astype(jnp.int32)
        rby_i = rby.astype(jnp.int32)

        iota_h = lax.broadcasted_iota(jnp.int32, (H, M), 0)
        iota_w = lax.broadcasted_iota(jnp.int32, (W, M), 0)

        # -- per point: two-stage gather, accumulated straight into the output
        acc = jnp.zeros((Cout, M), jnp.float32)
        for n in range(N):
            # weighted column one-hot (W, M): clamped duplicates sum correctly
            colsel = (jnp.where(iota_w == lty_i[n:n + 1, :], wy_l[n:n + 1, :], 0.0)
                      + jnp.where(iota_w == rby_i[n:n + 1, :], wy_r[n:n + 1, :], 0.0))
            # weighted row one-hot (H, M)
            rowsel = (jnp.where(iota_h == ltx_i[n:n + 1, :], wx_l[n:n + 1, :], 0.0)
                      + jnp.where(iota_h == rbx_i[n:n + 1, :], wx_r[n:n + 1, :], 0.0))
            # stage 1 (MXU): column gather  (C*H, W) @ (W, M) -> (C*H, M)
            xg = jnp.dot(x_r, colsel, preferred_element_type=jnp.float32)
            # stage 2 (VPU): row weights applied elementwise
            a_n = (xg.reshape(C, H, M) * rowsel[None, :, :]).reshape(CH, M)
            # stage 3 (MXU): fused h-reduction + kernel-size-strided conv
            acc = acc + jnp.dot(cwh_ref[n], a_n, preferred_element_type=jnp.float32)

        out_ref[0] = acc

    flops = B * (2 * (2 * N) * (N * C) * M        # offset conv
                 + N * 2 * CH * W * M             # 9 column-gather matmuls
                 + 3 * N * CH * M                 # row-weight elementwise
                 + N * 2 * Cout * CH * M)         # per-point conv accumulation
    bytes_accessed = 4 * (B * (C * M + CH * W + Cout * M)
                          + 2 * N * N * C + 2 * N + 3 * N * M + N * Cout * CH)

    out = pl.pallas_call(
        kernel,
        out_shape=jax.ShapeDtypeStruct((B, Cout, M), jnp.float32),
        grid_spec=pltpu.PrefetchScalarGridSpec(
            num_scalar_prefetch=0,
            grid=(B,),
            in_specs=[
                pl.BlockSpec((1, C, M), lambda b: (b, 0, 0)),
                pl.BlockSpec((1, CH, W), lambda b: (b, 0, 0)),
                pl.BlockSpec((N, N, C), lambda b: (0, 0, 0)),
                pl.BlockSpec((N, N, C), lambda b: (0, 0, 0)),
                pl.BlockSpec((N, 1), lambda b: (0, 0)),
                pl.BlockSpec((N, 1), lambda b: (0, 0)),
                pl.BlockSpec((N, M), lambda b: (0, 0)),
                pl.BlockSpec((N, M), lambda b: (0, 0)),
                pl.BlockSpec((N, M), lambda b: (0, 0)),
                pl.BlockSpec((N, Cout, CH), lambda b: (0, 0, 0)),
            ],
            out_specs=pl.BlockSpec((1, Cout, M), lambda b: (b, 0, 0)),
        ),
        compiler_params=pltpu.CompilerParams(
            dimension_semantics=("parallel",)),           # independent per batch
        cost_estimate=pl.CostEstimate(flops=flops, transcendentals=0,
                                      bytes_accessed=bytes_accessed),
    )(xf, xr, pwx3, pwy3, pbx, pby, base_x, base_y, masks, cwh)
    return out  # (B, Cout, M)


# ----------------------------------------------------------------------------
# Pallas BatchNorm (training-mode batch stats) + ReLU, gridded over channels
# ----------------------------------------------------------------------------
def bn_relu_pallas(y, gamma, beta, eps=1e-5):
    """y: (B, C, M) f32 -> (B, C, M) f32; per-channel stats over (B, M)."""
    B, C, M = y.shape
    cb = 8 if C % 8 == 0 else C                   # channel block (stats are per-channel)
    inv_n = 1.0 / float(B * M)

    def kernel(y_ref, g_ref, b_ref, o_ref):
        yv = y_ref[...]                                      # (B, cb, M)
        ysum = jnp.sum(yv, axis=0)                           # (cb, M)
        mean = jnp.sum(ysum, axis=1, keepdims=True) * inv_n  # (cb, 1)
        diff = yv - mean[None, :, :]
        dsum = jnp.sum(diff * diff, axis=0)                  # (cb, M)
        var = jnp.sum(dsum, axis=1, keepdims=True) * inv_n   # biased var
        scale = g_ref[...] * lax.rsqrt(var + eps)            # (cb, 1)
        o_ref[...] = jnp.maximum(diff * scale[None, :, :] + b_ref[...][None, :, :],
                                 0.0)

    out = pl.pallas_call(
        kernel,
        out_shape=jax.ShapeDtypeStruct((B, C, M), jnp.float32),
        grid_spec=pltpu.PrefetchScalarGridSpec(
            num_scalar_prefetch=0,
            grid=(C // cb,),
            in_specs=[
                pl.BlockSpec((B, cb, M), lambda i: (0, i, 0)),
                pl.BlockSpec((cb, 1), lambda i: (i, 0)),
                pl.BlockSpec((cb, 1), lambda i: (i, 0)),
            ],
            out_specs=pl.BlockSpec((B, cb, M), lambda i: (0, i, 0)),
        ),
        compiler_params=pltpu.CompilerParams(dimension_semantics=("parallel",)),
        cost_estimate=pl.CostEstimate(flops=10 * B * C * M, transcendentals=C,
                                      bytes_accessed=4 * (2 * B * C * M + 4 * C)),
    )(y.astype(jnp.float32),
      gamma.reshape(C, 1).astype(jnp.float32),
      beta.reshape(C, 1).astype(jnp.float32))
    return out


def deform_inconv_pallas(x, params):
    (pw1, pb1, cw1, g1, b1, pw2, pb2, cw2, g2, b2) = params
    B, _, H, W = x.shape
    y = deform_conv2d_pallas(x, pw1, pb1, cw1)
    y = bn_relu_pallas(y, g1, b1).reshape(B, -1, H, W)
    y = deform_conv2d_pallas(y, pw2, pb2, cw2)
    y = bn_relu_pallas(y, g2, b2).reshape(B, -1, H, W)
    return y


# ----------------------------------------------------------------------------
# Pure-JAX reference (literal transcription of the PyTorch forward, padding=0)
# ----------------------------------------------------------------------------
def _deform_conv2d_ref(x, p_w, p_b, conv_w):
    B, C, H, W = x.shape
    N = N_PTS
    offset = lax.conv_general_dilated(
        x, p_w, (1, 1), ((1, 1), (1, 1)),
        dimension_numbers=("NCHW", "OIHW", "NCHW"),
        precision=lax.Precision.HIGHEST) + p_b[None, :, None, None]

    pnx = jnp.repeat(jnp.arange(-(KS - 1) // 2, (KS - 1) // 2 + 1), KS).astype(jnp.float32)
    pny = jnp.tile(jnp.arange(-(KS - 1) // 2, (KS - 1) // 2 + 1), KS).astype(jnp.float32)
    p_n = jnp.concatenate([pnx, pny]).reshape(1, 2 * N, 1, 1)
    i0 = jnp.arange(1, H + 1, dtype=jnp.float32)
    j0 = jnp.arange(1, W + 1, dtype=jnp.float32)
    p0x = jnp.broadcast_to(i0[:, None], (H, W)).reshape(1, 1, H, W)
    p0y = jnp.broadcast_to(j0[None, :], (H, W)).reshape(1, 1, H, W)
    p_0 = jnp.concatenate([jnp.tile(p0x, (1, N, 1, 1)), jnp.tile(p0y, (1, N, 1, 1))], axis=1)

    p = p_0 + p_n + offset
    p = jnp.transpose(p, (0, 2, 3, 1))                       # (B, H, W, 2N)
    q_lt = jnp.floor(p)
    q_rb = q_lt + 1
    q_lt = jnp.concatenate([jnp.clip(q_lt[..., :N], 0, H - 1),
                            jnp.clip(q_lt[..., N:], 0, W - 1)], axis=-1).astype(jnp.int32)
    q_rb = jnp.concatenate([jnp.clip(q_rb[..., :N], 0, H - 1),
                            jnp.clip(q_rb[..., N:], 0, W - 1)], axis=-1).astype(jnp.int32)
    q_lb = jnp.concatenate([q_lt[..., :N], q_rb[..., N:]], axis=-1)
    q_rt = jnp.concatenate([q_rb[..., :N], q_lt[..., N:]], axis=-1)
    p = jnp.concatenate([jnp.clip(p[..., :N], 0, H - 1),
                         jnp.clip(p[..., N:], 0, W - 1)], axis=-1)

    f = jnp.float32
    g_lt = (1 + (q_lt[..., :N].astype(f) - p[..., :N])) * (1 + (q_lt[..., N:].astype(f) - p[..., N:]))
    g_rb = (1 - (q_rb[..., :N].astype(f) - p[..., :N])) * (1 - (q_rb[..., N:].astype(f) - p[..., N:]))
    g_lb = (1 + (q_lb[..., :N].astype(f) - p[..., :N])) * (1 - (q_lb[..., N:].astype(f) - p[..., N:]))
    g_rt = (1 - (q_rt[..., :N].astype(f) - p[..., :N])) * (1 + (q_rt[..., N:].astype(f) - p[..., N:]))

    def get_x_q(q):
        xf = x.reshape(B, C, H * W)
        idx = q[..., :N] * W + q[..., N:]
        idx = jnp.broadcast_to(idx.reshape(B, 1, H * W * N), (B, C, H * W * N))
        return jnp.take_along_axis(xf, idx, axis=2).reshape(B, C, H, W, N)

    x_offset = (g_lt[:, None] * get_x_q(q_lt) + g_rb[:, None] * get_x_q(q_rb)
                + g_lb[:, None] * get_x_q(q_lb) + g_rt[:, None] * get_x_q(q_rt))

    xo = jnp.concatenate([x_offset[..., s:s + KS].reshape(B, C, H, W * KS)
                          for s in range(0, N, KS)], axis=-1)
    xo = xo.reshape(B, C, H * KS, W * KS)
    return lax.conv_general_dilated(
        xo, conv_w, (KS, KS), "VALID",
        dimension_numbers=("NCHW", "OIHW", "NCHW"),
        precision=lax.Precision.HIGHEST)


def _bn_relu_ref(y, gamma, beta, eps=1e-5):
    mean = jnp.mean(y, axis=(0, 2, 3), keepdims=True)
    var = jnp.mean((y - mean) ** 2, axis=(0, 2, 3), keepdims=True)
    out = (y - mean) / jnp.sqrt(var + eps) * gamma[None, :, None, None] + beta[None, :, None, None]
    return jnp.maximum(out, 0.0)


def deform_inconv_ref(x, params):
    (pw1, pb1, cw1, g1, b1, pw2, pb2, cw2, g2, b2) = params
    y = _bn_relu_ref(_deform_conv2d_ref(x, pw1, pb1, cw1), g1, b1)
    y = _bn_relu_ref(_deform_conv2d_ref(y, pw2, pb2, cw2), g2, b2)
    return y


# ----------------------------------------------------------------------------
if __name__ == "__main__":
    B, in_ch, out_ch, H, W = 2, 4, 8, 16, 16

    key = jax.random.PRNGKey(0)
    ks = jax.random.split(key, 8)
    x = jax.random.normal(ks[0], (B, in_ch, H, W), jnp.float32)

    # Deterministic parameter init (module gives shapes; p_conv init is 0 in the
    # original __init__ — small random values used here to exercise the kernel).
    pw1 = 0.05 * jax.random.normal(ks[1], (2 * N_PTS, in_ch, KS, KS), jnp.float32)
    pb1 = 0.30 * jax.random.normal(ks[2], (2 * N_PTS,), jnp.float32)
    cw1 = 0.30 * jax.random.normal(ks[3], (out_ch, in_ch, KS, KS), jnp.float32)
    g1 = jnp.ones((out_ch,), jnp.float32)
    b1 = jnp.zeros((out_ch,), jnp.float32)

    pw2 = 0.05 * jax.random.normal(ks[4], (2 * N_PTS, out_ch, KS, KS), jnp.float32)
    pb2 = 0.30 * jax.random.normal(ks[5], (2 * N_PTS,), jnp.float32)
    cw2 = 0.20 * jax.random.normal(ks[6], (out_ch, out_ch, KS, KS), jnp.float32)
    g2 = jnp.ones((out_ch,), jnp.float32)
    b2 = jnp.zeros((out_ch,), jnp.float32)

    params = (pw1, pb1, cw1, g1, b1, pw2, pb2, cw2, g2, b2)

    out = deform_inconv_pallas(x, params)
    out = jax.block_until_ready(out)

    ref = jax.block_until_ready(deform_inconv_ref(x, params))

    assert out.shape == (B, out_ch, H, W), out.shape
    maxerr = float(np.max(np.abs(np.asarray(out) - np.asarray(ref))))
    assert np.allclose(np.asarray(out), np.asarray(ref), rtol=1e-2, atol=1e-2), maxerr

    print("KERNEL_OK")
</pallas_src>

<mosaic_0001>
module attributes {stable_mosaic.version = 11 : i64} {
  func.func @kernel(%arg0: i32, %arg1: memref<1x4x256xf32, #tpu.memory_space<vmem>>, %arg2: memref<1x64x16xf32, #tpu.memory_space<vmem>>, %arg3: memref<9x9x4xf32, #tpu.memory_space<vmem>>, %arg4: memref<9x9x4xf32, #tpu.memory_space<vmem>>, %arg5: memref<9x1xf32, #tpu.memory_space<vmem>>, %arg6: memref<9x1xf32, #tpu.memory_space<vmem>>, %arg7: memref<9x256xf32, #tpu.memory_space<vmem>>, %arg8: memref<9x256xf32, #tpu.memory_space<vmem>>, %arg9: memref<9x256xf32, #tpu.memory_space<vmem>>, %arg10: memref<9x8x64xf32, #tpu.memory_space<vmem>>, %arg11: memref<1x8x256xf32, #tpu.memory_space<vmem>>) attributes {dimension_semantics = [#tpu.dimension_semantics<parallel>], iteration_bounds = array<i64: 2>, scalar_prefetch = 0 : i64, scratch_operands = 0 : i64, tpu.core_type = #tpu.core_type<tc>, window_params = [{transform_indices = @transform_0, window_bounds = array<i64: 1, 4, 256>}, {transform_indices = @transform_1, window_bounds = array<i64: 1, 64, 16>}, {pipeline_mode = #tpu.pipeline_mode<synchronous>, transform_indices = @transform_2, window_bounds = array<i64: 9, 9, 4>}, {pipeline_mode = #tpu.pipeline_mode<synchronous>, transform_indices = @transform_3, window_bounds = array<i64: 9, 9, 4>}, {pipeline_mode = #tpu.pipeline_mode<synchronous>, transform_indices = @transform_4, window_bounds = array<i64: 9, 1>}, {pipeline_mode = #tpu.pipeline_mode<synchronous>, transform_indices = @transform_5, window_bounds = array<i64: 9, 1>}, {pipeline_mode = #tpu.pipeline_mode<synchronous>, transform_indices = @transform_6, window_bounds = array<i64: 9, 256>}, {pipeline_mode = #tpu.pipeline_mode<synchronous>, transform_indices = @transform_7, window_bounds = array<i64: 9, 256>}, {pipeline_mode = #tpu.pipeline_mode<synchronous>, transform_indices = @transform_8, window_bounds = array<i64: 9, 256>}, {pipeline_mode = #tpu.pipeline_mode<synchronous>, transform_indices = @transform_9, window_bounds = array<i64: 9, 8, 64>}, {transform_indices = @transform_10, window_bounds = array<i64: 1, 8, 256>}]} {
    %c0 = arith.constant 0 : index
    %c0_0 = arith.constant 0 : index
    %c0_1 = arith.constant 0 : index
    %0 = vector.load %arg1[%c0, %c0_0, %c0_1] : memref<1x4x256xf32, #tpu.memory_space<vmem>>, vector<1x4x256xf32>
    %1 = vector.shape_cast %0 : vector<1x4x256xf32> to vector<4x256xf32>
    %c0_2 = arith.constant 0 : index
    %c0_3 = arith.constant 0 : index
    %c0_4 = arith.constant 0 : index
    %2 = vector.load %arg2[%c0_2, %c0_3, %c0_4] : memref<1x64x16xf32, #tpu.memory_space<vmem>>, vector<1x64x16xf32>
    %3 = vector.shape_cast %2 : vector<1x64x16xf32> to vector<64x16xf32>
    %c0_5 = arith.constant 0 : index
    %c0_6 = arith.constant 0 : index
    %4 = vector.load %arg9[%c0_5, %c0_6] : memref<9x256xf32, #tpu.memory_space<vmem>>, vector<9x256xf32>
    %cst = arith.constant 0.000000e+00 : f32
    %5 = vector.broadcast %cst : f32 to vector<9x256xf32>
    %cst_7 = arith.constant 0.000000e+00 : f32
    %6 = vector.broadcast %cst_7 : f32 to vector<9x256xf32>
    %7 = vector.extract_strided_slice %1 {offsets = [0, 239], sizes = [4, 17], strides = [1, 1]} : vector<4x256xf32> to vector<4x17xf32>
    %8 = vector.extract_strided_slice %1 {offsets = [0, 0], sizes = [4, 239], strides = [1, 1]} : vector<4x256xf32> to vector<4x239xf32>
    %9 = tpu.concatenate %7, %8 in 1 : vector<4x17xf32>, vector<4x239xf32> -> vector<4x256xf32>
    %10 = vector.extract_strided_slice %4 {offsets = [0, 0], sizes = [1, 256], strides = [1, 1]} : vector<9x256xf32> to vector<1x256xf32>
    %11 = vector.broadcast %10 : vector<1x256xf32> to vector<4x256xf32>
    %12 = arith.mulf %9, %11 : vector<4x256xf32>
    %c0_8 = arith.constant 0 : index
    %c0_9 = arith.constant 0 : index
    %c0_10 = arith.constant 0 : index
    %13 = vector.load %arg3[%c0_8, %c0_9, %c0_10] : memref<9x9x4xf32, #tpu.memory_space<vmem>>, vector<1x9x4xf32>
    %14 = vector.shape_cast %13 : vector<1x9x4xf32> to vector<9x4xf32>
    %cst_11 = arith.constant dense<0.000000e+00> : vector<9x256xf32>
    %15 = tpu.matmul %14, %12, %cst_11 {dimension_numbers = #tpu.dot_dimension_numbers<[1], [0], [0], [1], [0, 0, 1, 1], [], []>} : vector<9x4xf32>, vector<4x256xf32>, vector<9x256xf32> -> vector<9x256xf32>
    %16 = arith.addf %5, %15 : vector<9x256xf32>
    %c0_12 = arith.constant 0 : index
    %c0_13 = arith.constant 0 : index
    %c0_14 = arith.constant 0 : index
    %17 = vector.load %arg4[%c0_12, %c0_13, %c0_14] : memref<9x9x4xf32, #tpu.memory_space<vmem>>, vector<1x9x4xf32>
    %18 = vector.shape_cast %17 : vector<1x9x4xf32> to vector<9x4xf32>
    %cst_15 = arith.constant dense<0.000000e+00> : vector<9x256xf32>
    %19 = tpu.matmul %18, %12, %cst_15 {dimension_numbers = #tpu.dot_dimension_numbers<[1], [0], [0], [1], [0, 0, 1, 1], [], []>} : vector<9x4xf32>, vector<4x256xf32>, vector<9x256xf32> -> vector<9x256xf32>
    %20 = arith.addf %6, %19 : vector<9x256xf32>
    %21 = vector.extract_strided_slice %1 {offsets = [0, 240], sizes = [4, 16], strides = [1, 1]} : vector<4x256xf32> to vector<4x16xf32>
    %22 = vector.extract_strided_slice %1 {offsets = [0, 0], sizes = [4, 240], strides = [1, 1]} : vector<4x256xf32> to vector<4x240xf32>
    %23 = tpu.concatenate %21, %22 in 1 : vector<4x16xf32>, vector<4x240xf32> -> vector<4x256xf32>
    %24 = vector.extract_strided_slice %4 {offsets = [1, 0], sizes = [1, 256], strides = [1, 1]} : vector<9x256xf32> to vector<1x256xf32>
    %25 = vector.broadcast %24 : vector<1x256xf32> to vector<4x256xf32>
    %26 = arith.mulf %23, %25 : vector<4x256xf32>
    %c1 = arith.constant 1 : index
    %c0_16 = arith.constant 0 : index
    %c0_17 = arith.constant 0 : index
    %27 = vector.load %arg3[%c1, %c0_16, %c0_17] : memref<9x9x4xf32, #tpu.memory_space<vmem>>, vector<1x9x4xf32>
    %28 = vector.shape_cast %27 : vector<1x9x4xf32> to vector<9x4xf32>
    %cst_18 = arith.constant dense<0.000000e+00> : vector<9x256xf32>
    %29 = tpu.matmul %28, %26, %cst_18 {dimension_numbers = #tpu.dot_dimension_numbers<[1], [0], [0], [1], [0, 0, 1, 1], [], []>} : vector<9x4xf32>, vector<4x256xf32>, vector<9x256xf32> -> vector<9x256xf32>
    %30 = arith.addf %16, %29 : vector<9x256xf32>
    %c1_19 = arith.constant 1 : index
    %c0_20 = arith.constant 0 : index
    %c0_21 = arith.constant 0 : index
    %31 = vector.load %arg4[%c1_19, %c0_20, %c0_21] : memref<9x9x4xf32, #tpu.memory_space<vmem>>, vector<1x9x4xf32>
    %32 = vector.shape_cast %31 : vector<1x9x4xf32> to vector<9x4xf32>
    %cst_22 = arith.constant dense<0.000000e+00> : vector<9x256xf32>
    %33 = tpu.matmul %32, %26, %cst_22 {dimension_numbers = #tpu.dot_dimension_numbers<[1], [0], [0], [1], [0, 0, 1, 1], [], []>} : vector<9x4xf32>, vector<4x256xf32>, vector<9x256xf32> -> vector<9x256xf32>
    %34 = arith.addf %20, %33 : vector<9x256xf32>
    %35 = vector.extract_strided_slice %1 {offsets = [0, 241], sizes = [4, 15], strides = [1, 1]} : vector<4x256xf32> to vector<4x15xf32>
    %36 = vector.extract_strided_slice %1 {offsets = [0, 0], sizes = [4, 241], strides = [1, 1]} : vector<4x256xf32> to vector<4x241xf32>
    %37 = tpu.concatenate %35, %36 in 1 : vector<4x15xf32>, vector<4x241xf32> -> vector<4x256xf32>
    %38 = vector.extract_strided_slice %4 {offsets = [2, 0], sizes = [1, 256], strides = [1, 1]} : vector<9x256xf32> to vector<1x256xf32>
    %39 = vector.broadcast %38 : vector<1x256xf32> to vector<4x256xf32>
    %40 = arith.mulf %37, %39 : vector<4x256xf32>
    %c2 = arith.constant 2 : index
    %c0_23 = arith.constant 0 : index
    %c0_24 = arith.constant 0 : index
    %41 = vector.load %arg3[%c2, %c0_23, %c0_24] : memref<9x9x4xf32, #tpu.memory_space<vmem>>, vector<1x9x4xf32>
    %42 = vector.shape_cast %41 : vector<1x9x4xf32> to vector<9x4xf32>
    %cst_25 = arith.constant dense<0.000000e+00> : vector<9x256xf32>
    %43 = tpu.matmul %42, %40, %cst_25 {dimension_numbers = #tpu.dot_dimension_numbers<[1], [0], [0], [1], [0, 0, 1, 1], [], []>} : vector<9x4xf32>, vector<4x256xf32>, vector<9x256xf32> -> vector<9x256xf32>
    %44 = arith.addf %30, %43 : vector<9x256xf32>
    %c2_26 = arith.constant 2 : index
    %c0_27 = arith.constant 0 : index
    %c0_28 = arith.constant 0 : index
    %45 = vector.load %arg4[%c2_26, %c0_27, %c0_28] : memref<9x9x4xf32, #tpu.memory_space<vmem>>, vector<1x9x4xf32>
    %46 = vector.shape_cast %45 : vector<1x9x4xf32> to vector<9x4xf32>
    %cst_29 = arith.constant dense<0.000000e+00> : vector<9x256xf32>
    %47 = tpu.matmul %46, %40, %cst_29 {dimension_numbers = #tpu.dot_dimension_numbers<[1], [0], [0], [1], [0, 0, 1, 1], [], []>} : vector<9x4xf32>, vector<4x256xf32>, vector<9x256xf32> -> vector<9x256xf32>
    %48 = arith.addf %34, %47 : vector<9x256xf32>
    %49 = vector.extract_strided_slice %1 {offsets = [0, 255], sizes = [4, 1], strides = [1, 1]} : vector<4x256xf32> to vector<4x1xf32>
    %50 = vector.extract_strided_slice %1 {offsets = [0, 0], sizes = [4, 255], strides = [1, 1]} : vector<4x256xf32> to vector<4x255xf32>
    %51 = tpu.concatenate %49, %50 in 1 : vector<4x1xf32>, vector<4x255xf32> -> vector<4x256xf32>
    %52 = vector.extract_strided_slice %4 {offsets = [3, 0], sizes = [1, 256], strides = [1, 1]} : vector<9x256xf32> to vector<1x256xf32>
    %53 = vector.broadcast %52 : vector<1x256xf32> to vector<4x256xf32>
    %54 = arith.mulf %51, %53 : vector<4x256xf32>
    %c3 = arith.constant 3 : index
    %c0_30 = arith.constant 0 : index
    %c0_31 = arith.constant 0 : index
    %55 = vector.load %arg3[%c3, %c0_30, %c0_31] : memref<9x9x4xf32, #tpu.memory_space<vmem>>, vector<1x9x4xf32>
    %56 = vector.shape_cast %55 : vector<1x9x4xf32> to vector<9x4xf32>
    %cst_32 = arith.constant dense<0.000000e+00> : vector<9x256xf32>
    %57 = tpu.matmul %56, %54, %cst_32 {dimension_numbers = #tpu.dot_dimension_numbers<[1], [0], [0], [1], [0, 0, 1, 1], [], []>} : vector<9x4xf32>, vector<4x256xf32>, vector<9x256xf32> -> vector<9x256xf32>
    %58 = arith.addf %44, %57 : vector<9x256xf32>
    %c3_33 = arith.constant 3 : index
    %c0_34 = arith.constant 0 : index
    %c0_35 = arith.constant 0 : index
    %59 = vector.load %arg4[%c3_33, %c0_34, %c0_35] : memref<9x9x4xf32, #tpu.memory_space<vmem>>, vector<1x9x4xf32>
    %60 = vector.shape_cast %59 : vector<1x9x4xf32> to vector<9x4xf32>
    %cst_36 = arith.constant dense<0.000000e+00> : vector<9x256xf32>
    %61 = tpu.matmul %60, %54, %cst_36 {dimension_numbers = #tpu.dot_dimension_numbers<[1], [0], [0], [1], [0, 0, 1, 1], [], []>} : vector<9x4xf32>, vector<4x256xf32>, vector<9x256xf32> -> vector<9x256xf32>
    %62 = arith.addf %48, %61 : vector<9x256xf32>
    %63 = vector.extract_strided_slice %4 {offsets = [4, 0], sizes = [1, 256], strides = [1, 1]} : vector<9x256xf32> to vector<1x256xf32>
    %64 = vector.broadcast %63 : vector<1x256xf32> to vector<4x256xf32>
    %65 = arith.mulf %1, %64 : vector<4x256xf32>
    %c4 = arith.constant 4 : index
    %c0_37 = arith.constant 0 : index
    %c0_38 = arith.constant 0 : index
    %66 = vector.load %arg3[%c4, %c0_37, %c0_38] : memref<9x9x4xf32, #tpu.memory_space<vmem>>, vector<1x9x4xf32>
    %67 = vector.shape_cast %66 : vector<1x9x4xf32> to vector<9x4xf32>
    %cst_39 = arith.constant dense<0.000000e+00> : vector<9x256xf32>
    %68 = tpu.matmul %67, %65, %cst_39 {dimension_numbers = #tpu.dot_dimension_numbers<[1], [0], [0], [1], [0, 0, 1, 1], [], []>} : vector<9x4xf32>, vector<4x256xf32>, vector<9x256xf32> -> vector<9x256xf32>
    %69 = arith.addf %58, %68 : vector<9x256xf32>
    %c4_40 = arith.constant 4 : index
    %c0_41 = arith.constant 0 : index
    %c0_42 = arith.constant 0 : index
    %70 = vector.load %arg4[%c4_40, %c0_41, %c0_42] : memref<9x9x4xf32, #tpu.memory_space<vmem>>, vector<1x9x4xf32>
    %71 = vector.shape_cast %70 : vector<1x9x4xf32> to vector<9x4xf32>
    %cst_43 = arith.constant dense<0.000000e+00> : vector<9x256xf32>
    %72 = tpu.matmul %71, %65, %cst_43 {dimension_numbers = #tpu.dot_dimension_numbers<[1], [0], [0], [1], [0, 0, 1, 1], [], []>} : vector<9x4xf32>, vector<4x256xf32>, vector<9x256xf32> -> vector<9x256xf32>
    %73 = arith.addf %62, %72 : vector<9x256xf32>
    %74 = vector.extract_strided_slice %1 {offsets = [0, 1], sizes = [4, 255], strides = [1, 1]} : vector<4x256xf32> to vector<4x255xf32>
    %75 = vector.extract_strided_slice %1 {offsets = [0, 0], sizes = [4, 1], strides = [1, 1]} : vector<4x256xf32> to vector<4x1xf32>
    %76 = tpu.concatenate %74, %75 in 1 : vector<4x255xf32>, vector<4x1xf32> -> vector<4x256xf32>
    %77 = vector.extract_strided_slice %4 {offsets = [5, 0], sizes = [1, 256], strides = [1, 1]} : vector<9x256xf32> to vector<1x256xf32>
    %78 = vector.broadcast %77 : vector<1x256xf32> to vector<4x256xf32>
    %79 = arith.mulf %76, %78 : vector<4x256xf32>
    %c5 = arith.constant 5 : index
    %c0_44 = arith.constant 0 : index
    %c0_45 = arith.constant 0 : index
    %80 = vector.load %arg3[%c5, %c0_44, %c0_45] : memref<9x9x4xf32, #tpu.memory_space<vmem>>, vector<1x9x4xf32>
    %81 = vector.shape_cast %80 : vector<1x9x4xf32> to vector<9x4xf32>
    %cst_46 = arith.constant dense<0.000000e+00> : vector<9x256xf32>
    %82 = tpu.matmul %81, %79, %cst_46 {dimension_numbers = #tpu.dot_dimension_numbers<[1], [0], [0], [1], [0, 0, 1, 1], [], []>} : vector<9x4xf32>, vector<4x256xf32>, vector<9x256xf32> -> vector<9x256xf32>
    %83 = arith.addf %69, %82 : vector<9x256xf32>
    %c5_47 = arith.constant 5 : index
    %c0_48 = arith.constant 0 : index
    %c0_49 = arith.constant 0 : index
    %84 = vector.load %arg4[%c5_47, %c0_48, %c0_49] : memref<9x9x4xf32, #tpu.memory_space<vmem>>, vector<1x9x4xf32>
    %85 = vector.shape_cast %84 : vector<1x9x4xf32> to vector<9x4xf32>
    %cst_50 = arith.constant dense<0.000000e+00> : vector<9x256xf32>
    %86 = tpu.matmul %85, %79, %cst_50 {dimension_numbers = #tpu.dot_dimension_numbers<[1], [0], [0], [1], [0, 0, 1, 1], [], []>} : vector<9x4xf32>, vector<4x256xf32>, vector<9x256xf32> -> vector<9x256xf32>
    %87 = arith.addf %73, %86 : vector<9x256xf32>
    %88 = vector.extract_strided_slice %1 {offsets = [0, 15], sizes = [4, 241], strides = [1, 1]} : vector<4x256xf32> to vector<4x241xf32>
    %89 = vector.extract_strided_slice %1 {offsets = [0, 0], sizes = [4, 15], strides = [1, 1]} : vector<4x256xf32> to vector<4x15xf32>
    %90 = tpu.concatenate %88, %89 in 1 : vector<4x241xf32>, vector<4x15xf32> -> vector<4x256xf32>
    %91 = vector.extract_strided_slice %4 {offsets = [6, 0], sizes = [1, 256], strides = [1, 1]} : vector<9x256xf32> to vector<1x256xf32>
    %92 = vector.broadcast %91 : vector<1x256xf32> to vector<4x256xf32>
    %93 = arith.mulf %90, %92 : vector<4x256xf32>
    %c6 = arith.constant 6 : index
    %c0_51 = arith.constant 0 : index
    %c0_52 = arith.constant 0 : index
    %94 = vector.load %arg3[%c6, %c0_51, %c0_52] : memref<9x9x4xf32, #tpu.memory_space<vmem>>, vector<1x9x4xf32>
    %95 = vector.shape_cast %94 : vector<1x9x4xf32> to vector<9x4xf32>
    %cst_53 = arith.constant dense<0.000000e+00> : vector<9x256xf32>
    %96 = tpu.matmul %95, %93, %cst_53 {dimension_numbers = #tpu.dot_dimension_numbers<[1], [0], [0], [1], [0, 0, 1, 1], [], []>} : vector<9x4xf32>, vector<4x256xf32>, vector<9x256xf32> -> vector<9x256xf32>
    %97 = arith.addf %83, %96 : vector<9x256xf32>
    %c6_54 = arith.constant 6 : index
    %c0_55 = arith.constant 0 : index
    %c0_56 = arith.constant 0 : index
    %98 = vector.load %arg4[%c6_54, %c0_55, %c0_56] : memref<9x9x4xf32, #tpu.memory_space<vmem>>, vector<1x9x4xf32>
    %99 = vector.shape_cast %98 : vector<1x9x4xf32> to vector<9x4xf32>
    %cst_57 = arith.constant dense<0.000000e+00> : vector<9x256xf32>
    %100 = tpu.matmul %99, %93, %cst_57 {dimension_numbers = #tpu.dot_dimension_numbers<[1], [0], [0], [1], [0, 0, 1, 1], [], []>} : vector<9x4xf32>, vector<4x256xf32>, vector<9x256xf32> -> vector<9x256xf32>
    %101 = arith.addf %87, %100 : vector<9x256xf32>
    %102 = vector.extract_strided_slice %1 {offsets = [0, 16], sizes = [4, 240], strides = [1, 1]} : vector<4x256xf32> to vector<4x240xf32>
    %103 = vector.extract_strided_slice %1 {offsets = [0, 0], sizes = [4, 16], strides = [1, 1]} : vector<4x256xf32> to vector<4x16xf32>
    %104 = tpu.concatenate %102, %103 in 1 : vector<4x240xf32>, vector<4x16xf32> -> vector<4x256xf32>
    %105 = vector.extract_strided_slice %4 {offsets = [7, 0], sizes = [1, 256], strides = [1, 1]} : vector<9x256xf32> to vector<1x256xf32>
    %106 = vector.broadcast %105 : vector<1x256xf32> to vector<4x256xf32>
    %107 = arith.mulf %104, %106 : vector<4x256xf32>
    %c7 = arith.constant 7 : index
    %c0_58 = arith.constant 0 : index
    %c0_59 = arith.constant 0 : index
    %108 = vector.load %arg3[%c7, %c0_58, %c0_59] : memref<9x9x4xf32, #tpu.memory_space<vmem>>, vector<1x9x4xf32>
    %109 = vector.shape_cast %108 : vector<1x9x4xf32> to vector<9x4xf32>
    %cst_60 = arith.constant dense<0.000000e+00> : vector<9x256xf32>
    %110 = tpu.matmul %109, %107, %cst_60 {dimension_numbers = #tpu.dot_dimension_numbers<[1], [0], [0], [1], [0, 0, 1, 1], [], []>} : vector<9x4xf32>, vector<4x256xf32>, vector<9x256xf32> -> vector<9x256xf32>
    %111 = arith.addf %97, %110 : vector<9x256xf32>
    %c7_61 = arith.constant 7 : index
    %c0_62 = arith.constant 0 : index
    %c0_63 = arith.constant 0 : index
    %112 = vector.load %arg4[%c7_61, %c0_62, %c0_63] : memref<9x9x4xf32, #tpu.memory_space<vmem>>, vector<1x9x4xf32>
    %113 = vector.shape_cast %112 : vector<1x9x4xf32> to vector<9x4xf32>
    %cst_64 = arith.constant dense<0.000000e+00> : vector<9x256xf32>
    %114 = tpu.matmul %113, %107, %cst_64 {dimension_numbers = #tpu.dot_dimension_numbers<[1], [0], [0], [1], [0, 0, 1, 1], [], []>} : vector<9x4xf32>, vector<4x256xf32>, vector<9x256xf32> -> vector<9x256xf32>
    %115 = arith.addf %101, %114 : vector<9x256xf32>
    %116 = vector.extract_strided_slice %1 {offsets = [0, 17], sizes = [4, 239], strides = [1, 1]} : vector<4x256xf32> to vector<4x239xf32>
    %117 = vector.extract_strided_slice %1 {offsets = [0, 0], sizes = [4, 17], strides = [1, 1]} : vector<4x256xf32> to vector<4x17xf32>
    %118 = tpu.concatenate %116, %117 in 1 : vector<4x239xf32>, vector<4x17xf32> -> vector<4x256xf32>
    %119 = vector.extract_strided_slice %4 {offsets = [8, 0], sizes = [1, 256], strides = [1, 1]} : vector<9x256xf32> to vector<1x256xf32>
    %120 = vector.broadcast %119 : vector<1x256xf32> to vector<4x256xf32>
    %121 = arith.mulf %118, %120 : vector<4x256xf32>
    %c8 = arith.constant 8 : index
    %c0_65 = arith.constant 0 : index
    %c0_66 = arith.constant 0 : index
    %122 = vector.load %arg3[%c8, %c0_65, %c0_66] : memref<9x9x4xf32, #tpu.memory_space<vmem>>, vector<1x9x4xf32>
    %123 = vector.shape_cast %122 : vector<1x9x4xf32> to vector<9x4xf32>
    %cst_67 = arith.constant dense<0.000000e+00> : vector<9x256xf32>
    %124 = tpu.matmul %123, %121, %cst_67 {dimension_numbers = #tpu.dot_dimension_numbers<[1], [0], [0], [1], [0, 0, 1, 1], [], []>} : vector<9x4xf32>, vector<4x256xf32>, vector<9x256xf32> -> vector<9x256xf32>
    %125 = arith.addf %111, %124 : vector<9x256xf32>
    %c8_68 = arith.constant 8 : index
    %c0_69 = arith.constant 0 : index
    %c0_70 = arith.constant 0 : index
    %126 = vector.load %arg4[%c8_68, %c0_69, %c0_70] : memref<9x9x4xf32, #tpu.memory_space<vmem>>, vector<1x9x4xf32>
    %127 = vector.shape_cast %126 : vector<1x9x4xf32> to vector<9x4xf32>
    %cst_71 = arith.constant dense<0.000000e+00> : vector<9x256xf32>
    %128 = tpu.matmul %127, %121, %cst_71 {dimension_numbers = #tpu.dot_dimension_numbers<[1], [0], [0], [1], [0, 0, 1, 1], [], []>} : vector<9x4xf32>, vector<4x256xf32>, vector<9x256xf32> -> vector<9x256xf32>
    %129 = arith.addf %115, %128 : vector<9x256xf32>
    %c0_72 = arith.constant 0 : index
    %c0_73 = arith.constant 0 : index
    %130 = vector.load %arg5[%c0_72, %c0_73] : memref<9x1xf32, #tpu.memory_space<vmem>>, vector<9x1xf32>
    %131 = vector.broadcast %130 : vector<9x1xf32> to vector<9x256xf32>
    %132 = arith.addf %125, %131 : vector<9x256xf32>
    %c0_74 = arith.constant 0 : index
    %c0_75 = arith.constant 0 : index
    %133 = vector.load %arg6[%c0_74, %c0_75] : memref<9x1xf32, #tpu.memory_space<vmem>>, vector<9x1xf32>
    %134 = vector.broadcast %133 : vector<9x1xf32> to vector<9x256xf32>
    %135 = arith.addf %129, %134 : vector<9x256xf32>
    %c0_76 = arith.constant 0 : index
    %c0_77 = arith.constant 0 : index
    %136 = vector.load %arg7[%c0_76, %c0_77] : memref<9x256xf32, #tpu.memory_space<vmem>>, vector<9x256xf32>
    %137 = arith.addf %136, %132 : vector<9x256xf32>
    %c0_78 = arith.constant 0 : index
    %c0_79 = arith.constant 0 : index
    %138 = vector.load %arg8[%c0_78, %c0_79] : memref<9x256xf32, #tpu.memory_space<vmem>>, vector<9x256xf32>
    %139 = arith.addf %138, %135 : vector<9x256xf32>
    %140 = math.floor %137 : vector<9x256xf32>
    %141 = math.floor %139 : vector<9x256xf32>
    %cst_80 = arith.constant 0.000000e+00 : f32
    %cst_81 = arith.constant 1.500000e+01 : f32
    %142 = vector.broadcast %cst_80 : f32 to vector<9x256xf32>
    %143 = arith.maximumf %142, %140 : vector<9x256xf32>
    %144 = vector.broadcast %cst_81 : f32 to vector<9x256xf32>
    %145 = arith.minimumf %144, %143 : vector<9x256xf32>
    %cst_82 = arith.constant 1.000000e+00 : f32
    %146 = vector.broadcast %cst_82 : f32 to vector<9x256xf32>
    %147 = arith.addf %140, %146 : vector<9x256xf32>
    %cst_83 = arith.constant 0.000000e+00 : f32
    %cst_84 = arith.constant 1.500000e+01 : f32
    %148 = vector.broadcast %cst_83 : f32 to vector<9x256xf32>
    %149 = arith.maximumf %148, %147 : vector<9x256xf32>
    %150 = vector.broadcast %cst_84 : f32 to vector<9x256xf32>
    %151 = arith.minimumf %150, %149 : vector<9x256xf32>
    %cst_85 = arith.constant 0.000000e+00 : f32
    %cst_86 = arith.constant 1.500000e+01 : f32
    %152 = vector.broadcast %cst_85 : f32 to vector<9x256xf32>
    %153 = arith.maximumf %152, %141 : vector<9x256xf32>
    %154 = vector.broadcast %cst_86 : f32 to vector<9x256xf32>
    %155 = arith.minimumf %154, %153 : vector<9x256xf32>
    %cst_87 = arith.constant 1.000000e+00 : f32
    %156 = vector.broadcast %cst_87 : f32 to vector<9x256xf32>
    %157 = arith.addf %141, %156 : vector<9x256xf32>
    %cst_88 = arith.constant 0.000000e+00 : f32
    %cst_89 = arith.constant 1.500000e+01 : f32
    %158 = vector.broadcast %cst_88 : f32 to vector<9x256xf32>
    %159 = arith.maximumf %158, %157 : vector<9x256xf32>
    %160 = vector.broadcast %cst_89 : f32 to vector<9x256xf32>
    %161 = arith.minimumf %160, %159 : vector<9x256xf32>
    %cst_90 = arith.constant 0.000000e+00 : f32
    %cst_91 = arith.constant 1.500000e+01 : f32
    %162 = vector.broadcast %cst_90 : f32 to vector<9x256xf32>
    %163 = arith.maximumf %162, %137 : vector<9x256xf32>
    %164 = vector.broadcast %cst_91 : f32 to vector<9x256xf32>
    %165 = arith.minimumf %164, %163 : vector<9x256xf32>
    %cst_92 = arith.constant 0.000000e+00 : f32
    %cst_93 = arith.constant 1.500000e+01 : f32
    %166 = vector.broadcast %cst_92 : f32 to vector<9x256xf32>
    %167 = arith.maximumf %166, %139 : vector<9x256xf32>
    %168 = vector.broadcast %cst_93 : f32 to vector<9x256xf32>
    %169 = arith.minimumf %168, %167 : vector<9x256xf32>
    %170 = arith.subf %145, %165 : vector<9x256xf32>
    %cst_94 = arith.constant 1.000000e+00 : f32
    %171 = vector.broadcast %cst_94 : f32 to vector<9x256xf32>
    %172 = arith.addf %171, %170 : vector<9x256xf32>
    %173 = arith.subf %151, %165 : vector<9x256xf32>
    %cst_95 = arith.constant 1.000000e+00 : f32
    %174 = vector.broadcast %cst_95 : f32 to vector<9x256xf32>
    %175 = arith.subf %174, %173 : vector<9x256xf32>
    %176 = arith.subf %155, %169 : vector<9x256xf32>
    %cst_96 = arith.constant 1.000000e+00 : f32
    %177 = vector.broadcast %cst_96 : f32 to vector<9x256xf32>
    %178 = arith.addf %177, %176 : vector<9x256xf32>
    %179 = arith.subf %161, %169 : vector<9x256xf32>
    %cst_97 = arith.constant 1.000000e+00 : f32
    %180 = vector.broadcast %cst_97 : f32 to vector<9x256xf32>
    %181 = arith.subf %180, %179 : vector<9x256xf32>
    %182 = arith.fptosi %145 : vector<9x256xf32> to vector<9x256xi32>
    %183 = arith.fptosi %151 : vector<9x256xf32> to vector<9x256xi32>
    %184 = arith.fptosi %155 : vector<9x256xf32> to vector<9x256xi32>
    %185 = arith.fptosi %161 : vector<9x256xf32> to vector<9x256xi32>
    %186 = tpu.iota {dimensions = array<i32: 0>} : vector<16x256xi32>
    %187 = tpu.iota {dimensions = array<i32: 0>} : vector<16x256xi32>
    %cst_98 = arith.constant 0.000000e+00 : f32
    %188 = vector.broadcast %cst_98 : f32 to vector<8x256xf32>
    %189 = vector.extract_strided_slice %184 {offsets = [0, 0], sizes = [1, 256], strides = [1, 1]} : vector<9x256xi32> to vector<1x256xi32>
    %190 = vector.broadcast %189 : vector<1x256xi32> to vector<16x256xi32>
    %191 = arith.cmpi eq, %187, %190 : vector<16x256xi32>
    %192 = vector.extract_strided_slice %178 {offsets = [0, 0], sizes = [1, 256], strides = [1, 1]} : vector<9x256xf32> to vector<1x256xf32>
    %cst_99 = arith.constant 0.000000e+00 : f32
    %193 = vector.shape_cast %192 : vector<1x256xf32> to vector<1x256xf32>
    %194 = vector.broadcast %193 : vector<1x256xf32> to vector<16x256xf32>
    %195 = vector.broadcast %cst_99 : f32 to vector<16x256xf32>
    %196 = arith.select %191, %194, %195 : vector<16x256xi1>, vector<16x256xf32>
    %197 = vector.extract_strided_slice %185 {offsets = [0, 0], sizes = [1, 256], strides = [1, 1]} : vector<9x256xi32> to vector<1x256xi32>
    %198 = vector.broadcast %197 : vector<1x256xi32> to vector<16x256xi32>
    %199 = arith.cmpi eq, %187, %198 : vector<16x256xi32>
    %200 = vector.extract_strided_slice %181 {offsets = [0, 0], sizes = [1, 256], strides = [1, 1]} : vector<9x256xf32> to vector<1x256xf32>
    %cst_100 = arith.constant 0.000000e+00 : f32
    %201 = vector.shape_cast %200 : vector<1x256xf32> to vector<1x256xf32>
    %202 = vector.broadcast %201 : vector<1x256xf32> to vector<16x256xf32>
    %203 = vector.broadcast %cst_100 : f32 to vector<16x256xf32>
    %204 = arith.select %199, %202, %203 : vector<16x256xi1>, vector<16x256xf32>
    %205 = arith.addf %196, %204 : vector<16x256xf32>
    %206 = vector.extract_strided_slice %182 {offsets = [0, 0], sizes = [1, 256], strides = [1, 1]} : vector<9x256xi32> to vector<1x256xi32>
    %207 = vector.broadcast %206 : vector<1x256xi32> to vector<16x256xi32>
    %208 = arith.cmpi eq, %186, %207 : vector<16x256xi32>
    %209 = vector.extract_strided_slice %172 {offsets = [0, 0], sizes = [1, 256], strides = [1, 1]} : vector<9x256xf32> to vector<1x256xf32>
    %cst_101 = arith.constant 0.000000e+00 : f32
    %210 = vector.shape_cast %209 : vector<1x256xf32> to vector<1x256xf32>
    %211 = vector.broadcast %210 : vector<1x256xf32> to vector<16x256xf32>
    %212 = vector.broadcast %cst_101 : f32 to vector<16x256xf32>
    %213 = arith.select %208, %211, %212 : vector<16x256xi1>, vector<16x256xf32>
    %214 = vector.extract_strided_slice %183 {offsets = [0, 0], sizes = [1, 256], strides = [1, 1]} : vector<9x256xi32> to vector<1x256xi32>
    %215 = vector.broadcast %214 : vector<1x256xi32> to vector<16x256xi32>
    %216 = arith.cmpi eq, %186, %215 : vector<16x256xi32>
    %217 = vector.extract_strided_slice %175 {offsets = [0, 0], sizes = [1, 256], strides = [1, 1]} : vector<9x256xf32> to vector<1x256xf32>
    %cst_102 = arith.constant 0.000000e+00 : f32
    %218 = vector.shape_cast %217 : vector<1x256xf32> to vector<1x256xf32>
    %219 = vector.broadcast %218 : vector<1x256xf32> to vector<16x256xf32>
    %220 = vector.broadcast %cst_102 : f32 to vector<16x256xf32>
    %221 = arith.select %216, %219, %220 : vector<16x256xi1>, vector<16x256xf32>
    %222 = arith.addf %213, %221 : vector<16x256xf32>
    %cst_103 = arith.constant dense<0.000000e+00> : vector<64x256xf32>
    %223 = tpu.matmul %3, %205, %cst_103 {dimension_numbers = #tpu.dot_dimension_numbers<[1], [0], [0], [1], [0, 0, 1, 1], [], []>} : vector<64x16xf32>, vector<16x256xf32>, vector<64x256xf32> -> vector<64x256xf32>
    %224 = vector.shape_cast %223 : vector<64x256xf32> to vector<4x16x256xf32>
    %225 = vector.shape_cast %222 : vector<16x256xf32> to vector<1x16x256xf32>
    %226 = vector.broadcast %225 : vector<1x16x256xf32> to vector<4x16x256xf32>
    %227 = arith.mulf %224, %226 : vector<4x16x256xf32>
    %228 = vector.shape_cast %227 : vector<4x16x256xf32> to vector<64x256xf32>
    %c0_104 = arith.constant 0 : index
    %c0_105 = arith.constant 0 : index
    %c0_106 = arith.constant 0 : index
    %229 = vector.load %arg10[%c0_104, %c0_105, %c0_106] : memref<9x8x64xf32, #tpu.memory_space<vmem>>, vector<1x8x64xf32>
    %230 = vector.shape_cast %229 : vector<1x8x64xf32> to vector<8x64xf32>
    %cst_107 = arith.constant dense<0.000000e+00> : vector<8x256xf32>
    %231 = tpu.matmul %230, %228, %cst_107 {dimension_numbers = #tpu.dot_dimension_numbers<[1], [0], [0], [1], [0, 0, 1, 1], [], []>} : vector<8x64xf32>, vector<64x256xf32>, vector<8x256xf32> -> vector<8x256xf32>
    %232 = arith.addf %188, %231 : vector<8x256xf32>
    %233 = vector.extract_strided_slice %184 {offsets = [1, 0], sizes = [1, 256], strides = [1, 1]} : vector<9x256xi32> to vector<1x256xi32>
    %234 = vector.broadcast %233 : vector<1x256xi32> to vector<16x256xi32>
    %235 = arith.cmpi eq, %187, %234 : vector<16x256xi32>
    %236 = vector.extract_strided_slice %178 {offsets = [1, 0], sizes = [1, 256], strides = [1, 1]} : vector<9x256xf32> to vector<1x256xf32>
    %cst_108 = arith.constant 0.000000e+00 : f32
    %237 = vector.shape_cast %236 : vector<1x256xf32> to vector<1x256xf32>
    %238 = vector.broadcast %237 : vector<1x256xf32> to vector<16x256xf32>
    %239 = vector.broadcast %cst_108 : f32 to vector<16x256xf32>
    %240 = arith.select %235, %238, %239 : vector<16x256xi1>, vector<16x256xf32>
    %241 = vector.extract_strided_slice %185 {offsets = [1, 0], sizes = [1, 256], strides = [1, 1]} : vector<9x256xi32> to vector<1x256xi32>
    %242 = vector.broadcast %241 : vector<1x256xi32> to vector<16x256xi32>
    %243 = arith.cmpi eq, %187, %242 : vector<16x256xi32>
    %244 = vector.extract_strided_slice %181 {offsets = [1, 0], sizes = [1, 256], strides = [1, 1]} : vector<9x256xf32> to vector<1x256xf32>
    %cst_109 = arith.constant 0.000000e+00 : f32
    %245 = vector.shape_cast %244 : vector<1x256xf32> to vector<1x256xf32>
    %246 = vector.broadcast %245 : vector<1x256xf32> to vector<16x256xf32>
    %247 = vector.broadcast %cst_109 : f32 to vector<16x256xf32>
    %248 = arith.select %243, %246, %247 : vector<16x256xi1>, vector<16x256xf32>
    %249 = arith.addf %240, %248 : vector<16x256xf32>
    %250 = vector.extract_strided_slice %182 {offsets = [1, 0], sizes = [1, 256], strides = [1, 1]} : vector<9x256xi32> to vector<1x256xi32>
    %251 = vector.broadcast %250 : vector<1x256xi32> to vector<16x256xi32>
    %252 = arith.cmpi eq, %186, %251 : vector<16x256xi32>
    %253 = vector.extract_strided_slice %172 {offsets = [1, 0], sizes = [1, 256], strides = [1, 1]} : vector<9x256xf32> to vector<1x256xf32>
    %cst_110 = arith.constant 0.000000e+00 : f32
    %254 = vector.shape_cast %253 : vector<1x256xf32> to vector<1x256xf32>
    %255 = vector.broadcast %254 : vector<1x256xf32> to vector<16x256xf32>
    %256 = vector.broadcast %cst_110 : f32 to vector<16x256xf32>
    %257 = arith.select %252, %255, %256 : vector<16x256xi1>, vector<16x256xf32>
    %258 = vector.extract_strided_slice %183 {offsets = [1, 0], sizes = [1, 256], strides = [1, 1]} : vector<9x256xi32> to vector<1x256xi32>
    %259 = vector.broadcast %258 : vector<1x256xi32> to vector<16x256xi32>
    %260 = arith.cmpi eq, %186, %259 : vector<16x256xi32>
    %261 = vector.extract_strided_slice %175 {offsets = [1, 0], sizes = [1, 256], strides = [1, 1]} : vector<9x256xf32> to vector<1x256xf32>
    %cst_111 = arith.constant 0.000000e+00 : f32
    %262 = vector.shape_cast %261 : vector<1x256xf32> to vector<1x256xf32>
    %263 = vector.broadcast %262 : vector<1x256xf32> to vector<16x256xf32>
    %264 = vector.broadcast %cst_111 : f32 to vector<16x256xf32>
    %265 = arith.select %260, %263, %264 : vector<16x256xi1>, vector<16x256xf32>
    %266 = arith.addf %257, %265 : vector<16x256xf32>
    %cst_112 = arith.constant dense<0.000000e+00> : vector<64x256xf32>
    %267 = tpu.matmul %3, %249, %cst_112 {dimension_numbers = #tpu.dot_dimension_numbers<[1], [0], [0], [1], [0, 0, 1, 1], [], []>} : vector<64x16xf32>, vector<16x256xf32>, vector<64x256xf32> -> vector<64x256xf32>
    %268 = vector.shape_cast %267 : vector<64x256xf32> to vector<4x16x256xf32>
    %269 = vector.shape_cast %266 : vector<16x256xf32> to vector<1x16x256xf32>
    %270 = vector.broadcast %269 : vector<1x16x256xf32> to vector<4x16x256xf32>
    %271 = arith.mulf %268, %270 : vector<4x16x256xf32>
    %272 = vector.shape_cast %271 : vector<4x16x256xf32> to vector<64x256xf32>
    %c1_113 = arith.constant 1 : index
    %c0_114 = arith.constant 0 : index
    %c0_115 = arith.constant 0 : index
    %273 = vector.load %arg10[%c1_113, %c0_114, %c0_115] : memref<9x8x64xf32, #tpu.memory_space<vmem>>, vector<1x8x64xf32>
    %274 = vector.shape_cast %273 : vector<1x8x64xf32> to vector<8x64xf32>
    %cst_116 = arith.constant dense<0.000000e+00> : vector<8x256xf32>
    %275 = tpu.matmul %274, %272, %cst_116 {dimension_numbers = #tpu.dot_dimension_numbers<[1], [0], [0], [1], [0, 0, 1, 1], [], []>} : vector<8x64xf32>, vector<64x256xf32>, vector<8x256xf32> -> vector<8x256xf32>
    %276 = arith.addf %232, %275 : vector<8x256xf32>
    %277 = vector.extract_strided_slice %184 {offsets = [2, 0], sizes = [1, 256], strides = [1, 1]} : vector<9x256xi32> to vector<1x256xi32>
    %278 = vector.broadcast %277 : vector<1x256xi32> to vector<16x256xi32>
    %279 = arith.cmpi eq, %187, %278 : vector<16x256xi32>
    %280 = vector.extract_strided_slice %178 {offsets = [2, 0], sizes = [1, 256], strides = [1, 1]} : vector<9x256xf32> to vector<1x256xf32>
    %cst_117 = arith.constant 0.000000e+00 : f32
    %281 = vector.shape_cast %280 : vector<1x256xf32> to vector<1x256xf32>
    %282 = vector.broadcast %281 : vector<1x256xf32> to vector<16x256xf32>
    %283 = vector.broadcast %cst_117 : f32 to vector<16x256xf32>
    %284 = arith.select %279, %282, %283 : vector<16x256xi1>, vector<16x256xf32>
    %285 = vector.extract_strided_slice %185 {offsets = [2, 0], sizes = [1, 256], strides = [1, 1]} : vector<9x256xi32> to vector<1x256xi32>
    %286 = vector.broadcast %285 : vector<1x256xi32> to vector<16x256xi32>
    %287 = arith.cmpi eq, %187, %286 : vector<16x256xi32>
    %288 = vector.extract_strided_slice %181 {offsets = [2, 0], sizes = [1, 256], strides = [1, 1]} : vector<9x256xf32> to vector<1x256xf32>
    %cst_118 = arith.constant 0.000000e+00 : f32
    %289 = vector.shape_cast %288 : vector<1x256xf32> to vector<1x256xf32>
    %290 = vector.broadcast %289 : vector<1x256xf32> to vector<16x256xf32>
    %291 = vector.broadcast %cst_118 : f32 to vector<16x256xf32>
    %292 = arith.select %287, %290, %291 : vector<16x256xi1>, vector<16x256xf32>
    %293 = arith.addf %284, %292 : vector<16x256xf32>
    %294 = vector.extract_strided_slice %182 {offsets = [2, 0], sizes = [1, 256], strides = [1, 1]} : vector<9x256xi32> to vector<1x256xi32>
    %295 = vector.broadcast %294 : vector<1x256xi32> to vector<16x256xi32>
    %296 = arith.cmpi eq, %186, %295 : vector<16x256xi32>
    %297 = vector.extract_strided_slice %172 {offsets = [2, 0], sizes = [1, 256], strides = [1, 1]} : vector<9x256xf32> to vector<1x256xf32>
    %cst_119 = arith.constant 0.000000e+00 : f32
    %298 = vector.shape_cast %297 : vector<1x256xf32> to vector<1x256xf32>
    %299 = vector.broadcast %298 : vector<1x256xf32> to vector<16x256xf32>
    %300 = vector.broadcast %cst_119 : f32 to vector<16x256xf32>
    %301 = arith.select %296, %299, %300 : vector<16x256xi1>, vector<16x256xf32>
    %302 = vector.extract_strided_slice %183 {offsets = [2, 0], sizes = [1, 256], strides = [1, 1]} : vector<9x256xi32> to vector<1x256xi32>
    %303 = vector.broadcast %302 : vector<1x256xi32> to vector<16x256xi32>
    %304 = arith.cmpi eq, %186, %303 : vector<16x256xi32>
    %305 = vector.extract_strided_slice %175 {offsets = [2, 0], sizes = [1, 256], strides = [1, 1]} : vector<9x256xf32> to vector<1x256xf32>
    %cst_120 = arith.constant 0.000000e+00 : f32
    %306 = vector.shape_cast %305 : vector<1x256xf32> to vector<1x256xf32>
    %307 = vector.broadcast %306 : vector<1x256xf32> to vector<16x256xf32>
    %308 = vector.broadcast %cst_120 : f32 to vector<16x256xf32>
    %309 = arith.select %304, %307, %308 : vector<16x256xi1>, vector<16x256xf32>
    %310 = arith.addf %301, %309 : vector<16x256xf32>
    %cst_121 = arith.constant dense<0.000000e+00> : vector<64x256xf32>
    %311 = tpu.matmul %3, %293, %cst_121 {dimension_numbers = #tpu.dot_dimension_numbers<[1], [0], [0], [1], [0, 0, 1, 1], [], []>} : vector<64x16xf32>, vector<16x256xf32>, vector<64x256xf32> -> vector<64x256xf32>
    %312 = vector.shape_cast %311 : vector<64x256xf32> to vector<4x16x256xf32>
    %313 = vector.shape_cast %310 : vector<16x256xf32> to vector<1x16x256xf32>
    %314 = vector.broadcast %313 : vector<1x16x256xf32> to vector<4x16x256xf32>
    %315 = arith.mulf %312, %314 : vector<4x16x256xf32>
    %316 = vector.shape_cast %315 : vector<4x16x256xf32> to vector<64x256xf32>
    %c2_122 = arith.constant 2 : index
    %c0_123 = arith.constant 0 : index
    %c0_124 = arith.constant 0 : index
    %317 = vector.load %arg10[%c2_122, %c0_123, %c0_124] : memref<9x8x64xf32, #tpu.memory_space<vmem>>, vector<1x8x64xf32>
    %318 = vector.shape_cast %317 : vector<1x8x64xf32> to vector<8x64xf32>
    %cst_125 = arith.constant dense<0.000000e+00> : vector<8x256xf32>
    %319 = tpu.matmul %318, %316, %cst_125 {dimension_numbers = #tpu.dot_dimension_numbers<[1], [0], [0], [1], [0, 0, 1, 1], [], []>} : vector<8x64xf32>, vector<64x256xf32>, vector<8x256xf32> -> vector<8x256xf32>
    %320 = arith.addf %276, %319 : vector<8x256xf32>
    %321 = vector.extract_strided_slice %184 {offsets = [3, 0], sizes = [1, 256], strides = [1, 1]} : vector<9x256xi32> to vector<1x256xi32>
    %322 = vector.broadcast %321 : vector<1x256xi32> to vector<16x256xi32>
    %323 = arith.cmpi eq, %187, %322 : vector<16x256xi32>
    %324 = vector.extract_strided_slice %178 {offsets = [3, 0], sizes = [1, 256], strides = [1, 1]} : vector<9x256xf32> to vector<1x256xf32>
    %cst_126 = arith.constant 0.000000e+00 : f32
    %325 = vector.shape_cast %324 : vector<1x256xf32> to vector<1x256xf32>
    %326 = vector.broadcast %325 : vector<1x256xf32> to vector<16x256xf32>
    %327 = vector.broadcast %cst_126 : f32 to vector<16x256xf32>
    %328 = arith.select %323, %326, %327 : vector<16x256xi1>, vector<16x256xf32>
    %329 = vector.extract_strided_slice %185 {offsets = [3, 0], sizes = [1, 256], strides = [1, 1]} : vector<9x256xi32> to vector<1x256xi32>
    %330 = vector.broadcast %329 : vector<1x256xi32> to vector<16x256xi32>
    %331 = arith.cmpi eq, %187, %330 : vector<16x256xi32>
    %332 = vector.extract_strided_slice %181 {offsets = [3, 0], sizes = [1, 256], strides = [1, 1]} : vector<9x256xf32> to vector<1x256xf32>
    %cst_127 = arith.constant 0.000000e+00 : f32
    %333 = vector.shape_cast %332 : vector<1x256xf32> to vector<1x256xf32>
    %334 = vector.broadcast %333 : vector<1x256xf32> to vector<16x256xf32>
    %335 = vector.broadcast %cst_127 : f32 to vector<16x256xf32>
    %336 = arith.select %331, %334, %335 : vector<16x256xi1>, vector<16x256xf32>
    %337 = arith.addf %328, %336 : vector<16x256xf32>
    %338 = vector.extract_strided_slice %182 {offsets = [3, 0], sizes = [1, 256], strides = [1, 1]} : vector<9x256xi32> to vector<1x256xi32>
    %339 = vector.broadcast %338 : vector<1x256xi32> to vector<16x256xi32>
    %340 = arith.cmpi eq, %186, %339 : vector<16x256xi32>
    %341 = vector.extract_strided_slice %172 {offsets = [3, 0], sizes = [1, 256], strides = [1, 1]} : vector<9x256xf32> to vector<1x256xf32>
    %cst_128 = arith.constant 0.000000e+00 : f32
    %342 = vector.shape_cast %341 : vector<1x256xf32> to vector<1x256xf32>
    %343 = vector.broadcast %342 : vector<1x256xf32> to vector<16x256xf32>
    %344 = vector.broadcast %cst_128 : f32 to vector<16x256xf32>
    %345 = arith.select %340, %343, %344 : vector<16x256xi1>, vector<16x256xf32>
    %346 = vector.extract_strided_slice %183 {offsets = [3, 0], sizes = [1, 256], strides = [1, 1]} : vector<9x256xi32> to vector<1x256xi32>
    %347 = vector.broadcast %346 : vector<1x256xi32> to vector<16x256xi32>
    %348 = arith.cmpi eq, %186, %347 : vector<16x256xi32>
    %349 = vector.extract_strided_slice %175 {offsets = [3, 0], sizes = [1, 256], strides = [1, 1]} : vector<9x256xf32> to vector<1x256xf32>
    %cst_129 = arith.constant 0.000000e+00 : f32
    %350 = vector.shape_cast %349 : vector<1x256xf32> to vector<1x256xf32>
    %351 = vector.broadcast %350 : vector<1x256xf32> to vector<16x256xf32>
    %352 = vector.broadcast %cst_129 : f32 to vector<16x256xf32>
    %353 = arith.select %348, %351, %352 : vector<16x256xi1>, vector<16x256xf32>
    %354 = arith.addf %345, %353 : vector<16x256xf32>
    %cst_130 = arith.constant dense<0.000000e+00> : vector<64x256xf32>
    %355 = tpu.matmul %3, %337, %cst_130 {dimension_numbers = #tpu.dot_dimension_numbers<[1], [0], [0], [1], [0, 0, 1, 1], [], []>} : vector<64x16xf32>, vector<16x256xf32>, vector<64x256xf32> -> vector<64x256xf32>
    %356 = vector.shape_cast %355 : vector<64x256xf32> to vector<4x16x256xf32>
    %357 = vector.shape_cast %354 : vector<16x256xf32> to vector<1x16x256xf32>
    %358 = vector.broadcast %357 : vector<1x16x256xf32> to vector<4x16x256xf32>
    %359 = arith.mulf %356, %358 : vector<4x16x256xf32>
    %360 = vector.shape_cast %359 : vector<4x16x256xf32> to vector<64x256xf32>
    %c3_131 = arith.constant 3 : index
    %c0_132 = arith.constant 0 : index
    %c0_133 = arith.constant 0 : index
    %361 = vector.load %arg10[%c3_131, %c0_132, %c0_133] : memref<9x8x64xf32, #tpu.memory_space<vmem>>, vector<1x8x64xf32>
    %362 = vector.shape_cast %361 : vector<1x8x64xf32> to vector<8x64xf32>
    %cst_134 = arith.constant dense<0.000000e+00> : vector<8x256xf32>
    %363 = tpu.matmul %362, %360, %cst_134 {dimension_numbers = #tpu.dot_dimension_numbers<[1], [0], [0], [1], [0, 0, 1, 1], [], []>} : vector<8x64xf32>, vector<64x256xf32>, vector<8x256xf32> -> vector<8x256xf32>
    %364 = arith.addf %320, %363 : vector<8x256xf32>
    %365 = vector.extract_strided_slice %184 {offsets = [4, 0], sizes = [1, 256], strides = [1, 1]} : vector<9x256xi32> to vector<1x256xi32>
    %366 = vector.broadcast %365 : vector<1x256xi32> to vector<16x256xi32>
    %367 = arith.cmpi eq, %187, %366 : vector<16x256xi32>
    %368 = vector.extract_strided_slice %178 {offsets = [4, 0], sizes = [1, 256], strides = [1, 1]} : vector<9x256xf32> to vector<1x256xf32>
    %cst_135 = arith.constant 0.000000e+00 : f32
    %369 = vector.shape_cast %368 : vector<1x256xf32> to vector<1x256xf32>
    %370 = vector.broadcast %369 : vector<1x256xf32> to vector<16x256xf32>
    %371 = vector.broadcast %cst_135 : f32 to vector<16x256xf32>
    %372 = arith.select %367, %370, %371 : vector<16x256xi1>, vector<16x256xf32>
    %373 = vector.extract_strided_slice %185 {offsets = [4, 0], sizes = [1, 256], strides = [1, 1]} : vector<9x256xi32> to vector<1x256xi32>
    %374 = vector.broadcast %373 : vector<1x256xi32> to vector<16x256xi32>
    %375 = arith.cmpi eq, %187, %374 : vector<16x256xi32>
    %376 = vector.extract_strided_slice %181 {offsets = [4, 0], sizes = [1, 256], strides = [1, 1]} : vector<9x256xf32> to vector<1x256xf32>
    %cst_136 = arith.constant 0.000000e+00 : f32
    %377 = vector.shape_cast %376 : vector<1x256xf32> to vector<1x256xf32>
    %378 = vector.broadcast %377 : vector<1x256xf32> to vector<16x256xf32>
    %379 = vector.broadcast %cst_136 : f32 to vector<16x256xf32>
    %380 = arith.select %375, %378, %379 : vector<16x256xi1>, vector<16x256xf32>
    %381 = arith.addf %372, %380 : vector<16x256xf32>
    %382 = vector.extract_strided_slice %182 {offsets = [4, 0], sizes = [1, 256], strides = [1, 1]} : vector<9x256xi32> to vector<1x256xi32>
    %383 = vector.broadcast %382 : vector<1x256xi32> to vector<16x256xi32>
    %384 = arith.cmpi eq, %186, %383 : vector<16x256xi32>
    %385 = vector.extract_strided_slice %172 {offsets = [4, 0], sizes = [1, 256], strides = [1, 1]} : vector<9x256xf32> to vector<1x256xf32>
    %cst_137 = arith.constant 0.000000e+00 : f32
    %386 = vector.shape_cast %385 : vector<1x256xf32> to vector<1x256xf32>
    %387 = vector.broadcast %386 : vector<1x256xf32> to vector<16x256xf32>
    %388 = vector.broadcast %cst_137 : f32 to vector<16x256xf32>
    %389 = arith.select %384, %387, %388 : vector<16x256xi1>, vector<16x256xf32>
    %390 = vector.extract_strided_slice %183 {offsets = [4, 0], sizes = [1, 256], strides = [1, 1]} : vector<9x256xi32> to vector<1x256xi32>
    %391 = vector.broadcast %390 : vector<1x256xi32> to vector<16x256xi32>
    %392 = arith.cmpi eq, %186, %391 : vector<16x256xi32>
    %393 = vector.extract_strided_slice %175 {offsets = [4, 0], sizes = [1, 256], strides = [1, 1]} : vector<9x256xf32> to vector<1x256xf32>
    %cst_138 = arith.constant 0.000000e+00 : f32
    %394 = vector.shape_cast %393 : vector<1x256xf32> to vector<1x256xf32>
    %395 = vector.broadcast %394 : vector<1x256xf32> to vector<16x256xf32>
    %396 = vector.broadcast %cst_138 : f32 to vector<16x256xf32>
    %397 = arith.select %392, %395, %396 : vector<16x256xi1>, vector<16x256xf32>
    %398 = arith.addf %389, %397 : vector<16x256xf32>
    %cst_139 = arith.constant dense<0.000000e+00> : vector<64x256xf32>
    %399 = tpu.matmul %3, %381, %cst_139 {dimension_numbers = #tpu.dot_dimension_numbers<[1], [0], [0], [1], [0, 0, 1, 1], [], []>} : vector<64x16xf32>, vector<16x256xf32>, vector<64x256xf32> -> vector<64x256xf32>
    %400 = vector.shape_cast %399 : vector<64x256xf32> to vector<4x16x256xf32>
    %401 = vector.shape_cast %398 : vector<16x256xf32> to vector<1x16x256xf32>
    %402 = vector.broadcast %401 : vector<1x16x256xf32> to vector<4x16x256xf32>
    %403 = arith.mulf %400, %402 : vector<4x16x256xf32>
    %404 = vector.shape_cast %403 : vector<4x16x256xf32> to vector<64x256xf32>
    %c4_140 = arith.constant 4 : index
    %c0_141 = arith.constant 0 : index
    %c0_142 = arith.constant 0 : index
    %405 = vector.load %arg10[%c4_140, %c0_141, %c0_142] : memref<9x8x64xf32, #tpu.memory_space<vmem>>, vector<1x8x64xf32>
    %406 = vector.shape_cast %405 : vector<1x8x64xf32> to vector<8x64xf32>
    %cst_143 = arith.constant dense<0.000000e+00> : vector<8x256xf32>
    %407 = tpu.matmul %406, %404, %cst_143 {dimension_numbers = #tpu.dot_dimension_numbers<[1], [0], [0], [1], [0, 0, 1, 1], [], []>} : vector<8x64xf32>, vector<64x256xf32>, vector<8x256xf32> -> vector<8x256xf32>
    %408 = arith.addf %364, %407 : vector<8x256xf32>
    %409 = vector.extract_strided_slice %184 {offsets = [5, 0], sizes = [1, 256], strides = [1, 1]} : vector<9x256xi32> to vector<1x256xi32>
    %410 = vector.broadcast %409 : vector<1x256xi32> to vector<16x256xi32>
    %411 = arith.cmpi eq, %187, %410 : vector<16x256xi32>
    %412 = vector.extract_strided_slice %178 {offsets = [5, 0], sizes = [1, 256], strides = [1, 1]} : vector<9x256xf32> to vector<1x256xf32>
    %cst_144 = arith.constant 0.000000e+00 : f32
    %413 = vector.shape_cast %412 : vector<1x256xf32> to vector<1x256xf32>
    %414 = vector.broadcast %413 : vector<1x256xf32> to vector<16x256xf32>
    %415 = vector.broadcast %cst_144 : f32 to vector<16x256xf32>
    %416 = arith.select %411, %414, %415 : vector<16x256xi1>, vector<16x256xf32>
    %417 = vector.extract_strided_slice %185 {offsets = [5, 0], sizes = [1, 256], strides = [1, 1]} : vector<9x256xi32> to vector<1x256xi32>
    %418 = vector.broadcast %417 : vector<1x256xi32> to vector<16x256xi32>
    %419 = arith.cmpi eq, %187, %418 : vector<16x256xi32>
    %420 = vector.extract_strided_slice %181 {offsets = [5, 0], sizes = [1, 256], strides = [1, 1]} : vector<9x256xf32> to vector<1x256xf32>
    %cst_145 = arith.constant 0.000000e+00 : f32
    %421 = vector.shape_cast %420 : vector<1x256xf32> to vector<1x256xf32>
    %422 = vector.broadcast %421 : vector<1x256xf32> to vector<16x256xf32>
    %423 = vector.broadcast %cst_145 : f32 to vector<16x256xf32>
    %424 = arith.select %419, %422, %423 : vector<16x256xi1>, vector<16x256xf32>
    %425 = arith.addf %416, %424 : vector<16x256xf32>
    %426 = vector.extract_strided_slice %182 {offsets = [5, 0], sizes = [1, 256], strides = [1, 1]} : vector<9x256xi32> to vector<1x256xi32>
    %427 = vector.broadcast %426 : vector<1x256xi32> to vector<16x256xi32>
    %428 = arith.cmpi eq, %186, %427 : vector<16x256xi32>
    %429 = vector.extract_strided_slice %172 {offsets = [5, 0], sizes = [1, 256], strides = [1, 1]} : vector<9x256xf32> to vector<1x256xf32>
    %cst_146 = arith.constant 0.000000e+00 : f32
    %430 = vector.shape_cast %429 : vector<1x256xf32> to vector<1x256xf32>
    %431 = vector.broadcast %430 : vector<1x256xf32> to vector<16x256xf32>
    %432 = vector.broadcast %cst_146 : f32 to vector<16x256xf32>
    %433 = arith.select %428, %431, %432 : vector<16x256xi1>, vector<16x256xf32>
    %434 = vector.extract_strided_slice %183 {offsets = [5, 0], sizes = [1, 256], strides = [1, 1]} : vector<9x256xi32> to vector<1x256xi32>
    %435 = vector.broadcast %434 : vector<1x256xi32> to vector<16x256xi32>
    %436 = arith.cmpi eq, %186, %435 : vector<16x256xi32>
    %437 = vector.extract_strided_slice %175 {offsets = [5, 0], sizes = [1, 256], strides = [1, 1]} : vector<9x256xf32> to vector<1x256xf32>
    %cst_147 = arith.constant 0.000000e+00 : f32
    %438 = vector.shape_cast %437 : vector<1x256xf32> to vector<1x256xf32>
    %439 = vector.broadcast %438 : vector<1x256xf32> to vector<16x256xf32>
    %440 = vector.broadcast %cst_147 : f32 to vector<16x256xf32>
    %441 = arith.select %436, %439, %440 : vector<16x256xi1>, vector<16x256xf32>
    %442 = arith.addf %433, %441 : vector<16x256xf32>
    %cst_148 = arith.constant dense<0.000000e+00> : vector<64x256xf32>
    %443 = tpu.matmul %3, %425, %cst_148 {dimension_numbers = #tpu.dot_dimension_numbers<[1], [0], [0], [1], [0, 0, 1, 1], [], []>} : vector<64x16xf32>, vector<16x256xf32>, vector<64x256xf32> -> vector<64x256xf32>
    %444 = vector.shape_cast %443 : vector<64x256xf32> to vector<4x16x256xf32>
    %445 = vector.shape_cast %442 : vector<16x256xf32> to vector<1x16x256xf32>
    %446 = vector.broadcast %445 : vector<1x16x256xf32> to vector<4x16x256xf32>
    %447 = arith.mulf %444, %446 : vector<4x16x256xf32>
    %448 = vector.shape_cast %447 : vector<4x16x256xf32> to vector<64x256xf32>
    %c5_149 = arith.constant 5 : index
    %c0_150 = arith.constant 0 : index
    %c0_151 = arith.constant 0 : index
    %449 = vector.load %arg10[%c5_149, %c0_150, %c0_151] : memref<9x8x64xf32, #tpu.memory_space<vmem>>, vector<1x8x64xf32>
    %450 = vector.shape_cast %449 : vector<1x8x64xf32> to vector<8x64xf32>
    %cst_152 = arith.constant dense<0.000000e+00> : vector<8x256xf32>
    %451 = tpu.matmul %450, %448, %cst_152 {dimension_numbers = #tpu.dot_dimension_numbers<[1], [0], [0], [1], [0, 0, 1, 1], [], []>} : vector<8x64xf32>, vector<64x256xf32>, vector<8x256xf32> -> vector<8x256xf32>
    %452 = arith.addf %408, %451 : vector<8x256xf32>
    %453 = vector.extract_strided_slice %184 {offsets = [6, 0], sizes = [1, 256], strides = [1, 1]} : vector<9x256xi32> to vector<1x256xi32>
    %454 = vector.broadcast %453 : vector<1x256xi32> to vector<16x256xi32>
    %455 = arith.cmpi eq, %187, %454 : vector<16x256xi32>
    %456 = vector.extract_strided_slice %178 {offsets = [6, 0], sizes = [1, 256], strides = [1, 1]} : vector<9x256xf32> to vector<1x256xf32>
    %cst_153 = arith.constant 0.000000e+00 : f32
    %457 = vector.shape_cast %456 : vector<1x256xf32> to vector<1x256xf32>
    %458 = vector.broadcast %457 : vector<1x256xf32> to vector<16x256xf32>
    %459 = vector.broadcast %cst_153 : f32 to vector<16x256xf32>
    %460 = arith.select %455, %458, %459 : vector<16x256xi1>, vector<16x256xf32>
    %461 = vector.extract_strided_slice %185 {offsets = [6, 0], sizes = [1, 256], strides = [1, 1]} : vector<9x256xi32> to vector<1x256xi32>
    %462 = vector.broadcast %461 : vector<1x256xi32> to vector<16x256xi32>
    %463 = arith.cmpi eq, %187, %462 : vector<16x256xi32>
    %464 = vector.extract_strided_slice %181 {offsets = [6, 0], sizes = [1, 256], strides = [1, 1]} : vector<9x256xf32> to vector<1x256xf32>
    %cst_154 = arith.constant 0.000000e+00 : f32
    %465 = vector.shape_cast %464 : vector<1x256xf32> to vector<1x256xf32>
    %466 = vector.broadcast %465 : vector<1x256xf32> to vector<16x256xf32>
    %467 = vector.broadcast %cst_154 : f32 to vector<16x256xf32>
    %468 = arith.select %463, %466, %467 : vector<16x256xi1>, vector<16x256xf32>
    %469 = arith.addf %460, %468 : vector<16x256xf32>
    %470 = vector.extract_strided_slice %182 {offsets = [6, 0], sizes = [1, 256], strides = [1, 1]} : vector<9x256xi32> to vector<1x256xi32>
    %471 = vector.broadcast %470 : vector<1x256xi32> to vector<16x256xi32>
    %472 = arith.cmpi eq, %186, %471 : vector<16x256xi32>
    %473 = vector.extract_strided_slice %172 {offsets = [6, 0], sizes = [1, 256], strides = [1, 1]} : vector<9x256xf32> to vector<1x256xf32>
    %cst_155 = arith.constant 0.000000e+00 : f32
    %474 = vector.shape_cast %473 : vector<1x256xf32> to vector<1x256xf32>
    %475 = vector.broadcast %474 : vector<1x256xf32> to vector<16x256xf32>
    %476 = vector.broadcast %cst_155 : f32 to vector<16x256xf32>
    %477 = arith.select %472, %475, %476 : vector<16x256xi1>, vector<16x256xf32>
    %478 = vector.extract_strided_slice %183 {offsets = [6, 0], sizes = [1, 256], strides = [1, 1]} : vector<9x256xi32> to vector<1x256xi32>
    %479 = vector.broadcast %478 : vector<1x256xi32> to vector<16x256xi32>
    %480 = arith.cmpi eq, %186, %479 : vector<16x256xi32>
    %481 = vector.extract_strided_slice %175 {offsets = [6, 0], sizes = [1, 256], strides = [1, 1]} : vector<9x256xf32> to vector<1x256xf32>
    %cst_156 = arith.constant 0.000000e+00 : f32
    %482 = vector.shape_cast %481 : vector<1x256xf32> to vector<1x256xf32>
    %483 = vector.broadcast %482 : vector<1x256xf32> to vector<16x256xf32>
    %484 = vector.broadcast %cst_156 : f32 to vector<16x256xf32>
    %485 = arith.select %480, %483, %484 : vector<16x256xi1>, vector<16x256xf32>
    %486 = arith.addf %477, %485 : vector<16x256xf32>
    %cst_157 = arith.constant dense<0.000000e+00> : vector<64x256xf32>
    %487 = tpu.matmul %3, %469, %cst_157 {dimension_numbers = #tpu.dot_dimension_numbers<[1], [0], [0], [1], [0, 0, 1, 1], [], []>} : vector<64x16xf32>, vector<16x256xf32>, vector<64x256xf32> -> vector<64x256xf32>
    %488 = vector.shape_cast %487 : vector<64x256xf32> to vector<4x16x256xf32>
    %489 = vector.shape_cast %486 : vector<16x256xf32> to vector<1x16x256xf32>
    %490 = vector.broadcast %489 : vector<1x16x256xf32> to vector<4x16x256xf32>
    %491 = arith.mulf %488, %490 : vector<4x16x256xf32>
    %492 = vector.shape_cast %491 : vector<4x16x256xf32> to vector<64x256xf32>
    %c6_158 = arith.constant 6 : index
    %c0_159 = arith.constant 0 : index
    %c0_160 = arith.constant 0 : index
    %493 = vector.load %arg10[%c6_158, %c0_159, %c0_160] : memref<9x8x64xf32, #tpu.memory_space<vmem>>, vector<1x8x64xf32>
    %494 = vector.shape_cast %493 : vector<1x8x64xf32> to vector<8x64xf32>
    %cst_161 = arith.constant dense<0.000000e+00> : vector<8x256xf32>
    %495 = tpu.matmul %494, %492, %cst_161 {dimension_numbers = #tpu.dot_dimension_numbers<[1], [0], [0], [1], [0, 0, 1, 1], [], []>} : vector<8x64xf32>, vector<64x256xf32>, vector<8x256xf32> -> vector<8x256xf32>
    %496 = arith.addf %452, %495 : vector<8x256xf32>
    %497 = vector.extract_strided_slice %184 {offsets = [7, 0], sizes = [1, 256], strides = [1, 1]} : vector<9x256xi32> to vector<1x256xi32>
    %498 = vector.broadcast %497 : vector<1x256xi32> to vector<16x256xi32>
    %499 = arith.cmpi eq, %187, %498 : vector<16x256xi32>
    %500 = vector.extract_strided_slice %178 {offsets = [7, 0], sizes = [1, 256], strides = [1, 1]} : vector<9x256xf32> to vector<1x256xf32>
    %cst_162 = arith.constant 0.000000e+00 : f32
    %501 = vector.shape_cast %500 : vector<1x256xf32> to vector<1x256xf32>
    %502 = vector.broadcast %501 : vector<1x256xf32> to vector<16x256xf32>
    %503 = vector.broadcast %cst_162 : f32 to vector<16x256xf32>
    %504 = arith.select %499, %502, %503 : vector<16x256xi1>, vector<16x256xf32>
    %505 = vector.extract_strided_slice %185 {offsets = [7, 0], sizes = [1, 256], strides = [1, 1]} : vector<9x256xi32> to vector<1x256xi32>
    %506 = vector.broadcast %505 : vector<1x256xi32> to vector<16x256xi32>
    %507 = arith.cmpi eq, %187, %506 : vector<16x256xi32>
    %508 = vector.extract_strided_slice %181 {offsets = [7, 0], sizes = [1, 256], strides = [1, 1]} : vector<9x256xf32> to vector<1x256xf32>
    %cst_163 = arith.constant 0.000000e+00 : f32
    %509 = vector.shape_cast %508 : vector<1x256xf32> to vector<1x256xf32>
    %510 = vector.broadcast %509 : vector<1x256xf32> to vector<16x256xf32>
    %511 = vector.broadcast %cst_163 : f32 to vector<16x256xf32>
    %512 = arith.select %507, %510, %511 : vector<16x256xi1>, vector<16x256xf32>
    %513 = arith.addf %504, %512 : vector<16x256xf32>
    %514 = vector.extract_strided_slice %182 {offsets = [7, 0], sizes = [1, 256], strides = [1, 1]} : vector<9x256xi32> to vector<1x256xi32>
    %515 = vector.broadcast %514 : vector<1x256xi32> to vector<16x256xi32>
    %516 = arith.cmpi eq, %186, %515 : vector<16x256xi32>
    %517 = vector.extract_strided_slice %172 {offsets = [7, 0], sizes = [1, 256], strides = [1, 1]} : vector<9x256xf32> to vector<1x256xf32>
    %cst_164 = arith.constant 0.000000e+00 : f32
    %518 = vector.shape_cast %517 : vector<1x256xf32> to vector<1x256xf32>
    %519 = vector.broadcast %518 : vector<1x256xf32> to vector<16x256xf32>
    %520 = vector.broadcast %cst_164 : f32 to vector<16x256xf32>
    %521 = arith.select %516, %519, %520 : vector<16x256xi1>, vector<16x256xf32>
    %522 = vector.extract_strided_slice %183 {offsets = [7, 0], sizes = [1, 256], strides = [1, 1]} : vector<9x256xi32> to vector<1x256xi32>
    %523 = vector.broadcast %522 : vector<1x256xi32> to vector<16x256xi32>
    %524 = arith.cmpi eq, %186, %523 : vector<16x256xi32>
    %525 = vector.extract_strided_slice %175 {offsets = [7, 0], sizes = [1, 256], strides = [1, 1]} : vector<9x256xf32> to vector<1x256xf32>
    %cst_165 = arith.constant 0.000000e+00 : f32
    %526 = vector.shape_cast %525 : vector<1x256xf32> to vector<1x256xf32>
    %527 = vector.broadcast %526 : vector<1x256xf32> to vector<16x256xf32>
    %528 = vector.broadcast %cst_165 : f32 to vector<16x256xf32>
    %529 = arith.select %524, %527, %528 : vector<16x256xi1>, vector<16x256xf32>
    %530 = arith.addf %521, %529 : vector<16x256xf32>
    %cst_166 = arith.constant dense<0.000000e+00> : vector<64x256xf32>
    %531 = tpu.matmul %3, %513, %cst_166 {dimension_numbers = #tpu.dot_dimension_numbers<[1], [0], [0], [1], [0, 0, 1, 1], [], []>} : vector<64x16xf32>, vector<16x256xf32>, vector<64x256xf32> -> vector<64x256xf32>
    %532 = vector.shape_cast %531 : vector<64x256xf32> to vector<4x16x256xf32>
    %533 = vector.shape_cast %530 : vector<16x256xf32> to vector<1x16x256xf32>
    %534 = vector.broadcast %533 : vector<1x16x256xf32> to vector<4x16x256xf32>
    %535 = arith.mulf %532, %534 : vector<4x16x256xf32>
    %536 = vector.shape_cast %535 : vector<4x16x256xf32> to vector<64x256xf32>
    %c7_167 = arith.constant 7 : index
    %c0_168 = arith.constant 0 : index
    %c0_169 = arith.constant 0 : index
    %537 = vector.load %arg10[%c7_167, %c0_168, %c0_169] : memref<9x8x64xf32, #tpu.memory_space<vmem>>, vector<1x8x64xf32>
    %538 = vector.shape_cast %537 : vector<1x8x64xf32> to vector<8x64xf32>
    %cst_170 = arith.constant dense<0.000000e+00> : vector<8x256xf32>
    %539 = tpu.matmul %538, %536, %cst_170 {dimension_numbers = #tpu.dot_dimension_numbers<[1], [0], [0], [1], [0, 0, 1, 1], [], []>} : vector<8x64xf32>, vector<64x256xf32>, vector<8x256xf32> -> vector<8x256xf32>
    %540 = arith.addf %496, %539 : vector<8x256xf32>
    %541 = vector.extract_strided_slice %184 {offsets = [8, 0], sizes = [1, 256], strides = [1, 1]} : vector<9x256xi32> to vector<1x256xi32>
    %542 = vector.broadcast %541 : vector<1x256xi32> to vector<16x256xi32>
    %543 = arith.cmpi eq, %187, %542 : vector<16x256xi32>
    %544 = vector.extract_strided_slice %178 {offsets = [8, 0], sizes = [1, 256], strides = [1, 1]} : vector<9x256xf32> to vector<1x256xf32>
    %cst_171 = arith.constant 0.000000e+00 : f32
    %545 = vector.shape_cast %544 : vector<1x256xf32> to vector<1x256xf32>
    %546 = vector.broadcast %545 : vector<1x256xf32> to vector<16x256xf32>
    %547 = vector.broadcast %cst_171 : f32 to vector<16x256xf32>
    %548 = arith.select %543, %546, %547 : vector<16x256xi1>, vector<16x256xf32>
    %549 = vector.extract_strided_slice %185 {offsets = [8, 0], sizes = [1, 256], strides = [1, 1]} : vector<9x256xi32> to vector<1x256xi32>
    %550 = vector.broadcast %549 : vector<1x256xi32> to vector<16x256xi32>
    %551 = arith.cmpi eq, %187, %550 : vector<16x256xi32>
    %552 = vector.extract_strided_slice %181 {offsets = [8, 0], sizes = [1, 256], strides = [1, 1]} : vector<9x256xf32> to vector<1x256xf32>
    %cst_172 = arith.constant 0.000000e+00 : f32
    %553 = vector.shape_cast %552 : vector<1x256xf32> to vector<1x256xf32>
    %554 = vector.broadcast %553 : vector<1x256xf32> to vector<16x256xf32>
    %555 = vector.broadcast %cst_172 : f32 to vector<16x256xf32>
    %556 = arith.select %551, %554, %555 : vector<16x256xi1>, vector<16x256xf32>
    %557 = arith.addf %548, %556 : vector<16x256xf32>
    %558 = vector.extract_strided_slice %182 {offsets = [8, 0], sizes = [1, 256], strides = [1, 1]} : vector<9x256xi32> to vector<1x256xi32>
    %559 = vector.broadcast %558 : vector<1x256xi32> to vector<16x256xi32>
    %560 = arith.cmpi eq, %186, %559 : vector<16x256xi32>
    %561 = vector.extract_strided_slice %172 {offsets = [8, 0], sizes = [1, 256], strides = [1, 1]} : vector<9x256xf32> to vector<1x256xf32>
    %cst_173 = arith.constant 0.000000e+00 : f32
    %562 = vector.shape_cast %561 : vector<1x256xf32> to vector<1x256xf32>
    %563 = vector.broadcast %562 : vector<1x256xf32> to vector<16x256xf32>
    %564 = vector.broadcast %cst_173 : f32 to vector<16x256xf32>
    %565 = arith.select %560, %563, %564 : vector<16x256xi1>, vector<16x256xf32>
    %566 = vector.extract_strided_slice %183 {offsets = [8, 0], sizes = [1, 256], strides = [1, 1]} : vector<9x256xi32> to vector<1x256xi32>
    %567 = vector.broadcast %566 : vector<1x256xi32> to vector<16x256xi32>
    %568 = arith.cmpi eq, %186, %567 : vector<16x256xi32>
    %569 = vector.extract_strided_slice %175 {offsets = [8, 0], sizes = [1, 256], strides = [1, 1]} : vector<9x256xf32> to vector<1x256xf32>
    %cst_174 = arith.constant 0.000000e+00 : f32
    %570 = vector.shape_cast %569 : vector<1x256xf32> to vector<1x256xf32>
    %571 = vector.broadcast %570 : vector<1x256xf32> to vector<16x256xf32>
    %572 = vector.broadcast %cst_174 : f32 to vector<16x256xf32>
    %573 = arith.select %568, %571, %572 : vector<16x256xi1>, vector<16x256xf32>
    %574 = arith.addf %565, %573 : vector<16x256xf32>
    %cst_175 = arith.constant dense<0.000000e+00> : vector<64x256xf32>
    %575 = tpu.matmul %3, %557, %cst_175 {dimension_numbers = #tpu.dot_dimension_numbers<[1], [0], [0], [1], [0, 0, 1, 1], [], []>} : vector<64x16xf32>, vector<16x256xf32>, vector<64x256xf32> -> vector<64x256xf32>
    %576 = vector.shape_cast %575 : vector<64x256xf32> to vector<4x16x256xf32>
    %577 = vector.shape_cast %574 : vector<16x256xf32> to vector<1x16x256xf32>
    %578 = vector.broadcast %577 : vector<1x16x256xf32> to vector<4x16x256xf32>
    %579 = arith.mulf %576, %578 : vector<4x16x256xf32>
    %580 = vector.shape_cast %579 : vector<4x16x256xf32> to vector<64x256xf32>
    %c8_176 = arith.constant 8 : index
    %c0_177 = arith.constant 0 : index
    %c0_178 = arith.constant 0 : index
    %581 = vector.load %arg10[%c8_176, %c0_177, %c0_178] : memref<9x8x64xf32, #tpu.memory_space<vmem>>, vector<1x8x64xf32>
    %582 = vector.shape_cast %581 : vector<1x8x64xf32> to vector<8x64xf32>
    %cst_179 = arith.constant dense<0.000000e+00> : vector<8x256xf32>
    %583 = tpu.matmul %582, %580, %cst_179 {dimension_numbers = #tpu.dot_dimension_numbers<[1], [0], [0], [1], [0, 0, 1, 1], [], []>} : vector<8x64xf32>, vector<64x256xf32>, vector<8x256xf32> -> vector<8x256xf32>
    %584 = arith.addf %540, %583 : vector<8x256xf32>
    %c0_180 = arith.constant 0 : index
    %c0_181 = arith.constant 0 : index
    %c0_182 = arith.constant 0 : index
    %585 = vector.load %arg11[%c0_180, %c0_181, %c0_182] : memref<1x8x256xf32, #tpu.memory_space<vmem>>, vector<1x8x256xf32>
    %586 = vector.shape_cast %585 : vector<1x8x256xf32> to vector<8x256xf32>
    %587 = vector.shape_cast %584 : vector<8x256xf32> to vector<1x8x256xf32>
    tpu.vector_store %arg11[%c0_180, %c0_181, %c0_182], %587 {strides = array<i32>} : memref<1x8x256xf32, #tpu.memory_space<vmem>>, vector<1x8x256xf32>,
    return
  }
  func.func @transform_0(%arg0: i32) -> (i32, i32, i32) {
    %c0_i32 = arith.constant 0 : i32
    %c0_i32_0 = arith.constant 0 : i32
    %c0_i32_1 = arith.constant 0 : i32
    return %arg0, %c0_i32, %c0_i32_0 : i32, i32, i32
  }
  func.func @transform_1(%arg0: i32) -> (i32, i32, i32) {
    %c0_i32 = arith.constant 0 : i32
    %c0_i32_0 = arith.constant 0 : i32
    %c0_i32_1 = arith.constant 0 : i32
    return %arg0, %c0_i32, %c0_i32_0 : i32, i32, i32
  }
  func.func @transform_2(%arg0: i32) -> (i32, i32, i32) {
    %c0_i32 = arith.constant 0 : i32
    %c0_i32_0 = arith.constant 0 : i32
    %c0_i32_1 = arith.constant 0 : i32
    %c0_i32_2 = arith.constant 0 : i32
    return %c0_i32, %c0_i32_0, %c0_i32_1 : i32, i32, i32
  }
  func.func @transform_3(%arg0: i32) -> (i32, i32, i32) {
    %c0_i32 = arith.constant 0 : i32
    %c0_i32_0 = arith.constant 0 : i32
    %c0_i32_1 = arith.constant 0 : i32
    %c0_i32_2 = arith.constant 0 : i32
    return %c0_i32, %c0_i32_0, %c0_i32_1 : i32, i32, i32
  }
  func.func @transform_4(%arg0: i32) -> (i32, i32) {
    %c0_i32 = arith.constant 0 : i32
    %c0_i32_0 = arith.constant 0 : i32
    %c0_i32_1 = arith.constant 0 : i32
    return %c0_i32, %c0_i32_0 : i32, i32
  }
  func.func @transform_5(%arg0: i32) -> (i32, i32) {
    %c0_i32 = arith.constant 0 : i32
    %c0_i32_0 = arith.constant 0 : i32
    %c0_i32_1 = arith.constant 0 : i32
    return %c0_i32, %c0_i32_0 : i32, i32
  }
  func.func @transform_6(%arg0: i32) -> (i32, i32) {
    %c0_i32 = arith.constant 0 : i32
    %c0_i32_0 = arith.constant 0 : i32
    %c0_i32_1 = arith.constant 0 : i32
    return %c0_i32, %c0_i32_0 : i32, i32
  }
  func.func @transform_7(%arg0: i32) -> (i32, i32) {
    %c0_i32 = arith.constant 0 : i32
    %c0_i32_0 = arith.constant 0 : i32
    %c0_i32_1 = arith.constant 0 : i32
    return %c0_i32, %c0_i32_0 : i32, i32
  }
  func.func @transform_8(%arg0: i32) -> (i32, i32) {
    %c0_i32 = arith.constant 0 : i32
    %c0_i32_0 = arith.constant 0 : i32
    %c0_i32_1 = arith.constant 0 : i32
    return %c0_i32, %c0_i32_0 : i32, i32
  }
  func.func @transform_9(%arg0: i32) -> (i32, i32, i32) {
    %c0_i32 = arith.constant 0 : i32
    %c0_i32_0 = arith.constant 0 : i32
    %c0_i32_1 = arith.constant 0 : i32
    %c0_i32_2 = arith.constant 0 : i32
    return %c0_i32, %c0_i32_0, %c0_i32_1 : i32, i32, i32
  }
  func.func @transform_10(%arg0: i32) -> (i32, i32, i32) {
    %c0_i32 = arith.constant 0 : i32
    %c0_i32_0 = arith.constant 0 : i32
    %c0_i32_1 = arith.constant 0 : i32
    return %arg0, %c0_i32, %c0_i32_0 : i32, i32, i32
  }
}

</mosaic_0001>

<bundles_post_ra>
// kernel: tpu_custom_call.1
= control target key start
LH: loop header
LB: loop body
LE: loop exit
PB: predicated region body
PF: predicated region fallthrough
CT: control target
= control target key end

     0   :  { %15 = vsyncpa [#allocation3], 0  ;;  %s7652_s0 = inlined_call_operand.vmem [shape: f32[2,4,256], index: 0, kind: input, shape index: {}]   ;;  %s7653_s1 = inlined_call_operand.vmem [shape: f32[2,64,16], index: 1, kind: input, shape index: {}]   ;;  %s7654_s2 = inlined_call_operand.vmem [shape: f32[9,9,4], index: 2, kind: input, shape index: {}]   ;;  %s7655_s3 = inlined_call_operand.vmem [shape: f32[9,9,4], index: 3, kind: input, shape index: {}]   ;;  %s7656_s4 = inlined_call_operand.vmem [shape: f32[9,1], index: 4, kind: input, shape index: {}]   ;;  %s7657_s5 = inlined_call_operand.vmem [shape: f32[9,1], index: 5, kind: input, shape index: {}]   ;;  %s7658_s6 = inlined_call_operand.vmem [shape: f32[9,256], index: 6, kind: input, shape index: {}]   ;;  %s7659_s7 = inlined_call_operand.vmem [shape: f32[9,256], index: 7, kind: input, shape index: {}]   ;;  %s7660_s8 = inlined_call_operand.vmem [shape: f32[9,256], index: 8, kind: input, shape index: {}]   ;;  %s7661_s9 = inlined_call_operand.vmem [shape: f32[9,8,64], index: 9, kind: input, shape index: {}]   ;;  %s7662_s10 = inlined_call_operand.hbm [shape: f32[2,8,256], index: 10, kind: output, shape index: {}]  }
   0x1   :  { %17 = vsyncpa [#allocation3 + $0x1], 0  ;;  %s5990_s13 = smov 0   ;;  %s5992_s14 = smov 0  }
   0x2   :  { %s5994_s15 = smov 0   ;;  %s5996_s16 = smov 0  }
   0x3 LB: > { %s6011_s17 = sadd.s32 4294967295, %s5922_s16   ;;  %s5294_s18 = sadd.s32 4294967294, %s5922_s16   ;;  %s5922_s16 = sphi %s5996_s16, %s7832_s16   ;;  %s5918_s15 = sphi %s5994_s15, %s7831_s15   ;;  %s5914_s14 = sphi %s5992_s14, %s7830_s14   ;;  %s5910_s13 = sphi %s5990_s13, %s7829_s13  }
   0x4   : > { %s6015_s19 = sadd.s32 1, %s5922_s16   ;;  %s250_s20 = sadd.s32 1, %s5918_s15 }
   0x5   : > { %s247_s21 = ssub.s32 %s5922_s16, %s6015_s19  ;;  %p260_p0 = scmp.ne.s32.totalorder %s5918_s15, %s5914_s14 }
   0x6   : > { %p248_p1 = scmp.eq.s32.totalorder %s247_s21, 0  ;;  %p261_p2 = scmp.eq.s32.totalorder %s6011_s17, 1 }
   0x7   : > { %p266_p3 = scmp.ne.s32.totalorder %s5914_s14, %s5910_s13  ;;  %p267_p4 = scmp.eq.s32.totalorder %s5294_s18, 1 }
   0x8   : > { %s6026_s22 = scalar_select %p248_p1, %s5918_s15, %s250_s20  }
   0x9   : > { %p6028_p5 = por %p261_p2, %p260_p0  ;;  %p6032_p6 = por %p267_p4, %p266_p3 }
   0xa   : > { %p5297_p7 = scmp.ge.s32.totalorder %s5922_s16, 1  ;;  %p325_p8 = scmp.lt.s32.totalorder %s5922_s16, 3 }
   0xc   : > { %p326_p9 = pnand %p5297_p7, %p325_p8 }
   0xe   : > { %329 = sbr.rel (%p326_p9) target bundleno = 1783 (0x6f7), region = 60 }
  0x15   : > { %p368_p10 = scmp.lt.s32.totalorder %s6011_s17, 1  ;;  %v7663_v0 = vmov 0.0   ;;  %s5925_s30 = smov 17   ;;  %v2240_v3 = vld [vmem:[%s7657_s5] sm:$0xff]  ;;  %v5933_v5 = vmov 0   ;;  %v403_v8 = vlaneseq  ;;  %v6085_v12 = vld [vmem:[%s7660_s8 + $0x8] sm:$0xff] }
  0x16   : > { %518 = vmatprep.mubr.f32.mxu0 %v7663_v0  ;;  %699 = vmatprep.mubr.f32.mxu1 %v7663_v0  ;;  %s5926_s11 = smov 16   ;;  %s5927_s12 = smov 15   ;;  %v2224_v4 = vld [vmem:[%s7656_s4] sm:$0xff]  ;;  %v2225_v6 = vld [vmem:[%s7656_s4 + $0x8] sm:$0x1]  ;;  %vm398_vm0 = vcmask 138240  }
  0x17   : > { %s6040_s25 = scalar_select %p368_p10, %s6011_s17, 1  ;;  %5849 = vset.pattern.permute.xlu0 %v5933_v5  ;;  %5850 = vset.pattern.permute.xlu1 %v5933_v5  ;;  %v2241_v7 = vld [vmem:[%s7657_s5 + $0x8] sm:$0x1]  ;;  %v6072_v9 = vshrl.u32 %v403_v8, 7  ;;  %v6080_v11 = vld [vmem:[%s7660_s8] sm:$0xff]  ;;  %vm422_vm1 = vcmask 130048  }
  0x18   : > { %s5928_s18 = smov 1   ;;  %s5929_s20 = smov 127   ;;  %vm447_vm2 = vcmask 1043456   ;;  %vm794_vm3 = vcmask 121856   ;;  %v5303_v31 = vld [vmem:[%s7654_s2 + $0x10] sm:$0xff]  ;;  %vm440_vm4 = vcmask 31744  }
  0x19   : > { %s5503_s26 = sshll.u32 %s6040_s25, 3  ;;  %s5930_s21 = smov 113   ;;  %v6075_v10 = vsub.s32 1, %v6072_v9  ;;  %v6088_v15 = vsub.s32 0, %v6072_v9  ;;  %v6099_v22 = vsub.s32 2, %v6072_v9  ;;  %v6105_v26 = vsub.s32 4, %v6072_v9 }
  0x1a   : > { %s372_s29 = scalar_lea.vmem %s7652_s0, %s5503_s26  ;;  %s5931_s26 = smov 112   ;;  %v6108_v29 = vsub.s32 3, %v6072_v9  ;;  %v5314_v33 = vld [vmem:[%s7655_s3 + $0x18] sm:$0x1]  ;;  %vm1000_vm5 = vcmask 7168   ;;  %v415_v46 = vld [vmem:[%s7655_s3] sm:$0xff] }
  0x1b   : > { %v6048_v1 = vld [vmem:[%s372_s29] sm:$0xff]  ;;  %s5932_s27 = smov 111   ;;  %v430_v16 = vrot.slane %v6080_v11, %v6075_v10  ;;  %v434_v17 = vrot.slane %v6085_v12, %v6075_v10  ;;  %v406_v18 = vrot.slane %v6080_v11, %v6088_v15  ;;  %v410_v19 = vrot.slane %v6085_v12, %v6088_v15  ;;  %7713 = vst [vmem:[#allocation5_spill] sm:$0xff] %v6105_v26  ;;  %v5304_v44 = vld [vmem:[%s7654_s2 + $0x18] sm:$0x1]  ;;  %v5313_v63 = vld [vmem:[%s7655_s3 + $0x10] sm:$0xff] }
  0x1c   : > { %v392_v2 = vcombine.high %v6048_v1, %v6048_v1  ;;  %v802_v35 = vrot.slane %v6080_v11, %v6099_v22  ;;  %v806_v36 = vrot.slane %v6085_v12, %v6099_v22  ;;  %v1204_v39 = vrot.slane %v6080_v11, %v6105_v26  ;;  %v413_v53 = vld [vmem:[%s7654_s2] sm:$0xff]  ;;  %v416_v54 = vld [vmem:[%s7655_s3 + $0x8] sm:$0x1] }
  0x1d   : > { %v1208_v40 = vrot.slane %v6085_v12, %v6105_v26  ;;  %v1012_v43 = vrot.slane %v6085_v12, %v6108_v29  ;;  %v1008_v55 = vrot.slane %v6080_v11, %v6108_v29  ;;  %v414_v58 = vld [vmem:[%s7654_s2 + $0x8] sm:$0x1]  ;;  %v5329_v60 = vld [vmem:[%s7655_s3 + $0x20] sm:$0xff]  ;;  %v6184_v62 = vsub.s32 5, %v6072_v9 }
  0x1e   : > { %393 = vrot.lane.b32.xlu1 %v392_v2, %s5925_s30  ;;  %417 = vrot.lane.b32.xlu0 %v392_v2, %s5926_s11  ;;  %vm1404_vm6 = vcmask 1039360   ;;  %v5323_v5 = vld [vmem:[%s7654_s2 + $0x20] sm:$0xff]  ;;  %vm1610_vm7 = vcmask 924672   ;;  %vm1816_vm8 = vcmask 916480   ;;  %vm2022_vm9 = vcmask 908288  }
  0x1f   : > { %v1211_v51 = vcombine.low %v1204_v39, %v1208_v40  ;;  %v5365_v40 = vld [vmem:[%s7655_s3 + $0x50] sm:$0xff] }
  0x21   : > { %v6165_v57 = vmul.f32 %v1211_v51, %v6048_v1 }
  0x22   : > { %396 = vrot.lane.b32.xlu1 %v6048_v1, %s5925_s30  ;;  %420 = vrot.lane.b32.xlu0 %v6048_v1, %s5926_s11  ;;  %s5504_s30 = sshll.u32 %s6040_s25, 6  ;;  %s365_s11 = sand.u32 1, %s5914_s14  }
  0x23   : > { %v1218_v61 = vcombine.high %v6165_v57, %v6165_v57 }
  0x26   : > { %792 = vrot.lane.b32.xlu1 %v6048_v1, %s5927_s12  ;;  %789 = vrot.lane.b32.xlu0 %v392_v2, %s5927_s12  ;;  %s6474_s12 = scalar_lea.vmem %s7653_s1, %s5504_s30  ;;  %s5934_s30 = smov [#allocation2]  }
  0x27   : > { %s5864_s25 = sshll.u32 %s5934_s30, 4  ;;  %s5865_s25 = int_to_ptr.vmem [resolvable:$false] %s5864_s25 }
  0x2a   : > { %998 = vrot.lane.b32.xlu1 %v6048_v1, %s5928_s18  ;;  %995 = vrot.lane.b32.xlu0 %v392_v2, %s5928_s18  ;;  %s5505_s18 = sshll.u32 %s6011_s17, 8  ;;  %s5209_s17 = scalar_lea.sflag [#allocation3], %s365_s11 }
  0x2b   : > { %s7610_s28 = scalar_lea.hbm %s7662_s10, %s5505_s18 }
  0x2e   : > { %1402 = vrot.lane.b32.xlu1 %v392_v2, %s5929_s20  ;;  %1400 = vrot.lane.b32.xlu0 %v6048_v1, %s5929_s20 }
  0x32   : > { %1608 = vrot.lane.b32.xlu1 %v392_v2, %s5930_s21  ;;  %1606 = vrot.lane.b32.xlu0 %v6048_v1, %s5930_s21 }
  0x36   : > { %1814 = vrot.lane.b32.xlu1 %v392_v2, %s5931_s26  ;;  %1812 = vrot.lane.b32.xlu0 %v6048_v1, %s5931_s26 }
  0x3a   : > { %2020 = vrot.lane.b32.xlu1 %v392_v2, %s5932_s27  ;;  %2018 = vrot.lane.b32.xlu0 %v6048_v1, %s5932_s27  ;;  %v5330_v1 = vld [vmem:[%s7655_s3 + $0x28] sm:$0x1] }
  0x3e   : > { %2244 = vperm.xlu0 %5849, %v2240_v3   ;;  %2228 = vperm.xlu1 %5850, %v2224_v4   ;;  %v1417_v4 = vrot.slane %v6085_v12, %v6184_v62 }
  0x42   : > { %2233 = vperm.xlu0 %5849, %v2225_v6   ;;  %2249 = vperm.xlu1 %5850, %v2241_v7   ;;  %v5341_v7 = vld [vmem:[%s7655_s3 + $0x30] sm:$0xff] }
  0x90   : > { %v394_v13 = vpop.permute.xlu1 %393  ;;  %v418_v14 = vpop.permute.xlu0 %417 }
  0x94   : > { %v397_v20 = vpop.permute.xlu1 %396  ;;  %v421_v21 = vpop.permute.xlu0 %420 }
  0x95   : > { %v399_v23 = vsel %vm398_vm0, %v397_v20, %v394_v13  ;;  %v423_v24 = vsel %vm422_vm1, %v421_v21, %v418_v14  ;;  %v426_v25 = vsel %vm422_vm1, %v418_v14, %v421_v21  ;;  %v402_v30 = vsel %vm398_vm0, %v394_v13, %v397_v20  ;;  %v5324_v14 = vld [vmem:[%s7654_s2 + $0x28] sm:$0x1] }
  0x96   : > { %v435_v27 = vmul.f32 %v430_v16, %v426_v25  ;;  %v436_v28 = vmul.f32 %v434_v17, %v423_v24  ;;  %v412_v32 = vmul.f32 %v410_v19, %v399_v23  ;;  %v411_v41 = vmul.f32 %v406_v18, %v402_v30  ;;  %v5342_v16 = vld [vmem:[%s7655_s3 + $0x38] sm:$0x1]  ;;  %v5335_v23 = vld [vmem:[%s7654_s2 + $0x30] sm:$0xff]  ;;  %v5353_v25 = vld [vmem:[%s7655_s3 + $0x40] sm:$0xff] }
  0x97   : > { %v6214_v13 = vsub.s32 6, %v6072_v9  ;;  %v1413_v19 = vrot.slane %v6080_v11, %v6184_v62  ;;  %v6248_v30 = vsub.s32 7, %v6072_v9 }
  0x98   : > { %5305 = vmatprep.subr.msk.mxu0 %vm447_vm2, %v436_v28  ;;  %5686 = vmatprep.subr.msk.mxu1 %vm447_vm2, %v436_v28  ;;  %v793_v34 = vpop.permute.xlu1 %792  ;;  %v790_v37 = vpop.permute.xlu0 %789 }
  0x99   : > { %5306 = vmatpush1.msk.msra.mxu0 %vm447_vm2, %v435_v27  ;;  %5687 = vmatpush1.msk.msra.mxu1 %vm447_vm2, %v435_v27  ;;  %v795_v38 = vsel %vm794_vm3, %v793_v34, %v790_v37  ;;  %v798_v42 = vsel %vm794_vm3, %v790_v37, %v793_v34  ;;  %v1623_v21 = vrot.slane %v6085_v12, %v6214_v13 }
  0x9a   : > { %5307 = vmatmul.mubr.msk.f32.vlgmr.msra.gmra.mrb[0].mxu0 %vm440_vm4, %v5303_v31  ;;  %5309 = vmatprep.subr.msk.mxu0 %vm447_vm2, %v412_v32  ;;  %v808_v45 = vmul.f32 %v806_v36, %v795_v38  ;;  %v807_v49 = vmul.f32 %v802_v35, %v798_v42  ;;  %7714 = vst [vmem:[#allocation6_spill] sm:$0xff] %v6248_v30  ;;  %v5336_v31 = vld [vmem:[%s7654_s2 + $0x38] sm:$0x1]  ;;  %v5347_v38 = vld [vmem:[%s7654_s2 + $0x40] sm:$0xff]  ;;  %v5348_v42 = vld [vmem:[%s7654_s2 + $0x48] sm:$0x1] }
  0x9b   : > { %5318 = vmatmul.mubr.msk.f32.vlgmr.msra.gmra.mrb[0].mxu1 %vm440_vm4, %v5314_v33  ;;  %5319 = vmatprep.subr.msk.mxu1 %vm447_vm2, %v412_v32  ;;  %v5354_v32 = vld [vmem:[%s7655_s3 + $0x48] sm:$0x1]  ;;  %v1619_v35 = vrot.slane %v6080_v11, %v6214_v13  ;;  %v1829_v37 = vrot.slane %v6085_v12, %v6248_v30 }
  0x9c   : > { %5310 = vmatpush1.msk.msra.mxu0 %vm447_vm2, %v411_v41  ;;  %5320 = vmatpush1.msk.msra.mxu1 %vm447_vm2, %v411_v41  ;;  %v999_v47 = vpop.permute.xlu1 %998  ;;  %v996_v48 = vpop.permute.xlu0 %995 }
  0x9d   : > { %5315 = vmatprep.subr.msk.mxu0 %vm447_vm2, %v436_v28  ;;  %524 = vmatprep.mubr.f32.mxu0 %v7663_v0  ;;  %v1001_v50 = vsel %vm1000_vm5, %v999_v47, %v996_v48  ;;  %v1004_v56 = vsel %vm1000_vm5, %v996_v48, %v999_v47  ;;  %v5359_v48 = vld [vmem:[%s7654_s2 + $0x50] sm:$0xff] }
  0x9e   : > { %776 = vmatprep.mubr.f32.mxu1 %v7663_v0  ;;  %5308 = vmatmul.mubr.msk.f32.gmra.mrb[2].mxu0 %vm440_vm4, %v5304_v44  ;;  %v1014_v52 = vmul.f32 %v1012_v43, %v1001_v50  ;;  %v1013_v59 = vmul.f32 %v1008_v55, %v1004_v56  ;;  %v5366_v43 = vld [vmem:[%s7655_s3 + $0x58] sm:$0x1]  ;;  %v5377_v50 = vld [vmem:[%s7655_s3 + $0x60] sm:$0xff]  ;;  %v5395_v55 = vld [vmem:[%s7660_s8 + $0x10] ss:$0 sm:$0xff] }
  0x9f   : > { %5321 = vmatmul.mubr.msk.f32.vlgmr.msra.gmra.mrb[2].mxu1 %vm440_vm4, %v415_v46  ;;  %607 = vmatprep.mubr.f32.mxu0 %v7663_v0  ;;  %v1825_v46 = vrot.slane %v6080_v11, %v6248_v30 }
  0xa0   : > { %782 = vmatprep.mubr.f32.mxu1 %v7663_v0  ;;  %5331 = vmatprep.subr.msk.mxu1 %vm447_vm2, %v808_v45  ;;  %v1403_v2 = vpop.permute.xlu1 %1402  ;;  %v1401_v3 = vpop.permute.xlu0 %1400 }
  0xa1   : > { %5332 = vmatpush1.msk.msra.mxu1 %vm447_vm2, %v807_v49  ;;  %v1409_v6 = vsel %vm1404_vm6, %v1403_v2, %v1401_v3  ;;  %v1405_v20 = vsel %vm1404_vm6, %v1401_v3, %v1403_v2  ;;  %v5384_v2 = vld [vmem:[%s7654_s2 + $0x78] sm:$0x1]  ;;  %v5404_v3 = vld [vmem:[%s7655_s3 + $0x88] sm:$0x1] }
  0xa2   : > { %5311 = vmatmul.mubr.msk.f32.vlgmr.msra.gmra.mrb[0].mxu0 %vm440_vm4, %v413_v53  ;;  %5343 = vmatprep.subr.msk.mxu1 %vm447_vm2, %v1014_v52  ;;  %v1419_v8 = vmul.f32 %v1417_v4, %v1409_v6  ;;  %v5360_v53 = vld [vmem:[%s7654_s2 + $0x58] sm:$0x1]  ;;  %v5397_v4 = vld [vmem:[%s7654_s2 + $0x80] sm:$0xff] }
  0xa3   : > { %5316 = vmatpush1.msk.msra.mxu0 %vm447_vm2, %v435_v27  ;;  %5322 = vmatmul.mubr.msk.f32.gmra.mrb[0].mxu1 %vm440_vm4, %v416_v54  ;;  %v1418_v27 = vmul.f32 %v1413_v19, %v1405_v20  ;;  %v5378_v54 = vld [vmem:[%s7655_s3 + $0x68] sm:$0x1] }
  0xa4   : > { %5325 = vmatprep.subr.msk.mxu0 %vm447_vm2, %v808_v45  ;;  %613 = vmatprep.mubr.f32.mxu0 %v7663_v0  ;;  %v1609_v17 = vpop.permute.xlu1 %1608  ;;  %v1607_v18 = vpop.permute.xlu0 %1606 }
  0xa5   : > { %978 = vmatprep.mubr.f32.mxu1 %v7663_v0  ;;  %v1615_v24 = vsel %vm1610_vm7, %v1609_v17, %v1607_v18  ;;  %v1611_v36 = vsel %vm1610_vm7, %v1607_v18, %v1609_v17 }
  0xa6   : > { %5312 = vmatmul.mubr.msk.f32.gmra.mrb[2].mxu0 %vm440_vm4, %v414_v58  ;;  %v1625_v28 = vmul.f32 %v1623_v21, %v1615_v24  ;;  %v1624_v41 = vmul.f32 %v1619_v35, %v1611_v36  ;;  %v5389_v58 = vld [vmem:[%s7655_s3 + $0x70] sm:$0xff] }
  0xa7   : > { %5333 = vmatmul.mubr.msk.f32.vlgmr.msra.gmra.mrb[2].mxu1 %vm440_vm4, %v5329_v60  ;;  %693 = vmatprep.mubr.f32.mxu0 %v7663_v0  ;;  %v5372_v60 = vld [vmem:[%s7654_s2 + $0x68] sm:$0x1] }
  0xa8   : > { %984 = vmatprep.mubr.f32.mxu1 %v7663_v0  ;;  %5344 = vmatpush1.msk.msra.mxu1 %vm447_vm2, %v1013_v59  ;;  %v1815_v33 = vpop.permute.xlu1 %1814  ;;  %v1813_v34 = vpop.permute.xlu0 %1812 }
  0xa9   : > { %5355 = vmatprep.subr.msk.mxu1 %vm447_vm2, %v1218_v61  ;;  %v1821_v39 = vsel %vm1816_vm8, %v1815_v33, %v1813_v34  ;;  %v1817_v47 = vsel %vm1816_vm8, %v1813_v34, %v1815_v33  ;;  %v2264_v33 = vld [vmem:[%s7659_s7] sm:$0xff] }
  0xaa   : > { %5317 = vmatmul.mubr.msk.f32.vlgmr.msra.gmra.mrb[4].mxu0 %vm440_vm4, %v5313_v63  ;;  %v1831_v12 = vmul.f32 %v1829_v37, %v1821_v39  ;;  %v1830_v51 = vmul.f32 %v1825_v46, %v1817_v47  ;;  %v5383_v63 = vld [vmem:[%s7654_s2 + $0x70] sm:$0xff] }
  0xab   : > { %5326 = vmatpush1.msk.msra.mxu0 %vm447_vm2, %v807_v49  ;;  %5334 = vmatmul.mubr.msk.f32.gmra.mrb[0].mxu1 %vm440_vm4, %v5330_v1  ;;  %v5396_v49 = vld [vmem:[%s7660_s8 + $0x18] ss:$0 sm:$0xff]  ;;  %v5403_v1 = vld [vmem:[%s7655_s3 + $0x80] sm:$0xff] }
  0xac   : > { %5337 = vmatprep.subr.msk.mxu0 %vm447_vm2, %v1014_v52  ;;  %888 = vmatprep.mubr.f32.mxu0 %v7663_v0  ;;  %v2021_v44 = vpop.permute.xlu1 %2020  ;;  %v2019_v45 = vpop.permute.xlu0 %2018 }
  0xad   : > { %1184 = vmatprep.mubr.f32.mxu1 %v7663_v0  ;;  %v2027_v11 = vsel %vm2022_vm9, %v2021_v44, %v2019_v45  ;;  %v2023_v56 = vsel %vm2022_vm9, %v2019_v45, %v2021_v44 }
  0xae   : > { %5327 = vmatmul.mubr.msk.f32.vlgmr.msra.gmra.mrb[0].mxu0 %vm440_vm4, %v5323_v5  ;;  %v2037_v52 = vmul.f32 %v5396_v49, %v2027_v11  ;;  %v5398_v5 = vld [vmem:[%s7654_s2 + $0x88] sm:$0x1] }
  0xaf   : > { %5338 = vmatpush1.msk.msra.mxu0 %vm447_vm2, %v1013_v59  ;;  %5345 = vmatmul.mubr.msk.f32.vlgmr.msra.gmra.mrb[2].mxu1 %vm440_vm4, %v5341_v7  ;;  %v2036_v59 = vmul.f32 %v5395_v55, %v2023_v56  ;;  %v6408_v56 = vadd.s32 8, %v6072_v9 }
  0xb0   : > { %894 = vmatprep.mubr.f32.mxu0 %v7663_v0  ;;  %1190 = vmatprep.mubr.f32.mxu1 %v7663_v0 }
  0xb1   : > { %5356 = vmatpush1.msk.msra.mxu1 %vm447_vm2, %v6165_v57  ;;  %5349 = vmatprep.subr.msk.mxu0 %vm447_vm2, %v1218_v61  ;;  %v5390_v61 = vld [vmem:[%s7655_s3 + $0x78] sm:$0x1] }
  0xb2   : > { %5328 = vmatmul.mubr.msk.f32.gmra.mrb[2].mxu0 %vm440_vm4, %v5324_v14  ;;  %5367 = vmatprep.subr.msk.mxu1 %vm447_vm2, %v1419_v8 }
  0xb3   : > { %5346 = vmatmul.mubr.msk.f32.gmra.mrb[0].mxu1 %vm440_vm4, %v5342_v16  ;;  %1094 = vmatprep.mubr.f32.mxu0 %v7663_v0 }
  0xb4   : > { %1383 = vmatprep.mubr.f32.mxu1 %v7663_v0 }
  0xb6   : > { %5339 = vmatmul.mubr.msk.f32.vlgmr.msra.gmra.mrb[0].mxu0 %vm440_vm4, %v5335_v23 }
  0xb7   : > { %5357 = vmatmul.mubr.msk.f32.vlgmr.msra.gmra.mrb[2].mxu1 %vm440_vm4, %v5353_v25  ;;  %1100 = vmatprep.mubr.f32.mxu0 %v7663_v0 }
  0xb8   : > { %5350 = vmatpush1.msk.msra.mxu0 %vm447_vm2, %v6165_v57  ;;  %1389 = vmatprep.mubr.f32.mxu1 %v7663_v0  ;;  %v5371_v57 = vld [vmem:[%s7654_s2 + $0x60] sm:$0xff] }
  0xb9   : > { %5361 = vmatprep.subr.msk.mxu0 %vm447_vm2, %v1419_v8  ;;  %5368 = vmatpush1.msk.msra.mxu1 %vm447_vm2, %v1418_v27 }
  0xba   : > { %5340 = vmatmul.mubr.msk.f32.gmra.mrb[2].mxu0 %vm440_vm4, %v5336_v31  ;;  %5379 = vmatprep.subr.msk.mxu1 %vm447_vm2, %v1625_v28 }
  0xbb   : > { %5358 = vmatmul.mubr.msk.f32.gmra.mrb[0].mxu1 %vm440_vm4, %v5354_v32  ;;  %1293 = vmatprep.mubr.f32.mxu0 %v7663_v0 }
  0xbc   : > { %1589 = vmatprep.mubr.f32.mxu1 %v7663_v0 }
  0xbd   : > { %v2245_v23 = vpop.permute.xlu0 %2244 }
  0xbe   : > { %5351 = vmatmul.mubr.msk.f32.vlgmr.msra.gmra.mrb[0].mxu0 %vm440_vm4, %v5347_v38 }
  0xbf   : > { %5362 = vmatpush1.msk.msra.mxu0 %vm447_vm2, %v1418_v27  ;;  %5369 = vmatmul.mubr.msk.f32.vlgmr.msra.gmra.mrb[2].mxu1 %vm440_vm4, %v5365_v40 }
  0xc0   : > { %1299 = vmatprep.mubr.f32.mxu0 %v7663_v0  ;;  %1595 = vmatprep.mubr.f32.mxu1 %v7663_v0 }
  0xc1   : > { %5373 = vmatprep.subr.msk.mxu0 %vm447_vm2, %v1625_v28  ;;  %5380 = vmatpush1.msk.msra.mxu1 %vm447_vm2, %v1624_v41  ;;  %v2265_v28 = vld [vmem:[%s7659_s7 + $0x8] sm:$0xff] }
  0xc2   : > { %5352 = vmatmul.mubr.msk.f32.gmra.mrb[2].mxu0 %vm440_vm4, %v5348_v42  ;;  %5391 = vmatprep.subr.msk.mxu1 %vm447_vm2, %v1831_v12 }
  0xc3   : > { %5370 = vmatmul.mubr.msk.f32.gmra.mrb[0].mxu1 %vm440_vm4, %v5366_v43  ;;  %1499 = vmatprep.mubr.f32.mxu0 %v7663_v0 }
  0xc4   : > { %1795 = vmatprep.mubr.f32.mxu1 %v7663_v0 }
  0xc6   : > { %5363 = vmatmul.mubr.msk.f32.vlgmr.msra.gmra.mrb[0].mxu0 %vm440_vm4, %v5359_v48 }
  0xc7   : > { %5374 = vmatpush1.msk.msra.mxu0 %vm447_vm2, %v1624_v41  ;;  %5381 = vmatmul.mubr.msk.f32.vlgmr.msra.gmra.mrb[2].mxu1 %vm440_vm4, %v5377_v50 }
  0xc8   : > { %1505 = vmatprep.mubr.f32.mxu0 %v7663_v0  ;;  %1801 = vmatprep.mubr.f32.mxu1 %v7663_v0 }
  0xc9   : > { %5385 = vmatprep.subr.msk.mxu0 %vm447_vm2, %v1831_v12  ;;  %5392 = vmatpush1.msk.msra.mxu1 %vm447_vm2, %v1830_v51 }
  0xca   : > { %5364 = vmatmul.mubr.msk.f32.gmra.mrb[2].mxu0 %vm440_vm4, %v5360_v53  ;;  %5405 = vmatprep.subr.msk.mxu1 %vm447_vm2, %v2037_v52 }
  0xcb   : > { %5382 = vmatmul.mubr.msk.f32.gmra.mrb[0].mxu1 %vm440_vm4, %v5378_v54  ;;  %1705 = vmatprep.mubr.f32.mxu0 %v7663_v0 }
  0xcc   : > { %2001 = vmatprep.mubr.f32.mxu1 %v7663_v0 }
  0xce   : > { %5375 = vmatmul.mubr.msk.f32.vlgmr.msra.gmra.mrb[0].mxu0 %vm440_vm4, %v5371_v57 }
  0xcf   : > { %5386 = vmatpush1.msk.msra.mxu0 %vm447_vm2, %v1830_v51  ;;  %5393 = vmatmul.mubr.msk.f32.vlgmr.msra.gmra.mrb[2].mxu1 %vm440_vm4, %v5389_v58 }
  0xd0   : > { %1711 = vmatprep.mubr.f32.mxu0 %v7663_v0  ;;  %2007 = vmatprep.mubr.f32.mxu1 %v7663_v0 }
  0xd1   : > { %5399 = vmatprep.subr.msk.mxu0 %vm447_vm2, %v2037_v52  ;;  %5406 = vmatpush1.msk.msra.mxu1 %vm447_vm2, %v2036_v59 }
  0xd2   : > { %5376 = vmatmul.mubr.msk.f32.gmra.mrb[2].mxu0 %vm440_vm4, %v5372_v60 }
  0xd3   : > { %5394 = vmatmul.mubr.msk.f32.gmra.mrb[0].mxu1 %vm440_vm4, %v5390_v61  ;;  %1911 = vmatprep.mubr.f32.mxu0 %v7663_v0 }
  0xd4   : > { %2207 = vmatprep.mubr.f32.mxu1 %v7663_v0 }
  0xd6   : > { %5387 = vmatmul.mubr.msk.f32.vlgmr.msra.gmra.mrb[0].mxu0 %vm440_vm4, %v5383_v63 }
  0xd7   : > { %5400 = vmatpush1.msk.msra.mxu0 %vm447_vm2, %v2036_v59  ;;  %5407 = vmatmul.mubr.msk.f32.vlgmr.msra.gmra.mrb[2].mxu1 %vm440_vm4, %v5403_v1 }
  0xd8   : > { %1917 = vmatprep.mubr.f32.mxu0 %v7663_v0  ;;  %2213 = vmatprep.mubr.f32.mxu1 %v7663_v0 }
  0xda   : > { %5388 = vmatmul.mubr.msk.f32.gmra.mrb[2].mxu0 %vm440_vm4, %v5384_v2 }
  0xdb   : > { %5408 = vmatmul.mubr.msk.f32.gmra.mrb[0].mxu1 %vm440_vm4, %v5404_v3  ;;  %2117 = vmatprep.mubr.f32.mxu0 %v7663_v0 }
  0xdc   : > { %2813 = vmatprep.mubr.f32.mxu1 %v7663_v0 }
  0xde   : > { %5401 = vmatmul.mubr.msk.f32.vlgmr.msra.gmra.mrb[0].mxu0 %vm440_vm4, %v5397_v4 }
  0xdf   : > { %2123 = vmatprep.mubr.f32.mxu0 %v7663_v0 }
  0xe2   : > { %5402 = vmatmul.mubr.msk.f32.gmra.mrb[2].mxu0 %vm440_vm4, %v5398_v5 }
  0xe3   : > { %2579 = vmatprep.mubr.f32.mxu0 %v7663_v0 }
 0x17d   : > { %v695_v6 = vpop.f32.mrb[4].mxu0 }
 0x17e   : > { %v697_v7 = vpop.f32.mrb[5].mxu0 }
 0x1aa   : > { %v2209_v8 = vpop.f32.mrb[2].mxu1 }
 0x1ab   : > { %v5688_v14 = vadd.f32 %v2209_v8, %v695_v6  ;;  %v2211_v16 = vpop.f32.mrb[3].mxu1 }
 0x1ac   : > { %v5689_v17 = vadd.f32 %v2211_v16, %v697_v7 }
 0x1ad   : > { %v2252_v32 = vadd.f32 %v5688_v14, %v2245_v23 }
 0x1ae   : > { %v6387_v18 = vpop.f32.mrb[0].mxu1  ;;  %v2253_v25 = vadd.f32 %v5689_v17, %v2245_v23 }
 0x1af   : > { %v6389_v19 = vpop.f32.mrb[1].mxu1  ;;  %v2268_v35 = vadd.f32 %v2264_v33, %v2252_v32 }
 0x1b0   : > { %v2269_v31 = vadd.f32 %v2265_v28, %v2253_v25 }
 0x1b1   : > { %v6391_v20 = vpop.f32.mrb[0].mxu0  ;;  %v2276_v37 = vfloor.f32 %v2268_v35  ;;  %v2328_v46 = vmax.f32 %v2268_v35, 0.0 }
 0x1b2   : > { %v6393_v21 = vpop.f32.mrb[1].mxu0  ;;  %v2277_v34 = vfloor.f32 %v2269_v31  ;;  %v2329_v12 = vmax.f32 %v2269_v31, 0.0 }
 0x1b3   : > { %v2308_v40 = vadd.f32 1.0, %v2276_v37  ;;  %v2300_v42 = vmax.f32 %v2276_v37, 0.0  ;;  %v2332_v52 = vmin.f32 %v2328_v46, 15.0 }
 0x1b4   : > { %v2301_v36 = vmax.f32 %v2277_v34, 0.0  ;;  %v2309_v38 = vadd.f32 1.0, %v2277_v34  ;;  %v2333_v47 = vmin.f32 %v2329_v12, 15.0 }
 0x1b5   : > { %v6395_v24 = vpop.f32.mrb[2].mxu0  ;;  %v2312_v44 = vmax.f32 %v2308_v40, 0.0  ;;  %v2304_v48 = vmin.f32 %v2300_v42, 15.0 }
 0x1b6   : > { %7715 = vst [vmem:[#allocation7_spill] sm:$0xff] %v6395_v24  ;;  %v6397_v27 = vpop.f32.mrb[3].mxu0  ;;  %v2305_v39 = vmin.f32 %v2301_v36, 15.0  ;;  %v2313_v41 = vmax.f32 %v2309_v38, 0.0 }
 0x1b7   : > { %7716 = vst [vmem:[#allocation8_spill] sm:$0xff] %v6397_v27  ;;  %v2316_v11 = vmin.f32 %v2312_v44, 15.0  ;;  %v2352_v54 = vsub.f32 %v2304_v48, %v2332_v52  ;;  %v5784_v55 = vtrunc.f32 %v2304_v48 }
 0x1b8   : > { %v5786_v43 = vtrunc.f32 %v2305_v39  ;;  %v2317_v45 = vmin.f32 %v2313_v41, 15.0  ;;  %v2353_v50 = vsub.f32 %v2305_v39, %v2333_v47 }
 0x1b9   : > { %v2360_v58 = vsub.f32 %v2316_v11, %v2332_v52  ;;  %v5792_v59 = vtrunc.f32 %v2316_v11  ;;  %v6418_v1 = vadd.f32 1.0, %v2352_v54  ;;  %v6420_v2 = vcvt.f32.s32 %v5784_v55 }
 0x1ba   : > { %v6405_v49 = vcvt.f32.s32 %v5786_v43  ;;  %v5794_v51 = vtrunc.f32 %v2317_v45  ;;  %v2361_v53 = vsub.f32 %v2317_v45, %v2333_v47  ;;  %v6412_v60 = vadd.f32 1.0, %v2353_v50 }
 0x1bb   : > { %7721 = vst [vmem:[#allocation13_spill] sm:$0xff] %v6418_v1  ;;  %7722 = vst [vmem:[#allocation14_spill] sm:$0xff] %v6420_v2  ;;  %v6424_v3 = vsub.f32 1.0, %v2360_v58  ;;  %v6426_v4 = vcvt.f32.s32 %v5792_v59  ;;  %v2390_v36 = vrot.slane %v6420_v2, %v6088_v15  ;;  %v2402_v38 = vrot.slane %v6418_v1, %v6088_v15 }
 0x1bc   : > { %7717 = vst [vmem:[#allocation9_spill] sm:$0xff] %v6405_v49  ;;  %v2394_v57 = vrot.slane %v6405_v49, %v6088_v15  ;;  %7718 = vst [vmem:[#allocation10_spill] sm:$0xff] %v6412_v60  ;;  %v6414_v61 = vcvt.f32.s32 %v5794_v51  ;;  %v6416_v63 = vsub.f32 1.0, %v2361_v53  ;;  %v2406_v5 = vrot.slane %v6412_v60, %v6088_v15 }
 0x1bd   : > { %7723 = vst [vmem:[#allocation15_spill] sm:$0xff] %v6424_v3  ;;  %7724 = vst [vmem:[#allocation16_spill] sm:$0xff] %v6426_v4  ;;  %v2652_v8 = vrot.slane %v6405_v49, %v6075_v10  ;;  %v2664_v14 = vrot.slane %v6412_v60, %v6075_v10  ;;  %v2414_v39 = vrot.slane %v6426_v4, %v6088_v15 }
 0x1be   : > { %7719 = vst [vmem:[#allocation11_spill] sm:$0xff] %v6414_v61  ;;  %7720 = vst [vmem:[#allocation12_spill] sm:$0xff] %v6416_v63  ;;  %vm2396_vm10 = vcmp.eq.s32.totalorder %v6072_v9, %v2394_v57  ;;  %vm2398_vm11 = vcmp.eq.s32.totalorder %v6408_v56, %v2394_v57  ;;  %v2418_v6 = vrot.slane %v6414_v61, %v6088_v15 }
 0x1bf   : > { %v2430_v7 = vrot.slane %v6416_v63, %v6088_v15  ;;  %v2676_v16 = vrot.slane %v6414_v61, %v6075_v10  ;;  %v2408_v17 = vsel %vm2396_vm10, %v2406_v5, 0.0  ;;  %v2410_v23 = vsel %vm2398_vm11, %v2406_v5, 0.0 }
 0x1c0   : > { %vm2420_vm12 = vcmp.eq.s32.totalorder %v6072_v9, %v2418_v6  ;;  %vm2422_vm13 = vcmp.eq.s32.totalorder %v6408_v56, %v2418_v6  ;;  %vm2654_vm14 = vcmp.eq.s32.totalorder %v6072_v9, %v2652_v8  ;;  %vm2656_vm15 = vcmp.eq.s32.totalorder %v6408_v56, %v2652_v8  ;;  %v6479_v6 = vld [vmem:[%s6474_s12] sm:$0xff] }
 0x1c1   : > { %v2432_v25 = vsel %vm2420_vm12, %v2430_v7, 0.0  ;;  %v2434_v28 = vsel %vm2422_vm13, %v2430_v7, 0.0  ;;  %v2666_v33 = vsel %vm2654_vm14, %v2664_v14, 0.0  ;;  %v2668_v34 = vsel %vm2656_vm15, %v2664_v14, 0.0 }
 0x1c2   : > { %v2436_v31 = vadd.f32 %v2432_v25, %v2408_v17  ;;  %v2438_v32 = vadd.f32 %v2434_v28, %v2410_v23  ;;  %vm2678_vm0 = vcmp.eq.s32.totalorder %v6072_v9, %v2676_v16  ;;  %vm2680_vm2 = vcmp.eq.s32.totalorder %v6408_v56, %v2676_v16  ;;  %v6485_v16 = vld [vmem:[%s6474_s12 + $0x8] sm:$0xff]  ;;  %v6493_v17 = vld [vmem:[%s6474_s12 + $0x10] sm:$0xff]  ;;  %v6502_v23 = vld [vmem:[%s6474_s12 + $0x18] sm:$0xff] }
 0x1c3   : > { %v2688_v35 = vrot.slane %v6416_v63, %v6075_v10  ;;  %v2426_v40 = vrot.slane %v6424_v3, %v6088_v15  ;;  %vm2395_vm3 = vcmp.eq.s32.totalorder %v6072_v9, %v2390_v36  ;;  %vm2397_vm4 = vcmp.eq.s32.totalorder %v6408_v56, %v2390_v36  ;;  %v6511_v25 = vld [vmem:[%s6474_s12 + $0x20] sm:$0xff]  ;;  %v6520_v28 = vld [vmem:[%s6474_s12 + $0x28] sm:$0xff] }
 0x1c4   : > { %v5506_v37 = vpack.c.bf16 %v2438_v32, %v2436_v31  ;;  %v2407_v44 = vsel %vm2395_vm3, %v2402_v38, 0.0  ;;  %v2409_v45 = vsel %vm2397_vm4, %v2402_v38, 0.0  ;;  %vm2419_vm5 = vcmp.eq.s32.totalorder %v6072_v9, %v2414_v39  ;;  %v6529_v31 = vld [vmem:[%s6474_s12 + $0x30] sm:$0xff]  ;;  %v6538_v32 = vld [vmem:[%s6474_s12 + $0x38] sm:$0xff]  ;;  %v2257_v38 = vld [vmem:[%s7658_s6 + $0x8] sm:$0xff] }
 0x1c5   : > { %v2690_v41 = vsel %vm2678_vm0, %v2688_v35, 0.0  ;;  %v2692_v12 = vsel %vm2680_vm2, %v2688_v35, 0.0  ;;  %vm2421_vm6 = vcmp.eq.s32.totalorder %v6408_v56, %v2414_v39  ;;  %v2648_v46 = vrot.slane %v6420_v2, %v6075_v10  ;;  %v2256_v35 = vld [vmem:[%s7658_s6] sm:$0xff] }
 0x1c6   : > { %5507 = vmatprep.subr.bf16.mxu0 %v5506_v37  ;;  %v2694_v42 = vadd.f32 %v2690_v41, %v2666_v33  ;;  %v2696_v43 = vadd.f32 %v2692_v12, %v2668_v34  ;;  %v2431_v48 = vsel %vm2419_vm5, %v2426_v40, 0.0  ;;  %v2433_v11 = vsel %vm2421_vm6, %v2426_v40, 0.0  ;;  %v2229_v33 = vpop.permute.xlu1 %2228 }
 0x1c7   : > { %v2672_v50 = vrot.slane %v6426_v4, %v6075_v10  ;;  %v2435_v51 = vadd.f32 %v2431_v48, %v2407_v44  ;;  %v2437_v52 = vadd.f32 %v2433_v11, %v2409_v45  ;;  %v2660_v53 = vrot.slane %v6418_v1, %v6075_v10 }
 0x1c8   : > { %v5510_v47 = vpack.c.bf16 %v2696_v43, %v2694_v42  ;;  %vm2653_vm7 = vcmp.eq.s32.totalorder %v6072_v9, %v2648_v46  ;;  %vm2655_vm8 = vcmp.eq.s32.totalorder %v6408_v56, %v2648_v46  ;;  %v2684_v55 = vrot.slane %v6424_v3, %v6075_v10 }
 0x1c9   : > { %vm2677_vm9 = vcmp.eq.s32.totalorder %v6072_v9, %v2672_v50  ;;  %vm2679_vm10 = vcmp.eq.s32.totalorder %v6408_v56, %v2672_v50  ;;  %v5508_v54 = vpack.c.bf16 %v2437_v52, %v2435_v51  ;;  %v2665_v57 = vsel %vm2653_vm7, %v2660_v53, 0.0 }
 0x1ca   : > { %5511 = vmatprep.subr.bf16.mxu1 %v5510_v47  ;;  %v2667_v58 = vsel %vm2655_vm8, %v2660_v53, 0.0  ;;  %v2689_v59 = vsel %vm2677_vm9, %v2684_v55, 0.0  ;;  %v2691_v5 = vsel %vm2679_vm10, %v2684_v55, 0.0  ;;  %v2236_v34 = vadd.f32 %v2229_v33, %v6391_v20 }
 0x1cb   : > { %5509 = vmatpush1.bf16.msra.mxu0 %v5508_v54  ;;  %v2693_v7 = vadd.f32 %v2689_v59, %v2665_v57  ;;  %v2695_v8 = vadd.f32 %v2691_v5, %v2667_v58  ;;  %v2237_v37 = vadd.f32 %v2229_v33, %v6393_v21 }
 0x1cc   : > { %v2260_v36 = vadd.f32 %v2256_v35, %v2236_v34 }
 0x1cd   : > { %v5512_v14 = vpack.c.bf16 %v2695_v8, %v2693_v7  ;;  %v2261_v40 = vadd.f32 %v2257_v38, %v2237_v37 }
 0x1ce   : > { %5409 = vmatmul.mubr.msk.f32.vlgmr.msra.gmra.mrb[6].mxu0 %vm422_vm1, %v6479_v6  ;;  %v2272_v39 = vfloor.f32 %v2260_v36  ;;  %v2320_v46 = vmax.f32 %v2260_v36, 0.0 }
 0x1cf   : > { %2585 = vmatprep.mubr.f32.mxu0 %v7663_v0  ;;  %5513 = vmatpush1.bf16.msra.mxu1 %v5512_v14  ;;  %v2273_v12 = vfloor.f32 %v2261_v40  ;;  %v2321_v53 = vmax.f32 %v2261_v40, 0.0 }
 0x1d0   : > { %v2288_v41 = vadd.f32 1.0, %v2272_v39  ;;  %v2280_v42 = vmax.f32 %v2272_v39, 0.0  ;;  %v2324_v51 = vmin.f32 %v2320_v46, 15.0 }
 0x1d1   : > { %v2289_v44 = vadd.f32 1.0, %v2273_v12  ;;  %v2281_v48 = vmax.f32 %v2273_v12, 0.0  ;;  %v2325_v5 = vmin.f32 %v2321_v53, 15.0 }
 0x1d2   : > { %5410 = vmatmul.mubr.msk.f32.gmra.mrb[8].mxu0 %vm422_vm1, %v6485_v16  ;;  %5417 = vmatmul.mubr.msk.f32.vlgmr.msra.gmra.mrb[4].mxu1 %vm422_vm1, %v6479_v6  ;;  %v2292_v43 = vmax.f32 %v2288_v41, 0.0  ;;  %v2284_v45 = vmin.f32 %v2280_v42, 15.0 }
 0x1d3   : > { %2591 = vmatprep.mubr.f32.mxu0 %v7663_v0  ;;  %2819 = vmatprep.mubr.f32.mxu1 %v7663_v0  ;;  %v2293_v47 = vmax.f32 %v2289_v44, 0.0  ;;  %v2285_v52 = vmin.f32 %v2281_v48, 15.0 }
 0x1d4   : > { %v2296_v20 = vmin.f32 %v2292_v43, 15.0  ;;  %v5768_v11 = vtrunc.f32 %v2284_v45  ;;  %v2336_v54 = vsub.f32 %v2284_v45, %v2324_v51 }
 0x1d5   : > { %v2297_v21 = vmin.f32 %v2293_v47, 15.0  ;;  %v5770_v7 = vtrunc.f32 %v2285_v52  ;;  %v2337_v36 = vsub.f32 %v2285_v52, %v2325_v5 }
 0x1d6   : > { %5411 = vmatmul.mubr.msk.f32.gmra.mrb[10].mxu0 %vm422_vm1, %v6493_v17  ;;  %5418 = vmatmul.mubr.msk.f32.gmra.mrb[6].mxu1 %vm422_vm1, %v6485_v16  ;;  %v5776_v50 = vtrunc.f32 %v2296_v20  ;;  %v2344_v55 = vsub.f32 %v2296_v20, %v2324_v51  ;;  %v6558_v57 = vcvt.f32.s32 %v5768_v11  ;;  %v6562_v8 = vadd.f32 1.0, %v2336_v54 }
 0x1d7   : > { %2597 = vmatprep.mubr.f32.mxu0 %v7663_v0  ;;  %2825 = vmatprep.mubr.f32.mxu1 %v7663_v0  ;;  %v5778_v59 = vtrunc.f32 %v2297_v21  ;;  %v2345_v33 = vsub.f32 %v2297_v21, %v2325_v5  ;;  %v6572_v38 = vcvt.f32.s32 %v5770_v7  ;;  %v6584_v42 = vadd.f32 1.0, %v2337_v36 }
 0x1d8   : > { %v6560_v58 = vcvt.f32.s32 %v5776_v50  ;;  %7725 = vst [vmem:[#allocation17_spill] sm:$0xff] %v6562_v8  ;;  %v6564_v14 = vsub.f32 1.0, %v2344_v55  ;;  %v2442_v34 = vrot.slane %v6558_v57, %v6088_v15  ;;  %v2454_v39 = vrot.slane %v6562_v8, %v6088_v15 }
 0x1d9   : > { %v6570_v37 = vcvt.f32.s32 %v5778_v59  ;;  %v6578_v41 = vsub.f32 1.0, %v2345_v33  ;;  %v2700_v12 = vrot.slane %v6558_v57, %v6075_v10  ;;  %7727 = vst [vmem:[#allocation19_spill] sm:$0xff] %v6584_v42  ;;  %v2446_v45 = vrot.slane %v6572_v38, %v6088_v15 }
 0x1da   : > { %5412 = vmatmul.mubr.msk.f32.gmra.mrb[12].mxu0 %vm422_vm1, %v6502_v23  ;;  %5419 = vmatmul.mubr.msk.f32.gmra.mrb[8].mxu1 %vm422_vm1, %v6493_v17  ;;  %v2466_v35 = vrot.slane %v6560_v58, %v6088_v15  ;;  %v2478_v40 = vrot.slane %v6564_v14, %v6088_v15  ;;  %vm2447_vm11 = vcmp.eq.s32.totalorder %v6072_v9, %v2442_v34 }
 0x1db   : > { %2603 = vmatprep.mubr.f32.mxu0 %v7663_v0  ;;  %2831 = vmatprep.mubr.f32.mxu1 %v7663_v0  ;;  %7726 = vst [vmem:[#allocation18_spill] sm:$0xff] %v6578_v41  ;;  %v2724_v43 = vrot.slane %v6560_v58, %v6075_v10  ;;  %v2470_v44 = vrot.slane %v6570_v37, %v6088_v15  ;;  %v2459_v20 = vsel %vm2447_vm11, %v2454_v39, 0.0 }
 0x1dc   : > { %vm2471_vm12 = vcmp.eq.s32.totalorder %v6072_v9, %v2466_v35  ;;  %v2712_v47 = vrot.slane %v6562_v8, %v6075_v10  ;;  %vm2705_vm13 = vcmp.eq.s32.totalorder %v6072_v9, %v2700_v12  ;;  %v2736_v48 = vrot.slane %v6564_v14, %v6075_v10 }
 0x1dd   : > { %v2483_v46 = vsel %vm2471_vm12, %v2478_v40, 0.0  ;;  %v2482_v11 = vrot.slane %v6578_v41, %v6088_v15  ;;  %vm2473_vm14 = vcmp.eq.s32.totalorder %v6408_v56, %v2466_v35  ;;  %vm2729_vm15 = vcmp.eq.s32.totalorder %v6072_v9, %v2724_v43 }
 0x1de   : > { %5413 = vmatmul.mubr.msk.f32.gmra.mrb[14].mxu0 %vm422_vm1, %v6511_v25  ;;  %5420 = vmatmul.mubr.msk.f32.gmra.mrb[10].mxu1 %vm422_vm1, %v6502_v23  ;;  %v2458_v50 = vrot.slane %v6584_v42, %v6088_v15  ;;  %vm2472_vm0 = vcmp.eq.s32.totalorder %v6072_v9, %v2470_v44  ;;  %vm2474_vm2 = vcmp.eq.s32.totalorder %v6408_v56, %v2470_v44  ;;  %v2717_v53 = vsel %vm2705_vm13, %v2712_v47, 0.0 }
 0x1df   : > { %2609 = vmatprep.mubr.f32.mxu0 %v7663_v0  ;;  %2837 = vmatprep.mubr.f32.mxu1 %v7663_v0  ;;  %v6605_v51 = vadd.f32 %v2483_v46, %v2459_v20  ;;  %vm2448_vm3 = vcmp.eq.s32.totalorder %v6072_v9, %v2446_v45  ;;  %v2728_v21 = vrot.slane %v6570_v37, %v6075_v10  ;;  %v2485_v55 = vsel %vm2473_vm14, %v2478_v40, 0.0 }
 0x1e0   : > { %vm2449_vm4 = vcmp.eq.s32.totalorder %v6408_v56, %v2442_v34  ;;  %v2704_v54 = vrot.slane %v6572_v38, %v6075_v10  ;;  %vm2450_vm5 = vcmp.eq.s32.totalorder %v6408_v56, %v2446_v45  ;;  %v2741_v59 = vsel %vm2729_vm15, %v2736_v48, 0.0 }
 0x1e1   : > { %v2484_v5 = vsel %vm2472_vm0, %v2482_v11, 0.0  ;;  %v2716_v33 = vrot.slane %v6584_v42, %v6075_v10  ;;  %v2486_v35 = vsel %vm2474_vm2, %v2482_v11, 0.0  ;;  %v2460_v36 = vsel %vm2448_vm3, %v2458_v50, 0.0 }
 0x1e2   : > { %5414 = vmatmul.mubr.msk.f32.gmra.mrb[16].mxu0 %vm422_vm1, %v6520_v28  ;;  %5421 = vmatmul.mubr.msk.f32.gmra.mrb[12].mxu1 %vm422_vm1, %v6511_v25  ;;  %v2740_v44 = vrot.slane %v6578_v41, %v6075_v10  ;;  %v2461_v34 = vsel %vm2449_vm4, %v2454_v39, 0.0  ;;  %vm2731_vm6 = vcmp.eq.s32.totalorder %v6408_v56, %v2724_v43  ;;  %vm2730_vm7 = vcmp.eq.s32.totalorder %v6072_v9, %v2728_v21 }
 0x1e3   : > { %2615 = vmatprep.mubr.f32.mxu0 %v7663_v0  ;;  %2843 = vmatprep.mubr.f32.mxu1 %v7663_v0  ;;  %v6620_v20 = vadd.f32 %v2485_v55, %v2461_v34  ;;  %v2462_v40 = vsel %vm2450_vm5, %v2458_v50, 0.0  ;;  %vm2732_vm8 = vcmp.eq.s32.totalorder %v6408_v56, %v2728_v21  ;;  %v6623_v45 = vadd.f32 %v2484_v5, %v2460_v36 }
 0x1e4   : > { %vm2706_vm9 = vcmp.eq.s32.totalorder %v6072_v9, %v2704_v54  ;;  %vm2707_vm10 = vcmp.eq.s32.totalorder %v6408_v56, %v2700_v12  ;;  %v6627_v11 = vadd.f32 %v2486_v35, %v2462_v40  ;;  %vm2708_vm11 = vcmp.eq.s32.totalorder %v6408_v56, %v2704_v54 }
 0x1e5   : > { %v2742_v5 = vsel %vm2730_vm7, %v2740_v44, 0.0  ;;  %v2744_v12 = vsel %vm2732_vm8, %v2740_v44, 0.0  ;;  %v6638_v35 = vadd.f32 %v2741_v59, %v2717_v53  ;;  %v2719_v40 = vsel %vm2707_vm10, %v2712_v47, 0.0 }
 0x1e6   : > { %5415 = vmatmul.mubr.msk.f32.gmra.mrb[18].mxu0 %vm422_vm1, %v6529_v31  ;;  %5422 = vmatmul.mubr.msk.f32.gmra.mrb[14].mxu1 %vm422_vm1, %v6520_v28 }
 0x1e7   : > { %2621 = vmatprep.mubr.f32.mxu0 %v7663_v0  ;;  %2849 = vmatprep.mubr.f32.mxu1 %v7663_v0 }
 0x1ea   : > { %5416 = vmatmul.mubr.msk.f32.gmra.mrb[20].mxu0 %vm422_vm1, %v6538_v32  ;;  %5423 = vmatmul.mubr.msk.f32.gmra.mrb[16].mxu1 %vm422_vm1, %v6529_v31 }
 0x1eb   : > { %2855 = vmatprep.mubr.f32.mxu1 %v7663_v0  ;;  %3022 = vmatprep.mubr.f32.mxu0 %v7663_v0 }
 0x1ee   : > { %5424 = vmatmul.mubr.msk.f32.gmra.mrb[18].mxu1 %vm422_vm1, %v6538_v32 }
 0x1ef   : > { %2948 = vmatprep.mubr.f32.mxu1 %v7663_v0  ;;  %v2743_v0 = vsel %vm2731_vm6, %v2736_v48, 0.0  ;;  %v2718_v48 = vsel %vm2706_vm9, %v2716_v33, 0.0 }
 0x1f0   : > { %v6644_v24 = vadd.f32 %v2742_v5, %v2718_v48 }
 0x2a1   : > { %v2581_v52 = vpop.f32.mrb[6].mxu0 }
 0x2a2   : > { %v2583_v7 = vpop.f32.mrb[7].mxu0  ;;  %v2628_v10 = vmul.f32 %v2581_v52, %v6605_v51 }
 0x2a3   : > { %v2629_v50 = vmul.f32 %v2583_v7, %v6623_v45  ;;  %v2720_v7 = vsel %vm2708_vm11, %v2716_v33, 0.0 }
 0x2a4   : > { %v6646_v42 = vadd.f32 %v2744_v12, %v2720_v7 }
 0x2a5   : > { %v2587_v46 = vpop.f32.mrb[8].mxu0  ;;  %v2815_v39 = vpop.f32.mrb[4].mxu1 }
 0x2a6   : > { %v2630_v43 = vmul.f32 %v2587_v46, %v6620_v20  ;;  %v2589_v55 = vpop.f32.mrb[9].mxu0  ;;  %v2817_v36 = vpop.f32.mrb[5].mxu1  ;;  %v6642_v46 = vadd.f32 %v2743_v0, %v2719_v40  ;;  %v2862_v21 = vmul.f32 %v2815_v39, %v6638_v35  ;;  %v3060_v39 = vrot.slane %v6414_v61, %v6099_v22 }
 0x2a7   : > { %v2631_v34 = vmul.f32 %v2589_v55, %v6627_v11  ;;  %v2863_v47 = vmul.f32 %v2817_v36, %v6644_v24  ;;  %v3072_v40 = vrot.slane %v6416_v63, %v6099_v22 }
 0x2a8   : > { %v5532_v52 = vpack.c.bf16 %v2630_v43, %v2628_v10  ;;  %vm3062_vm12 = vcmp.eq.s32.totalorder %v6072_v9, %v3060_v39  ;;  %vm3064_vm13 = vcmp.eq.s32.totalorder %v6408_v56, %v3060_v39 }
 0x2a9   : > { %v5530_v30 = vpack.c.bf16 %v2631_v34, %v2629_v50  ;;  %v2593_v27 = vpop.f32.mrb[10].mxu0  ;;  %v2821_v26 = vpop.f32.mrb[6].mxu1  ;;  %v3036_v34 = vrot.slane %v6405_v49, %v6099_v22 }
 0x2aa   : > { %v2595_v55 = vpop.f32.mrb[11].mxu0  ;;  %v2864_v53 = vmul.f32 %v2821_v26, %v6642_v46  ;;  %v2823_v59 = vpop.f32.mrb[7].mxu1  ;;  %v2632_v10 = vmul.f32 %v2593_v27, %v6605_v51 }
 0x2ab   : > { %5531 = vmatprep.subr.bf16.mxu0 %v5530_v30  ;;  %v2865_v0 = vmul.f32 %v2823_v59, %v6646_v42  ;;  %v2633_v26 = vmul.f32 %v2595_v55, %v6623_v45  ;;  %vm3038_vm14 = vcmp.eq.s32.totalorder %v6072_v9, %v3036_v34  ;;  %vm3040_vm15 = vcmp.eq.s32.totalorder %v6408_v56, %v3036_v34 }
 0x2ac   : > { %5533 = vmatpush1.bf16.msra.mxu0 %v5532_v52  ;;  %v5516_v54 = vpack.c.bf16 %v2864_v53, %v2862_v21  ;;  %v3048_v21 = vrot.slane %v6412_v60, %v6099_v22  ;;  %v3347_v34 = vrot.slane %v6405_v49, %v6108_v29 }
 0x2ad   : > { %v2599_v33 = vpop.f32.mrb[12].mxu0  ;;  %v5514_v44 = vpack.c.bf16 %v2865_v0, %v2863_v47  ;;  %v2827_v43 = vpop.f32.mrb[8].mxu1  ;;  %v3032_v47 = vrot.slane %v6420_v2, %v6099_v22 }
 0x2ae   : > { %v2634_v50 = vmul.f32 %v2599_v33, %v6620_v20  ;;  %v2601_v5 = vpop.f32.mrb[13].mxu0  ;;  %v2829_v30 = vpop.f32.mrb[9].mxu1  ;;  %v2866_v55 = vmul.f32 %v2827_v43, %v6638_v35  ;;  %v3044_v33 = vrot.slane %v6418_v1, %v6099_v22  ;;  %v3074_v43 = vsel %vm3062_vm12, %v3072_v40, 0.0 }
 0x2af   : > { %v2635_v36 = vmul.f32 %v2601_v5, %v6627_v11  ;;  %5515 = vmatprep.subr.bf16.mxu1 %v5514_v44  ;;  %v2867_v0 = vmul.f32 %v2829_v30, %v6644_v24  ;;  %v3056_v5 = vrot.slane %v6426_v4, %v6099_v22  ;;  %vm3037_vm0 = vcmp.eq.s32.totalorder %v6072_v9, %v3032_v47 }
 0x2b0   : > { %v5536_v12 = vpack.c.bf16 %v2634_v50, %v2632_v10  ;;  %5517 = vmatpush1.bf16.msra.mxu1 %v5516_v54  ;;  %v3076_v50 = vsel %vm3064_vm13, %v3072_v40, 0.0  ;;  %v3052_v40 = vsel %vm3040_vm15, %v3048_v21, 0.0  ;;  %vm3039_vm2 = vcmp.eq.s32.totalorder %v6408_v56, %v3032_v47 }
 0x2b1   : > { %v5534_v52 = vpack.c.bf16 %v2635_v36, %v2633_v26  ;;  %v2605_v27 = vpop.f32.mrb[14].mxu0  ;;  %v2833_v48 = vpop.f32.mrb[10].mxu1  ;;  %vm3061_vm3 = vcmp.eq.s32.totalorder %v6072_v9, %v3056_v5  ;;  %vm3063_vm4 = vcmp.eq.s32.totalorder %v6408_v56, %v3056_v5  ;;  %vm3349_vm5 = vcmp.eq.s32.totalorder %v6072_v9, %v3347_v34 }
 0x2b2   : > { %v2607_v7 = vpop.f32.mrb[15].mxu0  ;;  %v2868_v53 = vmul.f32 %v2833_v48, %v6642_v46  ;;  %v2835_v59 = vpop.f32.mrb[11].mxu1  ;;  %v2636_v26 = vmul.f32 %v2605_v27, %v6605_v51  ;;  %vm3351_vm6 = vcmp.eq.s32.totalorder %v6408_v56, %v3347_v34  ;;  %v3383_v5 = vrot.slane %v6416_v63, %v6108_v29 }
 0x2b3   : > { %5535 = vmatprep.subr.bf16.mxu0 %v5534_v52  ;;  %v2869_v54 = vmul.f32 %v2835_v59, %v6646_v42  ;;  %v2637_v48 = vmul.f32 %v2607_v7, %v6623_v45  ;;  %v3068_v7 = vrot.slane %v6424_v3, %v6099_v22  ;;  %v3343_v34 = vrot.slane %v6420_v2, %v6108_v29 }
 0x2b4   : > { %5537 = vmatpush1.bf16.msra.mxu0 %v5536_v12  ;;  %v5520_v44 = vpack.c.bf16 %v2868_v53, %v2866_v55  ;;  %v3050_v12 = vsel %vm3038_vm14, %v3048_v21, 0.0 }
 0x2b5   : > { %v2611_v10 = vpop.f32.mrb[16].mxu0  ;;  %v5518_v39 = vpack.c.bf16 %v2869_v54, %v2867_v0  ;;  %v2839_v36 = vpop.f32.mrb[12].mxu1  ;;  %v6687_v27 = vadd.f32 %v3074_v43, %v3050_v12  ;;  %v6689_v0 = vadd.f32 %v3076_v50, %v3052_v40  ;;  %v3073_v40 = vsel %vm3061_vm3, %v3068_v7, 0.0 }
 0x2b6   : > { %v2638_v30 = vmul.f32 %v2611_v10, %v6620_v20  ;;  %v2613_v52 = vpop.f32.mrb[17].mxu0  ;;  %v2841_v59 = vpop.f32.mrb[13].mxu1  ;;  %v2870_v21 = vmul.f32 %v2839_v36, %v6638_v35  ;;  %v3075_v47 = vsel %vm3063_vm4, %v3068_v7, 0.0  ;;  %vm3348_vm11 = vcmp.eq.s32.totalorder %v6072_v9, %v3343_v34 }
 0x2b7   : > { %v2639_v55 = vmul.f32 %v2613_v52, %v6627_v11  ;;  %5519 = vmatprep.subr.bf16.mxu1 %v5518_v39  ;;  %v3051_v39 = vsel %vm3039_vm2, %v3044_v33, 0.0  ;;  %vm3350_vm14 = vcmp.eq.s32.totalorder %v6408_v56, %v3343_v34  ;;  %vm2880_vm2 = vcmask 523264  }
 0x2b8   : > { %v5540_v53 = vpack.c.bf16 %v2638_v30, %v2636_v26  ;;  %5521 = vmatpush1.bf16.msra.mxu1 %v5520_v44  ;;  %v3049_v44 = vsel %vm3037_vm0, %v3044_v33, 0.0  ;;  %v2871_v26 = vmul.f32 %v2841_v59, %v6644_v24  ;;  %v3359_v33 = vrot.slane %v6412_v60, %v6108_v29 }
 0x2b9   : > { %v5538_v54 = vpack.c.bf16 %v2639_v55, %v2637_v48  ;;  %v2617_v10 = vpop.f32.mrb[18].mxu0  ;;  %v2845_v52 = vpop.f32.mrb[14].mxu1  ;;  %v3371_v48 = vrot.slane %v6414_v61, %v6108_v29 }
 0x2ba   : > { %v2619_v8 = vpop.f32.mrb[19].mxu0  ;;  %v2872_v43 = vmul.f32 %v2845_v52, %v6642_v46  ;;  %v2847_v50 = vpop.f32.mrb[15].mxu1 }
 0x2bb   : > { %5539 = vmatprep.subr.bf16.mxu0 %v5538_v54  ;;  %v2873_v30 = vmul.f32 %v2847_v50, %v6646_v42  ;;  %vm3373_vm7 = vcmp.eq.s32.totalorder %v6072_v9, %v3371_v48  ;;  %vm3375_vm8 = vcmp.eq.s32.totalorder %v6408_v56, %v3371_v48  ;;  %v4005_v48 = vrot.slane %v6416_v63, %v6184_v62 }
 0x2bc   : > { %5541 = vmatpush1.bf16.msra.mxu0 %v5540_v53  ;;  %v5524_v36 = vpack.c.bf16 %v2872_v43, %v2870_v21  ;;  %v2640_v53 = vmul.f32 %v2617_v10, %v6605_v51  ;;  %v2641_v21 = vmul.f32 %v2619_v8, %v6623_v45  ;;  %v3361_v10 = vsel %vm3349_vm5, %v3359_v33, 0.0 }
 0x2bd   : > { %v2623_v55 = vpop.f32.mrb[20].mxu0  ;;  %v5522_v59 = vpack.c.bf16 %v2873_v30, %v2871_v26  ;;  %v2851_v54 = vpop.f32.mrb[16].mxu1  ;;  %v3077_v26 = vadd.f32 %v3073_v40, %v3049_v44  ;;  %v3367_v8 = vrot.slane %v6426_v4, %v6108_v29  ;;  %v3355_v30 = vrot.slane %v6418_v1, %v6108_v29 }
 0x2be   : > { %v2642_v52 = vmul.f32 %v2623_v55, %v6620_v20  ;;  %v2625_v50 = vpop.f32.mrb[21].mxu0  ;;  %v2853_v43 = vpop.f32.mrb[17].mxu1  ;;  %v3079_v20 = vadd.f32 %v3075_v47, %v3051_v39  ;;  %v3993_v44 = vrot.slane %v6414_v61, %v6184_v62  ;;  %v2874_v55 = vmul.f32 %v2851_v54, %v6638_v35 }
 0x2bf   : > { %v2643_v12 = vmul.f32 %v2625_v50, %v6627_v11  ;;  %5523 = vmatprep.subr.bf16.mxu1 %v5522_v59  ;;  %v3363_v11 = vsel %vm3351_vm6, %v3359_v33, 0.0  ;;  %v3387_v40 = vsel %vm3375_vm8, %v3383_v5, 0.0  ;;  %v2875_v47 = vmul.f32 %v2853_v43, %v6644_v24 }
 0x2c0   : > { %v5544_v7 = vpack.c.bf16 %v2642_v52, %v2640_v53  ;;  %5525 = vmatpush1.bf16.msra.mxu1 %v5524_v36  ;;  %v3385_v36 = vsel %vm3373_vm7, %v3383_v5, 0.0  ;;  %v3379_v59 = vrot.slane %v6424_v3, %v6108_v29  ;;  %v3969_v35 = vrot.slane %v6405_v49, %v6184_v62 }
 0x2c1   : > { %v5542_v51 = vpack.c.bf16 %v2643_v12, %v2641_v21  ;;  %v2857_v45 = vpop.f32.mrb[18].mxu1  ;;  %vm3372_vm9 = vcmp.eq.s32.totalorder %v6072_v9, %v3367_v8  ;;  %vm3374_vm10 = vcmp.eq.s32.totalorder %v6408_v56, %v3367_v8  ;;  %vm3995_vm12 = vcmp.eq.s32.totalorder %v6072_v9, %v3993_v44  ;;  %v5425_v21 = vld [vmem:[%s7661_s9 + $0x8] sm:$0xff] }
 0x2c2   : > { %v2876_v12 = vmul.f32 %v2857_v45, %v6642_v46  ;;  %v2859_v39 = vpop.f32.mrb[19].mxu1  ;;  %vm3997_vm13 = vcmp.eq.s32.totalorder %v6408_v56, %v3993_v44  ;;  %v3389_v24 = vadd.f32 %v3385_v36, %v3361_v10  ;;  %v3981_v54 = vrot.slane %v6412_v60, %v6184_v62 }
 0x2c3   : > { %5543 = vmatprep.subr.bf16.mxu0 %v5542_v51  ;;  %v2877_v33 = vmul.f32 %v2859_v39, %v6646_v42  ;;  %v3391_v42 = vadd.f32 %v3387_v40, %v3363_v11  ;;  %v3384_v52 = vsel %vm3372_vm9, %v3379_v59, 0.0  ;;  %v3386_v50 = vsel %vm3374_vm10, %v3379_v59, 0.0 }
 0x2c4   : > { %5545 = vmatpush1.bf16.msra.mxu0 %v5544_v7  ;;  %v5528_v46 = vpack.c.bf16 %v2876_v12, %v2874_v55  ;;  %vm3971_vm15 = vcmp.eq.s32.totalorder %v6072_v9, %v3969_v35  ;;  %vm3973_vm0 = vcmp.eq.s32.totalorder %v6408_v56, %v3969_v35  ;;  %v4007_v43 = vsel %vm3995_vm12, %v4005_v48, 0.0 }
 0x2c5   : > { %v5526_v53 = vpack.c.bf16 %v2877_v33, %v2875_v47  ;;  %v4009_v5 = vsel %vm3997_vm13, %v4005_v48, 0.0  ;;  %v7728_v7 = vpack.c.bf16 %v6689_v0, %v6687_v27  ;;  %v5548_v51 = vpack.c.bf16 %v3079_v20, %v3077_v26  ;;  %v6778_v26 = vpop.permute.xlu1 %2249  ;;  %v2267_v47 = vld [vmem:[%s7659_s7 + $0x18] sm:$0x1] }
 0x2c6   : > { %v3360_v10 = vsel %vm3348_vm11, %v3355_v30, 0.0  ;;  %v3362_v8 = vsel %vm3350_vm14, %v3355_v30, 0.0  ;;  %v3983_v44 = vsel %vm3971_vm15, %v3981_v54, 0.0  ;;  %v3985_v55 = vsel %vm3973_vm0, %v3981_v54, 0.0 }
 0x2c7   : > { %5527 = vmatprep.subr.bf16.mxu1 %v5526_v53  ;;  %v3388_v45 = vadd.f32 %v3384_v52, %v3360_v10  ;;  %v3390_v11 = vadd.f32 %v3386_v50, %v3362_v8  ;;  %v5566_v12 = vpack.c.bf16 %v3391_v42, %v3389_v24  ;;  %v4011_v39 = vadd.f32 %v4007_v43, %v3983_v44 }
 0x2c8   : > { %5529 = vmatpush1.bf16.msra.mxu1 %v5528_v46  ;;  %v4013_v36 = vadd.f32 %v4009_v5, %v3985_v55  ;;  %v7729_v40 = vmov 0.0   ;;  %v3989_v20 = vrot.slane %v6426_v4, %v6184_v62  ;;  %v2255_v34 = vadd.f32 %v6778_v26, %v6389_v19 }
 0x2c9   : > { %5547 = vmatprep.subr.bf16.mxu1 %v7728_v7  ;;  %v5568_v27 = vpack.c.bf16 %v3390_v11, %v3388_v45  ;;  %v4304_v30 = vrot.slane %v6414_v61, %v6214_v13  ;;  %v3965_v33 = vrot.slane %v6420_v2, %v6184_v62  ;;  %v4001_v59 = vrot.slane %v6424_v3, %v6184_v62 }
 0x2ca   : > { %v5606_v0 = vpack.c.bf16 %v4013_v36, %v4011_v39  ;;  %v4280_v35 = vrot.slane %v6405_v49, %v6214_v13  ;;  %vm3994_vm3 = vcmp.eq.s32.totalorder %v6072_v9, %v3989_v20  ;;  %vm3996_vm4 = vcmp.eq.s32.totalorder %v6408_v56, %v3989_v20 }
 0x2cb   : > { %5426 = vmatmul.mubr.msk.f32.vlgmr.msra.gmra.mrb[20].mxu1 %vm2880_vm2, %v5425_v21  ;;  %v4316_v19 = vrot.slane %v6416_v63, %v6214_v13  ;;  %v2271_v46 = vadd.f32 %v2267_v47, %v2255_v34  ;;  %v3977_v48 = vrot.slane %v6418_v1, %v6184_v62  ;;  %vm4306_vm5 = vcmp.eq.s32.totalorder %v6072_v9, %v4304_v30 }
 0x2cc   : > { %5549 = vmatpush1.bf16.msra.mxu1 %v5548_v51  ;;  %3197 = vmatprep.mubr.f32.mxu1 %v7729_v40  ;;  %vm4308_vm6 = vcmp.eq.s32.totalorder %v6408_v56, %v4304_v30  ;;  %vm3970_vm7 = vcmp.eq.s32.totalorder %v6072_v9, %v3965_v33  ;;  %vm3972_vm8 = vcmp.eq.s32.totalorder %v6408_v56, %v3965_v33  ;;  %v4006_v24 = vsel %vm3994_vm3, %v4001_v59, 0.0 }
 0x2cd   : > { %5567 = vmatprep.subr.bf16.mxu1 %v5566_v12  ;;  %v4292_v53 = vrot.slane %v6412_v60, %v6214_v13  ;;  %v4008_v42 = vsel %vm3996_vm4, %v4001_v59, 0.0  ;;  %vm4282_vm9 = vcmp.eq.s32.totalorder %v6072_v9, %v4280_v35  ;;  %vm4284_vm10 = vcmp.eq.s32.totalorder %v6408_v56, %v4280_v35 }
 0x2ce   : > { %v4318_v54 = vsel %vm4306_vm5, %v4316_v19, 0.0  ;;  %v4320_v52 = vsel %vm4308_vm6, %v4316_v19, 0.0  ;;  %v2279_v50 = vfloor.f32 %v2271_v46  ;;  %v3982_v21 = vsel %vm3970_vm7, %v3977_v48, 0.0 }
 0x2cf   : > { %5428 = vmatmul.mubr.msk.f32.vlgmr.msra.gmra.mrb[22].mxu1 %vm422_vm1, %v6479_v6  ;;  %v3984_v43 = vsel %vm3972_vm8, %v3977_v48, 0.0  ;;  %v4010_v5 = vadd.f32 %v4006_v24, %v3982_v21  ;;  %v4294_v51 = vsel %vm4282_vm9, %v4292_v53, 0.0  ;;  %v4296_v10 = vsel %vm4284_vm10, %v4292_v53, 0.0  ;;  %v2266_v53 = vld [vmem:[%s7659_s7 + $0x10] sm:$0x1] }
 0x2d0   : > { %5569 = vmatpush1.bf16.msra.mxu1 %v5568_v27  ;;  %3203 = vmatprep.mubr.f32.mxu1 %v7729_v40  ;;  %v4012_v7 = vadd.f32 %v4008_v42, %v3984_v43  ;;  %v4322_v8 = vadd.f32 %v4318_v54, %v4294_v51  ;;  %v4324_v45 = vadd.f32 %v4320_v52, %v4296_v10  ;;  %v2311_v11 = vadd.f32 1.0, %v2279_v50 }
 0x2d1   : > { %5607 = vmatprep.subr.bf16.mxu1 %v5606_v0  ;;  %v2303_v39 = vmax.f32 %v2279_v50, 0.0  ;;  %v2331_v27 = vmax.f32 %v2271_v46, 0.0  ;;  %v2254_v19 = vadd.f32 %v6778_v26, %v6387_v18  ;;  %v4300_v48 = vrot.slane %v6426_v4, %v6214_v13 }
 0x2d2   : > { %v5608_v44 = vpack.c.bf16 %v4012_v7, %v4010_v5  ;;  %v5626_v55 = vpack.c.bf16 %v4324_v45, %v4322_v8  ;;  %v2315_v12 = vmax.f32 %v2311_v11, 0.0  ;;  %v4276_v54 = vrot.slane %v6420_v2, %v6214_v13 }
 0x2d3   : > { %5429 = vmatmul.mubr.msk.f32.gmra.mrb[24].mxu1 %vm422_vm1, %v6485_v16  ;;  %v2307_v0 = vmin.f32 %v2303_v39, 15.0  ;;  %v2335_v34 = vmin.f32 %v2331_v27, 15.0  ;;  %v4312_v18 = vrot.slane %v6424_v3, %v6214_v13  ;;  %v2270_v52 = vadd.f32 %v2266_v53, %v2254_v19 }
 0x2d4   : > { %3209 = vmatprep.mubr.f32.mxu1 %v7729_v40  ;;  %v2319_v36 = vmin.f32 %v2315_v12, 15.0  ;;  %vm4305_vm11 = vcmp.eq.s32.totalorder %v6072_v9, %v4300_v48  ;;  %vm4307_vm12 = vcmp.eq.s32.totalorder %v6408_v56, %v4300_v48  ;;  %v4288_v21 = vrot.slane %v6418_v1, %v6214_v13 }
 0x2d5   : > { %v5790_v30 = vtrunc.f32 %v2307_v0  ;;  %v2355_v59 = vsub.f32 %v2307_v0, %v2335_v34  ;;  %vm4281_vm15 = vcmp.eq.s32.totalorder %v6072_v9, %v4276_v54  ;;  %vm4283_vm0 = vcmp.eq.s32.totalorder %v6408_v56, %v4276_v54 }
 0x2d6   : > { %v5798_v20 = vtrunc.f32 %v2319_v36  ;;  %v2363_v47 = vsub.f32 %v2319_v36, %v2335_v34  ;;  %v4317_v5 = vsel %vm4305_vm11, %v4312_v18, 0.0  ;;  %v4319_v7 = vsel %vm4307_vm12, %v4312_v18, 0.0 }
 0x2d7   : > { %5430 = vmatmul.mubr.msk.f32.gmra.mrb[26].mxu1 %vm422_vm1, %v6493_v17  ;;  %v5791_v35 = vcvt.f32.s32 %v5790_v30  ;;  %v2359_v42 = vadd.f32 1.0, %v2355_v59  ;;  %v2278_v51 = vfloor.f32 %v2270_v52  ;;  %v4293_v45 = vsel %vm4281_vm15, %v4288_v21, 0.0 }
 0x2d8   : > { %3215 = vmatprep.mubr.f32.mxu1 %v7729_v40  ;;  %v5799_v33 = vcvt.f32.s32 %v5798_v20  ;;  %v2367_v46 = vsub.f32 1.0, %v2363_v47  ;;  %v4295_v11 = vsel %vm4283_vm0, %v4288_v21, 0.0  ;;  %v2330_v59 = vmax.f32 %v2270_v52, 0.0 }
 0x2d9   : > { %v4902_v26 = vrot.slane %v5791_v35, %v6088_v15  ;;  %v4914_v43 = vrot.slane %v2359_v42, %v6088_v15  ;;  %v2310_v0 = vadd.f32 1.0, %v2278_v51  ;;  %v2302_v47 = vmax.f32 %v2278_v51, 0.0 }
 0x2da   : > { %v4926_v24 = vrot.slane %v5799_v33, %v6088_v15  ;;  %v4938_v50 = vrot.slane %v2367_v46, %v6088_v15  ;;  %v2334_v46 = vmin.f32 %v2330_v59, 15.0 }
 0x2db   : > { %5431 = vmatmul.mubr.msk.f32.gmra.mrb[28].mxu1 %vm422_vm1, %v6502_v23  ;;  %vm4904_vm3 = vcmp.eq.s32.totalorder %v6072_v9, %v4902_v26  ;;  %vm4906_vm4 = vcmp.eq.s32.totalorder %v6408_v56, %v4902_v26  ;;  %v2314_v30 = vmax.f32 %v2310_v0, 0.0  ;;  %v2306_v35 = vmin.f32 %v2302_v47, 15.0 }
 0x2dc   : > { %3221 = vmatprep.mubr.f32.mxu1 %v7729_v40  ;;  %vm4928_vm13 = vcmp.eq.s32.totalorder %v6072_v9, %v4926_v24  ;;  %vm4930_vm14 = vcmp.eq.s32.totalorder %v6408_v56, %v4926_v24  ;;  %v4916_v12 = vsel %vm4904_vm3, %v4914_v43, 0.0  ;;  %v4918_v39 = vsel %vm4906_vm4, %v4914_v43, 0.0 }
 0x2dd   : > { %v4940_v10 = vsel %vm4928_vm13, %v4938_v50, 0.0  ;;  %v4942_v8 = vsel %vm4930_vm14, %v4938_v50, 0.0  ;;  %v2318_v33 = vmin.f32 %v2314_v30, 15.0  ;;  %v5788_v48 = vtrunc.f32 %v2306_v35 }
 0x2de   : > { %v4944_v36 = vadd.f32 %v4940_v10, %v4916_v12  ;;  %v4946_v27 = vadd.f32 %v4942_v8, %v4918_v39  ;;  %v2354_v42 = vsub.f32 %v2306_v35, %v2334_v46  ;;  %v7733_v39 = vld [vmem:[#allocation19_spill] sm:$0xff] }
 0x2df   : > { %5432 = vmatmul.mubr.msk.f32.gmra.mrb[30].mxu1 %vm422_vm1, %v6511_v25  ;;  %v5796_v19 = vtrunc.f32 %v2318_v33  ;;  %v2362_v53 = vsub.f32 %v2318_v33, %v2334_v46  ;;  %v5789_v54 = vcvt.f32.s32 %v5788_v48 }
 0x2e0   : > { %3227 = vmatprep.mubr.f32.mxu1 %v7729_v40  ;;  %v5666_v34 = vpack.c.bf16 %v4946_v27, %v4944_v36  ;;  %v2358_v52 = vadd.f32 1.0, %v2354_v42  ;;  %v3100_v36 = vrot.slane %v7733_v39, %v6099_v22 }
 0x2e1   : > { %v5797_v24 = vcvt.f32.s32 %v5796_v19  ;;  %v2366_v18 = vsub.f32 1.0, %v2362_v53  ;;  %v4898_v50 = vrot.slane %v5789_v54, %v6088_v15 }
 0x2e2   : > { %v4910_v43 = vrot.slane %v2358_v52, %v6088_v15 }
 0x2e3   : > { %5433 = vmatmul.mubr.msk.f32.gmra.mrb[32].mxu1 %vm422_vm1, %v6520_v28  ;;  %v4922_v26 = vrot.slane %v5797_v24, %v6088_v15  ;;  %v4934_v21 = vrot.slane %v2366_v18, %v6088_v15  ;;  %vm4903_vm7 = vcmp.eq.s32.totalorder %v6072_v9, %v4898_v50  ;;  %vm4905_vm8 = vcmp.eq.s32.totalorder %v6408_v56, %v4898_v50 }
 0x2e4   : > { %3233 = vmatprep.mubr.f32.mxu1 %v7729_v40  ;;  %v4915_v51 = vsel %vm4903_vm7, %v4910_v43, 0.0  ;;  %v4917_v10 = vsel %vm4905_vm8, %v4910_v43, 0.0 }
 0x2e5   : > { %vm4927_vm5 = vcmp.eq.s32.totalorder %v6072_v9, %v4922_v26  ;;  %vm4929_vm6 = vcmp.eq.s32.totalorder %v6408_v56, %v4922_v26 }
 0x2e7   : > { %5434 = vmatmul.mubr.msk.f32.gmra.mrb[34].mxu1 %vm422_vm1, %v6529_v31 }
 0x2e8   : > { %3239 = vmatprep.mubr.f32.mxu1 %v7729_v40 }
 0x2eb   : > { %5435 = vmatmul.mubr.msk.f32.gmra.mrb[36].mxu1 %vm422_vm1, %v6538_v32 }
 0x2ec   : > { %3508 = vmatprep.mubr.f32.mxu1 %v7729_v40 }
 0x2ef   : > { %5438 = vmatmul.mubr.msk.f32.vlgmr.msra.gmra.mrb[38].mxu1 %vm422_vm1, %v6479_v6 }
 0x2f0   : > { %5609 = vmatpush1.bf16.msra.mxu1 %v5608_v44  ;;  %3514 = vmatprep.mubr.f32.mxu1 %v7729_v40  ;;  %v4321_v44 = vadd.f32 %v4317_v5, %v4293_v45  ;;  %v4939_v5 = vsel %vm4927_vm5, %v4934_v21, 0.0 }
 0x2f1   : > { %5627 = vmatprep.subr.bf16.mxu1 %v5626_v55  ;;  %v4323_v55 = vadd.f32 %v4319_v7, %v4295_v11  ;;  %v4941_v7 = vsel %vm4929_vm6, %v4934_v21, 0.0  ;;  %v4943_v8 = vadd.f32 %v4939_v5, %v4915_v51  ;;  %v2644_v11 = vld [vmem:[%s7661_s9] sm:$0xff] }
 0x2f2   : > { %v4945_v45 = vadd.f32 %v4941_v7, %v4917_v10  ;;  %5427 = vmatmul.mubr.msk.f32.vlgmr.msra.gmra.mrb[22].mxu0 %vm2880_vm2, %v2644_v11 }
 0x2f3   : > { %5439 = vmatmul.mubr.msk.f32.gmra.mrb[40].mxu1 %vm422_vm1, %v6485_v16  ;;  %v5628_v20 = vpack.c.bf16 %v4323_v55, %v4321_v44  ;;  %3331 = vmatprep.mubr.f32.mxu0 %v7729_v40  ;;  %v7732_v55 = vld [vmem:[#allocation17_spill] sm:$0xff] }
 0x2f4   : > { %3520 = vmatprep.mubr.f32.mxu1 %v7729_v40  ;;  %v5668_v44 = vpack.c.bf16 %v4945_v45, %v4943_v8  ;;  %v3096_v12 = vrot.slane %v7732_v55, %v6099_v22 }
 0x2f7   : > { %5440 = vmatmul.mubr.msk.f32.gmra.mrb[42].mxu1 %vm422_vm1, %v6493_v17 }
 0x2f8   : > { %3526 = vmatprep.mubr.f32.mxu1 %v7729_v40 }
 0x2fb   : > { %5441 = vmatmul.mubr.msk.f32.gmra.mrb[44].mxu1 %vm422_vm1, %v6502_v23 }
 0x2fc   : > { %3532 = vmatprep.mubr.f32.mxu1 %v7729_v40 }
 0x2ff   : > { %5442 = vmatmul.mubr.msk.f32.gmra.mrb[46].mxu1 %vm422_vm1, %v6511_v25 }
 0x300   : > { %3538 = vmatprep.mubr.f32.mxu1 %v7729_v40 }
 0x303   : > { %5443 = vmatmul.mubr.msk.f32.gmra.mrb[48].mxu1 %vm422_vm1, %v6520_v28 }
 0x304   : > { %3544 = vmatprep.mubr.f32.mxu1 %v7729_v40 }
 0x307   : > { %5444 = vmatmul.mubr.msk.f32.gmra.mrb[50].mxu1 %vm422_vm1, %v6529_v31 }
 0x308   : > { %3550 = vmatprep.mubr.f32.mxu1 %v7729_v40 }
 0x30b   : > { %5445 = vmatmul.mubr.msk.f32.gmra.mrb[52].mxu1 %vm422_vm1, %v6538_v32 }
 0x30c   : > { %4130 = vmatprep.mubr.f32.mxu1 %v7729_v40 }
 0x30f   : > { %5458 = vmatmul.mubr.msk.f32.vlgmr.msra.gmra.mrb[54].mxu1 %vm422_vm1, %v6479_v6 }
 0x310   : > { %5629 = vmatpush1.bf16.msra.mxu1 %v5628_v20  ;;  %4136 = vmatprep.mubr.f32.mxu1 %v7729_v40 }
 0x311   : > { %5667 = vmatprep.subr.bf16.mxu1 %v5666_v34 }
 0x313   : > { %5459 = vmatmul.mubr.msk.f32.gmra.mrb[56].mxu1 %vm422_vm1, %v6485_v16 }
 0x314   : > { %4142 = vmatprep.mubr.f32.mxu1 %v7729_v40 }
 0x317   : > { %5460 = vmatmul.mubr.msk.f32.gmra.mrb[58].mxu1 %vm422_vm1, %v6493_v17 }
 0x318   : > { %4148 = vmatprep.mubr.f32.mxu1 %v7729_v40 }
 0x31b   : > { %5461 = vmatmul.mubr.msk.f32.gmra.mrb[60].mxu1 %vm422_vm1, %v6502_v23 }
 0x31c   : > { %4154 = vmatprep.mubr.f32.mxu1 %v7729_v40 }
 0x31f   : > { %5462 = vmatmul.mubr.msk.f32.gmra.mrb[62].mxu1 %vm422_vm1, %v6511_v25 }
 0x320   : > { %4160 = vmatprep.mubr.f32.mxu1 %v7729_v40 }
 0x323   : > { %5463 = vmatmul.mubr.msk.f32.gmra.mrb[64].mxu1 %vm422_vm1, %v6520_v28 }
 0x324   : > { %4166 = vmatprep.mubr.f32.mxu1 %v7729_v40 }
 0x327   : > { %5464 = vmatmul.mubr.msk.f32.gmra.mrb[66].mxu1 %vm422_vm1, %v6529_v31 }
 0x328   : > { %4172 = vmatprep.mubr.f32.mxu1 %v7729_v40 }
 0x32b   : > { %5465 = vmatmul.mubr.msk.f32.gmra.mrb[68].mxu1 %vm422_vm1, %v6538_v32 }
 0x32c   : > { %4441 = vmatprep.mubr.f32.mxu1 %v7729_v40 }
 0x32f   : > { %5468 = vmatmul.mubr.msk.f32.vlgmr.msra.gmra.mrb[70].mxu1 %vm422_vm1, %v6479_v6 }
 0x330   : > { %5669 = vmatpush1.bf16.msra.mxu1 %v5668_v44  ;;  %4447 = vmatprep.mubr.f32.mxu1 %v7729_v40 }
 0x333   : > { %5469 = vmatmul.mubr.msk.f32.gmra.mrb[72].mxu1 %vm422_vm1, %v6485_v16 }
 0x334   : > { %4453 = vmatprep.mubr.f32.mxu1 %v7729_v40 }
 0x337   : > { %5470 = vmatmul.mubr.msk.f32.gmra.mrb[74].mxu1 %vm422_vm1, %v6493_v17 }
 0x338   : > { %4459 = vmatprep.mubr.f32.mxu1 %v7729_v40 }
 0x33b   : > { %5471 = vmatmul.mubr.msk.f32.gmra.mrb[76].mxu1 %vm422_vm1, %v6502_v23 }
 0x33c   : > { %4465 = vmatprep.mubr.f32.mxu1 %v7729_v40 }
 0x33f   : > { %5472 = vmatmul.mubr.msk.f32.gmra.mrb[78].mxu1 %vm422_vm1, %v6511_v25 }
 0x340   : > { %4471 = vmatprep.mubr.f32.mxu1 %v7729_v40 }
 0x343   : > { %5473 = vmatmul.mubr.msk.f32.gmra.mrb[80].mxu1 %vm422_vm1, %v6520_v28 }
 0x344   : > { %4477 = vmatprep.mubr.f32.mxu1 %v7729_v40 }
 0x347   : > { %5474 = vmatmul.mubr.msk.f32.gmra.mrb[82].mxu1 %vm422_vm1, %v6529_v31 }
 0x348   : > { %4483 = vmatprep.mubr.f32.mxu1 %v7729_v40 }
 0x34b   : > { %5475 = vmatmul.mubr.msk.f32.gmra.mrb[84].mxu1 %vm422_vm1, %v6538_v32 }
 0x34c   : > { %5063 = vmatprep.mubr.f32.mxu1 %v7729_v40 }
 0x34f   : > { %5488 = vmatmul.mubr.msk.f32.vlgmr.msra.gmra.mrb[86].mxu1 %vm422_vm1, %v6479_v6  ;;  %v3108_v6 = vrot.slane %v6560_v58, %v6099_v22 }
 0x350   : > { %5069 = vmatprep.mubr.f32.mxu1 %v7729_v40 }
 0x351   : > { %vm3113_vm9 = vcmp.eq.s32.totalorder %v6072_v9, %v3108_v6  ;;  %vm3115_vm10 = vcmp.eq.s32.totalorder %v6408_v56, %v3108_v6 }
 0x353   : > { %5489 = vmatmul.mubr.msk.f32.gmra.mrb[88].mxu1 %vm422_vm1, %v6485_v16  ;;  %v3112_v16 = vrot.slane %v6570_v37, %v6099_v22 }
 0x354   : > { %5075 = vmatprep.mubr.f32.mxu1 %v7729_v40 }
 0x355   : > { %vm3114_vm11 = vcmp.eq.s32.totalorder %v6072_v9, %v3112_v16  ;;  %vm3116_vm12 = vcmp.eq.s32.totalorder %v6408_v56, %v3112_v16 }
 0x357   : > { %5490 = vmatmul.mubr.msk.f32.gmra.mrb[90].mxu1 %vm422_vm1, %v6493_v17  ;;  %v3084_v17 = vrot.slane %v6558_v57, %v6099_v22 }
 0x358   : > { %5081 = vmatprep.mubr.f32.mxu1 %v7729_v40 }
 0x359   : > { %vm3089_vm13 = vcmp.eq.s32.totalorder %v6072_v9, %v3084_v17  ;;  %vm3091_vm14 = vcmp.eq.s32.totalorder %v6408_v56, %v3084_v17 }
 0x35a   : > { %v3101_v33 = vsel %vm3089_vm13, %v3096_v12, 0.0  ;;  %v3103_v59 = vsel %vm3091_vm14, %v3096_v12, 0.0 }
 0x35b   : > { %5491 = vmatmul.mubr.msk.f32.gmra.mrb[92].mxu1 %vm422_vm1, %v6502_v23 }
 0x35c   : > { %5087 = vmatprep.mubr.f32.mxu1 %v7729_v40 }
 0x35f   : > { %5492 = vmatmul.mubr.msk.f32.gmra.mrb[94].mxu1 %vm422_vm1, %v6511_v25  ;;  %v3120_v25 = vrot.slane %v6564_v14, %v6099_v22 }
 0x360   : > { %5093 = vmatprep.mubr.f32.mxu1 %v7729_v40 }
 0x361   : > { %v3125_v27 = vsel %vm3113_vm9, %v3120_v25, 0.0  ;;  %v3127_v20 = vsel %vm3115_vm10, %v3120_v25, 0.0 }
 0x362   : > { %v3129_v35 = vadd.f32 %v3125_v27, %v3101_v33  ;;  %v3131_v46 = vadd.f32 %v3127_v20, %v3103_v59  ;;  %v3423_v59 = vrot.slane %v6570_v37, %v6108_v29 }
 0x363   : > { %5493 = vmatmul.mubr.msk.f32.gmra.mrb[96].mxu1 %vm422_vm1, %v6520_v28  ;;  %v3088_v28 = vrot.slane %v6572_v38, %v6099_v22 }
 0x364   : > { %5099 = vmatprep.mubr.f32.mxu1 %v7729_v40  ;;  %vm3425_vm6 = vcmp.eq.s32.totalorder %v6072_v9, %v3423_v59  ;;  %vm3427_vm7 = vcmp.eq.s32.totalorder %v6408_v56, %v3423_v59 }
 0x365   : > { %vm3090_vm15 = vcmp.eq.s32.totalorder %v6072_v9, %v3088_v28  ;;  %vm3092_vm0 = vcmp.eq.s32.totalorder %v6408_v56, %v3088_v28 }
 0x366   : > { %v3102_v19 = vsel %vm3090_vm15, %v3100_v36, 0.0  ;;  %v3104_v48 = vsel %vm3092_vm0, %v3100_v36, 0.0 }
 0x367   : > { %5494 = vmatmul.mubr.msk.f32.gmra.mrb[98].mxu1 %vm422_vm1, %v6529_v31 }
 0x368   : > { %5105 = vmatprep.mubr.f32.mxu1 %v7729_v40 }
 0x36b   : > { %5495 = vmatmul.mubr.msk.f32.gmra.mrb[100].mxu1 %vm422_vm1, %v6538_v32  ;;  %v3124_v32 = vrot.slane %v6578_v41, %v6099_v22 }
 0x36d   : > { %v3126_v34 = vsel %vm3114_vm11, %v3124_v32, 0.0  ;;  %v3128_v47 = vsel %vm3116_vm12, %v3124_v32, 0.0 }
 0x36e   : > { %v3130_v53 = vadd.f32 %v3126_v34, %v3102_v19  ;;  %v3132_v24 = vadd.f32 %v3128_v47, %v3104_v48  ;;  %v3419_v47 = vrot.slane %v6560_v58, %v6108_v29  ;;  %v3431_v19 = vrot.slane %v6564_v14, %v6108_v29 }
 0x370   : > { %vm3424_vm4 = vcmp.eq.s32.totalorder %v6072_v9, %v3419_v47  ;;  %vm3426_vm5 = vcmp.eq.s32.totalorder %v6408_v56, %v3419_v47 }
 0x39e   : > { %v6960_v23 = vpop.f32.mrb[20].mxu1 }
 0x39f   : > { %7730 = vst [vmem:[#allocation20_spill] sm:$0xff] %v6960_v23  ;;  %v6966_v31 = vpop.f32.mrb[21].mxu1 }
 0x3a0   : > { %7731 = vst [vmem:[#allocation21_spill] sm:$0xff] %v6966_v31  ;;  %v7241_v31 = vld [vmem:[%s6474_s12 + $0x28] sm:$0xff] }
 0x3a1   : > { %7742 = vst [vmem:[#allocation24_spill] sm:$0xff] %v7241_v31 }
 0x3a2   : > { %v3199_v0 = vpop.f32.mrb[22].mxu1 }
 0x3a3   : > { %v3201_v30 = vpop.f32.mrb[23].mxu1  ;;  %v3246_v42 = vmul.f32 %v3199_v0, %v3129_v35 }
 0x3a4   : > { %v3247_v26 = vmul.f32 %v3201_v30, %v3130_v53  ;;  %v3395_v30 = vrot.slane %v6558_v57, %v6108_v29 }
 0x3a6   : > { %v3205_v22 = vpop.f32.mrb[24].mxu1  ;;  %vm3400_vm3 = vcmp.eq.s32.totalorder %v6072_v9, %v3395_v30  ;;  %vm3402_vm8 = vcmp.eq.s32.totalorder %v6408_v56, %v3395_v30 }
 0x3a7   : > { %v3248_v54 = vmul.f32 %v3205_v22, %v3131_v46  ;;  %v3207_v18 = vpop.f32.mrb[25].mxu1  ;;  %v3407_v22 = vrot.slane %v7732_v55, %v6108_v29 }
 0x3a8   : > { %v3249_v52 = vmul.f32 %v3207_v18, %v3132_v24 }
 0x3a9   : > { %v5552_v50 = vpack.c.bf16 %v3248_v54, %v3246_v42  ;;  %v3399_v42 = vrot.slane %v6572_v38, %v6108_v29 }
 0x3aa   : > { %v5550_v21 = vpack.c.bf16 %v3249_v52, %v3247_v26  ;;  %v3211_v43 = vpop.f32.mrb[26].mxu1  ;;  %v3435_v52 = vrot.slane %v6578_v41, %v6108_v29 }
 0x3ab   : > { %v3213_v5 = vpop.f32.mrb[27].mxu1  ;;  %v3250_v51 = vmul.f32 %v3211_v43, %v3129_v35  ;;  %vm3401_vm9 = vcmp.eq.s32.totalorder %v6072_v9, %v3399_v42  ;;  %vm3403_vm10 = vcmp.eq.s32.totalorder %v6408_v56, %v3399_v42 }
 0x3ac   : > { %5551 = vmatprep.subr.bf16.mxu0 %v5550_v21  ;;  %v3251_v45 = vmul.f32 %v3213_v5, %v3130_v53  ;;  %v3436_v5 = vsel %vm3424_vm4, %v3431_v19, 0.0 }
 0x3ad   : > { %5553 = vmatpush1.bf16.msra.mxu0 %v5552_v50 }
 0x3ae   : > { %v3217_v7 = vpop.f32.mrb[28].mxu1 }
 0x3af   : > { %v3252_v10 = vmul.f32 %v3217_v7, %v3131_v46  ;;  %v3219_v8 = vpop.f32.mrb[29].mxu1  ;;  %v3411_v7 = vrot.slane %v7733_v39, %v6108_v29 }
 0x3b0   : > { %v3253_v11 = vmul.f32 %v3219_v8, %v3132_v24  ;;  %v3412_v8 = vsel %vm3400_vm3, %v3407_v22, 0.0 }
 0x3b1   : > { %v5556_v44 = vpack.c.bf16 %v3252_v10, %v3250_v51  ;;  %v3438_v51 = vsel %vm3426_vm5, %v3431_v19, 0.0  ;;  %v3439_v10 = vsel %vm3427_vm7, %v3435_v52, 0.0  ;;  %v3413_v29 = vsel %vm3401_vm9, %v3411_v7, 0.0 }
 0x3b2   : > { %v5554_v6 = vpack.c.bf16 %v3253_v11, %v3251_v45  ;;  %v3223_v16 = vpop.f32.mrb[30].mxu1  ;;  %v3414_v45 = vsel %vm3402_vm8, %v3407_v22, 0.0  ;;  %v7008_v11 = vadd.f32 %v3436_v5, %v3412_v8  ;;  %v4041_v5 = vrot.slane %v6560_v58, %v6184_v62 }
 0x3b3   : > { %v3225_v17 = vpop.f32.mrb[31].mxu1  ;;  %v3254_v28 = vmul.f32 %v3223_v16, %v3129_v35  ;;  %v5436_v16 = vld [vmem:[%s7661_s9 + $0x10] sm:$0xff] }
 0x3b4   : > { %5555 = vmatprep.subr.bf16.mxu0 %v5554_v6  ;;  %v3255_v36 = vmul.f32 %v3225_v17, %v3130_v53  ;;  %v3415_v6 = vsel %vm3403_vm10, %v3411_v7, 0.0  ;;  %vm4046_vm14 = vcmp.eq.s32.totalorder %v6072_v9, %v4041_v5  ;;  %vm4048_vm4 = vcmp.eq.s32.totalorder %v6408_v56, %v4041_v5 }
 0x3b5   : > { %5557 = vmatpush1.bf16.msra.mxu0 %v5556_v44  ;;  %v7010_v44 = vadd.f32 %v3438_v51, %v3414_v45  ;;  %v4053_v51 = vrot.slane %v6564_v14, %v6184_v62 }
 0x3b6   : > { %v3229_v25 = vpop.f32.mrb[32].mxu1 }
 0x3b7   : > { %v3256_v32 = vmul.f32 %v3229_v25, %v3131_v46  ;;  %v3231_v12 = vpop.f32.mrb[33].mxu1 }
 0x3b8   : > { %v3257_v27 = vmul.f32 %v3231_v12, %v3132_v24 }
 0x3b9   : > { %v5560_v0 = vpack.c.bf16 %v3256_v32, %v3254_v28  ;;  %v7017_v28 = vadd.f32 %v3439_v10, %v3415_v6 }
 0x3ba   : > { %v5558_v20 = vpack.c.bf16 %v3257_v27, %v3255_v36  ;;  %v3235_v34 = vpop.f32.mrb[34].mxu1 }
 0x3bb   : > { %v3237_v33 = vpop.f32.mrb[35].mxu1  ;;  %v3258_v54 = vmul.f32 %v3235_v34, %v3129_v35 }
 0x3bc   : > { %5559 = vmatprep.subr.bf16.mxu0 %v5558_v20  ;;  %v3259_v50 = vmul.f32 %v3237_v33, %v3130_v53  ;;  %v3437_v53 = vsel %vm3425_vm6, %v3435_v52, 0.0 }
 0x3bd   : > { %5561 = vmatpush1.bf16.msra.mxu0 %v5560_v0  ;;  %v7015_v17 = vadd.f32 %v3437_v53, %v3413_v29  ;;  %v4045_v53 = vrot.slane %v6570_v37, %v6184_v62 }
 0x3be   : > { %v3241_v48 = vpop.f32.mrb[36].mxu1 }
 0x3bf   : > { %v3260_v18 = vmul.f32 %v3241_v48, %v3131_v46  ;;  %v3243_v26 = vpop.f32.mrb[37].mxu1  ;;  %vm4047_vm3 = vcmp.eq.s32.totalorder %v6072_v9, %v4045_v53  ;;  %vm4049_vm7 = vcmp.eq.s32.totalorder %v6408_v56, %v4045_v53 }
 0x3c0   : > { %v3261_v21 = vmul.f32 %v3243_v26, %v3132_v24 }
 0x3c1   : > { %v5564_v43 = vpack.c.bf16 %v3260_v18, %v3258_v54 }
 0x3c2   : > { %v5562_v35 = vpack.c.bf16 %v3261_v21, %v3259_v50  ;;  %v3510_v46 = vpop.f32.mrb[38].mxu1  ;;  %v7734_v50 = vld [vmem:[#allocation5_spill] sm:$0xff] }
 0x3c3   : > { %v3512_v24 = vpop.f32.mrb[39].mxu1  ;;  %v3557_v32 = vmul.f32 %v3510_v46, %v7008_v11  ;;  %v3682_v21 = vrot.slane %v6414_v61, %v7734_v50  ;;  %v3658_v7 = vrot.slane %v6405_v49, %v7734_v50  ;;  %v7041_v46 = vrot.slane %v7732_v55, %v6184_v62 }
 0x3c4   : > { %5563 = vmatprep.subr.bf16.mxu0 %v5562_v35  ;;  %v3558_v27 = vmul.f32 %v3512_v24, %v7015_v17  ;;  %v3670_v45 = vrot.slane %v6412_v60, %v7734_v50  ;;  %v3694_v29 = vrot.slane %v6416_v63, %v7734_v50 }
 0x3c5   : > { %5565 = vmatpush1.bf16.msra.mxu0 %v5564_v43  ;;  %v7033_v43 = vrot.slane %v6558_v57, %v6184_v62  ;;  %vm3684_vm11 = vcmp.eq.s32.totalorder %v6072_v9, %v3682_v21  ;;  %vm3686_vm12 = vcmp.eq.s32.totalorder %v6408_v56, %v3682_v21  ;;  %vm3660_vm15 = vcmp.eq.s32.totalorder %v6072_v9, %v3658_v7 }
 0x3c6   : > { %v3516_v25 = vpop.f32.mrb[40].mxu1  ;;  %vm3662_vm0 = vcmp.eq.s32.totalorder %v6408_v56, %v3658_v7 }
 0x3c7   : > { %v3559_v12 = vmul.f32 %v3516_v25, %v7010_v44  ;;  %v3518_v36 = vpop.f32.mrb[41].mxu1  ;;  %vm4022_vm13 = vcmp.eq.s32.totalorder %v6072_v9, %v7033_v43 }
 0x3c8   : > { %v3560_v0 = vmul.f32 %v3518_v36, %v7017_v28  ;;  %5437 = vmatmul.mubr.msk.f32.vlgmr.msra.gmra.mrb[22].mxu0 %vm2880_vm2, %v5436_v16  ;;  %v4034_v5 = vsel %vm4022_vm13, %v7041_v46, 0.0 }
 0x3c9   : > { %v5572_v20 = vpack.c.bf16 %v3559_v12, %v3557_v32  ;;  %3642 = vmatprep.mubr.f32.mxu0 %v7729_v40  ;;  %v3678_v32 = vrot.slane %v6426_v4, %v7734_v50 }
 0x3ca   : > { %v5570_v34 = vpack.c.bf16 %v3560_v0, %v3558_v27  ;;  %v3522_v30 = vpop.f32.mrb[42].mxu1  ;;  %v4021_v27 = vrot.slane %v6572_v38, %v6184_v62  ;;  %v4033_v0 = vrot.slane %v7733_v39, %v6184_v62 }
 0x3cb   : > { %v3524_v47 = vpop.f32.mrb[43].mxu1  ;;  %v3561_v59 = vmul.f32 %v3522_v30, %v7008_v11  ;;  %v3696_v30 = vsel %vm3684_vm11, %v3694_v29, 0.0  ;;  %vm3683_vm5 = vcmp.eq.s32.totalorder %v6072_v9, %v3678_v32  ;;  %vm3685_vm6 = vcmp.eq.s32.totalorder %v6408_v56, %v3678_v32 }
 0x3cc   : > { %5571 = vmatprep.subr.bf16.mxu0 %v5570_v34  ;;  %v3562_v22 = vmul.f32 %v3524_v47, %v7015_v17  ;;  %v4057_v34 = vrot.slane %v6578_v41, %v6184_v62  ;;  %v3698_v47 = vsel %vm3686_vm12, %v3694_v29, 0.0  ;;  %vm4023_vm10 = vcmp.eq.s32.totalorder %v6072_v9, %v4021_v27 }
 0x3cd   : > { %5573 = vmatpush1.bf16.msra.mxu0 %v5572_v20  ;;  %vm4024_vm11 = vcmp.eq.s32.totalorder %v6408_v56, %v7033_v43  ;;  %vm4025_vm12 = vcmp.eq.s32.totalorder %v6408_v56, %v4021_v27  ;;  %v5446_v43 = vld [vmem:[%s7661_s9 + $0x18] sm:$0xff] }
 0x3ce   : > { %v3528_v33 = vpop.f32.mrb[44].mxu1  ;;  %v4037_v53 = vsel %vm4025_vm12, %v4033_v0, 0.0 }
 0x3cf   : > { %v3563_v19 = vmul.f32 %v3528_v33, %v7010_v44  ;;  %v3530_v48 = vpop.f32.mrb[45].mxu1  ;;  %v3654_v33 = vrot.slane %v6420_v2, %v7734_v50 }
 0x3d0   : > { %v3564_v42 = vmul.f32 %v3530_v48, %v7017_v28  ;;  %v3690_v48 = vrot.slane %v6424_v3, %v7734_v50 }
 0x3d1   : > { %v5576_v54 = vpack.c.bf16 %v3563_v19, %v3561_v59  ;;  %v4058_v59 = vsel %vm4046_vm14, %v4053_v51, 0.0  ;;  %v3672_v19 = vsel %vm3660_vm15, %v3670_v45, 0.0  ;;  %vm3659_vm8 = vcmp.eq.s32.totalorder %v6072_v9, %v3654_v33 }
 0x3d2   : > { %v5574_v18 = vpack.c.bf16 %v3564_v42, %v3562_v22  ;;  %v3534_v26 = vpop.f32.mrb[46].mxu1  ;;  %v3674_v22 = vsel %vm3662_vm0, %v3670_v45, 0.0  ;;  %v3700_v42 = vadd.f32 %v3696_v30, %v3672_v19  ;;  %vm3661_vm9 = vcmp.eq.s32.totalorder %v6408_v56, %v3654_v33 }
 0x3d3   : > { %v3536_v52 = vpop.f32.mrb[47].mxu1  ;;  %v3565_v24 = vmul.f32 %v3534_v26, %v7008_v11 }
 0x3d4   : > { %5575 = vmatprep.subr.bf16.mxu0 %v5574_v18  ;;  %v3566_v6 = vmul.f32 %v3536_v52, %v7015_v17  ;;  %v3666_v18 = vrot.slane %v6418_v1, %v7734_v50 }
 0x3d5   : > { %5577 = vmatpush1.bf16.msra.mxu0 %v5576_v54  ;;  %v3702_v54 = vadd.f32 %v3698_v47, %v3674_v22 }
 0x3d6   : > { %v3540_v35 = vpop.f32.mrb[48].mxu1  ;;  %v3671_v29 = vsel %vm3659_vm8, %v3666_v18, 0.0 }
 0x3d7   : > { %v3567_v10 = vmul.f32 %v3540_v35, %v7010_v44  ;;  %v3542_v8 = vpop.f32.mrb[49].mxu1 }
 0x3d8   : > { %v3568_v16 = vmul.f32 %v3542_v8, %v7017_v28 }
 0x3d9   : > { %v5580_v25 = vpack.c.bf16 %v3567_v10, %v3565_v24  ;;  %v3695_v24 = vsel %vm3683_vm5, %v3690_v48, 0.0  ;;  %v3697_v10 = vsel %vm3685_vm6, %v3690_v48, 0.0 }
 0x3da   : > { %v5578_v12 = vpack.c.bf16 %v3568_v16, %v3566_v6  ;;  %v3546_v36 = vpop.f32.mrb[50].mxu1  ;;  %v3673_v6 = vsel %vm3661_vm9, %v3666_v18, 0.0  ;;  %v4061_v16 = vsel %vm4049_vm7, %v4057_v34, 0.0  ;;  %v7136_v18 = vld [vmem:[%s6474_s12] sm:$0xff] }
 0x3db   : > { %v3548_v20 = vpop.f32.mrb[51].mxu1  ;;  %v3569_v26 = vmul.f32 %v3546_v36, %v7008_v11  ;;  %v4060_v11 = vsel %vm4048_vm4, %v4053_v51, 0.0  ;;  %v3701_v32 = vadd.f32 %v3697_v10, %v3673_v6  ;;  %v5586_v51 = vpack.c.bf16 %v3702_v54, %v3700_v42  ;;  %7735 = vst [vmem:[#allocation5_spill] sm:$0xff] %v7136_v18  ;;  %v7154_v10 = vld [vmem:[%s6474_s12 + $0x8] sm:$0xff]  ;;  %v7164_v6 = vld [vmem:[%s6474_s12 + $0x10] sm:$0xff] }
 0x3dc   : > { %5579 = vmatprep.subr.bf16.mxu0 %v5578_v12  ;;  %v3570_v7 = vmul.f32 %v3548_v20, %v7015_v17  ;;  %v4059_v17 = vsel %vm4047_vm3, %v4057_v34, 0.0  ;;  %v4036_v12 = vsel %vm4024_vm11, %v7041_v46, 0.0  ;;  %v7102_v36 = vadd.f32 %v4058_v59, %v4034_v5  ;;  %7736 = vst [vmem:[#allocation22_spill] sm:$0xff] %v7154_v10  ;;  %7737 = vst [vmem:[#allocation23_spill] sm:$0xff] %v7164_v6  ;;  %v2259_v5 = vld [vmem:[%s7658_s6 + $0x18] sm:$0x1] }
 0x3dd   : > { %5581 = vmatpush1.bf16.msra.mxu0 %v5580_v25  ;;  %v3699_v25 = vadd.f32 %v3695_v24, %v3671_v29  ;;  %v4035_v20 = vsel %vm4023_vm10, %v4033_v0, 0.0  ;;  %v7106_v30 = vadd.f32 %v4060_v11, %v4036_v12  ;;  %v7115_v47 = vadd.f32 %v4061_v16, %v4037_v53  ;;  %v2234_v29 = vpop.permute.xlu0 %2233  ;;  %v7739_v16 = vld [vmem:[#allocation8_spill] sm:$0xff] }
 0x3de   : > { %v3552_v62 = vpop.f32.mrb[52].mxu1  ;;  %v7113_v34 = vadd.f32 %v4059_v17, %v4035_v20  ;;  %v7738_v17 = vld [vmem:[#allocation7_spill] sm:$0xff] }
 0x3df   : > { %v3571_v52 = vmul.f32 %v3552_v62, %v7010_v44  ;;  %v3554_v21 = vpop.f32.mrb[53].mxu1  ;;  %v5588_v27 = vpack.c.bf16 %v3701_v32, %v3699_v25  ;;  %v2239_v25 = vadd.f32 %v2234_v29, %v7739_v16  ;;  %v2258_v32 = vld [vmem:[%s7658_s6 + $0x10] sm:$0x1] }
 0x3e0   : > { %v3572_v35 = vmul.f32 %v3554_v21, %v7017_v28 }
 0x3e1   : > { %v5584_v8 = vpack.c.bf16 %v3571_v52, %v3569_v26 }
 0x3e2   : > { %v5582_v44 = vpack.c.bf16 %v3572_v35, %v3570_v7  ;;  %v4132_v45 = vpop.f32.mrb[54].mxu1 }
 0x3e3   : > { %v4134_v28 = vpop.f32.mrb[55].mxu1  ;;  %v7118_v33 = vmul.f32 %v4132_v45, %v7102_v36 }
 0x3e4   : > { %5583 = vmatprep.subr.bf16.mxu0 %v5582_v44  ;;  %v7124_v0 = vmul.f32 %v4134_v28, %v7113_v34  ;;  %v2238_v28 = vadd.f32 %v2234_v29, %v7738_v17  ;;  %v4352_v29 = vrot.slane %v6560_v58, %v6214_v13  ;;  %v7208_v17 = vld [vmem:[%s6474_s12 + $0x20] sm:$0xff] }
 0x3e5   : > { %5585 = vmatpush1.bf16.msra.mxu0 %v5584_v8  ;;  %7741 = vst [vmem:[#allocation8_spill] sm:$0xff] %v7208_v17 }
 0x3e6   : > { %5587 = vmatprep.subr.bf16.mxu0 %v5586_v51  ;;  %v4138_v46 = vpop.f32.mrb[56].mxu1  ;;  %vm4357_vm14 = vcmp.eq.s32.totalorder %v6072_v9, %v4352_v29  ;;  %vm4359_vm15 = vcmp.eq.s32.totalorder %v6408_v56, %v4352_v29 }
 0x3e7   : > { %v7121_v59 = vmul.f32 %v4138_v46, %v7106_v30  ;;  %v4140_v19 = vpop.f32.mrb[57].mxu1 }
 0x3e8   : > { %v7127_v48 = vmul.f32 %v4140_v19, %v7115_v47  ;;  %5447 = vmatmul.mubr.msk.f32.vlgmr.msra.gmra.mrb[22].mxu0 %vm2880_vm2, %v5446_v43  ;;  %v7190_v19 = vld [vmem:[%s6474_s12 + $0x18] sm:$0xff] }
 0x3e9   : > { %5589 = vmatpush1.bf16.msra.mxu0 %v5588_v27  ;;  %3819 = vmatprep.mubr.f32.mxu0 %v7729_v40  ;;  %7740 = vst [vmem:[#allocation7_spill] sm:$0xff] %v7190_v19  ;;  %v7194_v27 = vadd.f32 %v2258_v32, %v2238_v28  ;;  %v4356_v28 = vrot.slane %v6570_v37, %v6214_v13 }
 0x3ea   : > { %v4144_v42 = vpop.f32.mrb[58].mxu1  ;;  %v4332_v32 = vrot.slane %v6572_v38, %v6214_v13 }
 0x3eb   : > { %v4146_v54 = vpop.f32.mrb[59].mxu1  ;;  %v7142_v52 = vmul.f32 %v4144_v42, %v7102_v36  ;;  %v7196_v42 = vadd.f32 %v2259_v5, %v2239_v25  ;;  %v2274_v16 = vfloor.f32 %v7194_v27  ;;  %vm4358_vm0 = vcmp.eq.s32.totalorder %v6072_v9, %v4356_v28 }
 0x3ec   : > { %5448 = vmatmul.mubr.msk.f32.vlgmr.msra.gmra.mrb[24].mxu0 %vm422_vm1, %v7136_v18  ;;  %v7148_v35 = vmul.f32 %v4146_v54, %v7113_v34  ;;  %v4368_v54 = vrot.slane %v6578_v41, %v6214_v13  ;;  %vm4360_vm3 = vcmp.eq.s32.totalorder %v6408_v56, %v4356_v28  ;;  %vm4334_vm4 = vcmp.eq.s32.totalorder %v6072_v9, %v4332_v32 }
 0x3ed   : > { %3825 = vmatprep.mubr.f32.mxu0 %v7729_v40  ;;  %v2275_v25 = vfloor.f32 %v7196_v42  ;;  %vm4336_vm6 = vcmp.eq.s32.totalorder %v6408_v56, %v4332_v32 }
 0x3ee   : > { %v4150_v26 = vpop.f32.mrb[60].mxu1  ;;  %v4370_v29 = vsel %vm4358_vm0, %v4368_v54, 0.0 }
 0x3ef   : > { %v7145_v21 = vmul.f32 %v4150_v26, %v7106_v30  ;;  %v4152_v7 = vpop.f32.mrb[61].mxu1 }
 0x3f0   : > { %v7151_v24 = vmul.f32 %v4152_v7, %v7115_v47  ;;  %5449 = vmatmul.mubr.msk.f32.gmra.mrb[26].mxu0 %vm422_vm1, %v7154_v10 }
 0x3f1   : > { %3831 = vmatprep.mubr.f32.mxu0 %v7729_v40 }
 0x3f2   : > { %v4156_v44 = vpop.f32.mrb[62].mxu1 }
 0x3f3   : > { %v4158_v45 = vpop.f32.mrb[63].mxu1  ;;  %v7178_v12 = vmul.f32 %v4156_v44, %v7102_v36  ;;  %v4328_v44 = vrot.slane %v6558_v57, %v6214_v13 }
 0x3f4   : > { %5450 = vmatmul.mubr.msk.f32.gmra.mrb[28].mxu0 %vm422_vm1, %v7164_v6  ;;  %v7184_v43 = vmul.f32 %v4158_v45, %v7113_v34 }
 0x3f5   : > { %3837 = vmatprep.mubr.f32.mxu0 %v7729_v40  ;;  %vm4333_vm13 = vcmp.eq.s32.totalorder %v6072_v9, %v4328_v44  ;;  %vm4335_vm5 = vcmp.eq.s32.totalorder %v6408_v56, %v4328_v44 }
 0x3f6   : > { %v4162_v51 = vpop.f32.mrb[64].mxu1 }
 0x3f7   : > { %v7181_v20 = vmul.f32 %v4162_v51, %v7106_v30  ;;  %v4164_v53 = vpop.f32.mrb[65].mxu1  ;;  %v4340_v51 = vrot.slane %v7732_v55, %v6214_v13 }
 0x3f8   : > { %v7187_v46 = vmul.f32 %v4164_v53, %v7115_v47  ;;  %5451 = vmatmul.mubr.msk.f32.gmra.mrb[30].mxu0 %vm422_vm1, %v7190_v19  ;;  %v4364_v53 = vrot.slane %v6564_v14, %v6214_v13 }
 0x3f9   : > { %3843 = vmatprep.mubr.f32.mxu0 %v7729_v40  ;;  %v4345_v23 = vsel %vm4333_vm13, %v4340_v51, 0.0 }
 0x3fa   : > { %v4168_v7 = vpop.f32.mrb[66].mxu1 }
 0x3fb   : > { %v4170_v45 = vpop.f32.mrb[67].mxu1  ;;  %v7227_v26 = vmul.f32 %v4168_v7, %v7102_v36  ;;  %v4371_v7 = vsel %vm4359_vm15, %v4364_v53, 0.0  ;;  %v2291_v36 = vadd.f32 1.0, %v2275_v25 }
 0x3fc   : > { %5452 = vmatmul.mubr.msk.f32.gmra.mrb[32].mxu0 %vm422_vm1, %v7208_v17  ;;  %v7235_v22 = vmul.f32 %v4170_v45, %v7113_v34  ;;  %v2290_v45 = vadd.f32 1.0, %v2274_v16 }
 0x3fd   : > { %3849 = vmatprep.mubr.f32.mxu0 %v7729_v40  ;;  %v2295_v32 = vmax.f32 %v2291_v36, 0.0 }
 0x3fe   : > { %v4174_v5 = vpop.f32.mrb[68].mxu1  ;;  %v2294_v10 = vmax.f32 %v2290_v45, 0.0  ;;  %v2282_v45 = vmax.f32 %v2274_v16, 0.0 }
 0x3ff   : > { %v7230_v8 = vmul.f32 %v4174_v5, %v7106_v30  ;;  %v4176_v11 = vpop.f32.mrb[69].mxu1  ;;  %v4344_v30 = vrot.slane %v7733_v39, %v6214_v13  ;;  %v4372_v5 = vsel %vm4360_vm3, %v4368_v54, 0.0  ;;  %v4347_v13 = vsel %vm4335_vm5, %v4340_v51, 0.0 }
 0x400   : > { %v7238_v62 = vmul.f32 %v4176_v11, %v7115_v47  ;;  %5453 = vmatmul.mubr.msk.f32.gmra.mrb[34].mxu0 %vm422_vm1, %v7241_v31  ;;  %v4369_v47 = vsel %vm4357_vm14, %v4364_v53, 0.0  ;;  %v7260_v31 = vld [vmem:[%s6474_s12 + $0x30] sm:$0xff]  ;;  %v7268_v17 = vadd.f32 %v4371_v7, %v4347_v13 }
 0x401   : > { %3855 = vmatprep.mubr.f32.mxu0 %v7729_v40  ;;  %7743 = vst [vmem:[#allocation25_spill] sm:$0xff] %v7260_v31  ;;  %v7264_v34 = vadd.f32 %v4369_v47, %v4345_v23  ;;  %v4346_v53 = vsel %vm4334_vm4, %v4344_v30, 0.0  ;;  %v4348_v54 = vsel %vm4336_vm6, %v4344_v30, 0.0  ;;  %v7288_v30 = vld [vmem:[%s6474_s12 + $0x38] sm:$0xff]  ;;  %s5298_s12 = sshll.u32 %s365_s11, 4 }
 0x402   : > { %v4443_v11 = vpop.f32.mrb[70].mxu1  ;;  %v7271_v19 = vadd.f32 %v4370_v29, %v4346_v53  ;;  %v7273_v6 = vadd.f32 %v4372_v5, %v4348_v54  ;;  %7747 = vst [vmem:[#allocation29_spill] sm:$0xff] %v7288_v30  ;;  %v2283_v29 = vmax.f32 %v2275_v25, 0.0  ;;  %v2298_v5 = vmin.f32 %v2294_v10, 15.0  ;;  %s367_s20 = scalar_lea.vmem [#allocation2], %s5298_s12  ;;  %s5866_s12 = scalar_lea.vmem %s5865_s25, 512 }
 0x403   : > { %v4445_v28 = vpop.f32.mrb[71].mxu1  ;;  %v2322_v53 = vmax.f32 %v7194_v27, 0.0  ;;  %v2299_v54 = vmin.f32 %v2295_v32, 15.0  ;;  %s5223_s21 = sshll.u32 %s367_s20, 4  ;;  %s7612_s21 = int_to_ptr.vmem [resolvable:$true] %s5223_s21 }
 0x404   : > { %5454 = vmatmul.mubr.msk.f32.gmra.mrb[36].mxu0 %vm422_vm1, %v7260_v31  ;;  %v7276_v31 = vmul.f32 %v4443_v11, %v7264_v34  ;;  %v7282_v47 = vmul.f32 %v4445_v28, %v7271_v19  ;;  %v5780_v18 = vtrunc.f32 %v2298_v5  ;;  %s5860_s29 = scalar_lea.vmem %s7612_s21, 256  ;;  %p5867_p0 = scmp.lt.s32.totalorder %s7612_s21, %s5865_s25 }
 0x405   : > { %3861 = vmatprep.mubr.f32.mxu0 %v7729_v40  ;;  %v2326_v36 = vmin.f32 %v2322_v53, 15.0  ;;  %v5782_v3 = vtrunc.f32 %v2299_v54  ;;  %p5861_p11 = scmp.ne.s32.totalorder %s7612_s21, %s5860_s29  ;;  %p5868_p1 = scmp.lt.s32.totalorder %s5866_s12, %s5860_s29 }
 0x406   : > { %v4449_v44 = vpop.f32.mrb[72].mxu1  ;;  %7744 = vst [vmem:[#allocation26_spill] sm:$0xff] %v7276_v31  ;;  %7746 = vst [vmem:[#allocation28_spill] sm:$0xff] %v7282_v47  ;;  %v5781_v60 = vcvt.f32.s32 %v5780_v18 }
 0x407   : > { %v7279_v23 = vmul.f32 %v4449_v44, %v7268_v17  ;;  %v4451_v51 = vpop.f32.mrb[73].mxu1  ;;  %v2286_v44 = vmin.f32 %v2282_v45, 15.0  ;;  %p5862_p12 = pnand %p5861_p11, %p6028_p5  ;;  %p5869_p2 = por %p5868_p1, %p5867_p0 }
 0x408   : > { %v7285_v7 = vmul.f32 %v4451_v51, %v7273_v6  ;;  %5455 = vmatmul.mubr.msk.f32.gmra.mrb[38].mxu0 %vm422_vm1, %v7288_v30  ;;  %v2323_v51 = vmax.f32 %v7196_v42, 0.0  ;;  %v2287_v30 = vmin.f32 %v2283_v29, 15.0  ;;  %v2346_v29 = vsub.f32 %v2298_v5, %v2326_v36 }
 0x409   : > { %7745 = vst [vmem:[#allocation27_spill] sm:$0xff] %v7279_v23  ;;  %3953 = vmatprep.mubr.f32.mxu0 %v7729_v40  ;;  %v5772_v32 = vtrunc.f32 %v2286_v44  ;;  %v2338_v63 = vsub.f32 %v2286_v44, %v2326_v36  ;;  %p5863_p13 = pneg %p5862_p12 }
 0x40a   : > { %v4455_v28 = vpop.f32.mrb[74].mxu1  ;;  %v2327_v42 = vmin.f32 %v2323_v51, 15.0  ;;  %v4974_v51 = vrot.slane %v5781_v60, %v6088_v15 }
 0x40b   : > { %v4457_v13 = vpop.f32.mrb[75].mxu1  ;;  %v7300_v11 = vmul.f32 %v4455_v28, %v7264_v34  ;;  %v5774_v28 = vtrunc.f32 %v2287_v30  ;;  %v5773_v31 = vcvt.f32.s32 %v5772_v32  ;;  %v2342_v18 = vadd.f32 1.0, %v2338_v63  ;;  %p5870_p3 = pnand %p5869_p2, %p5863_p13 }
 0x40c   : > { %v7306_v10 = vmul.f32 %v4457_v13, %v7271_v19  ;;  %v2347_v53 = vsub.f32 %v2299_v54, %v2327_v42  ;;  %v5783_v13 = vcvt.f32.s32 %v5782_v3  ;;  %v2339_v23 = vsub.f32 %v2287_v30, %v2327_v42 }
 0x40d   : > { %v5775_v49 = vcvt.f32.s32 %v5774_v28  ;;  %v4950_v36 = vrot.slane %v5773_v31, %v6088_v15  ;;  %vm4979_vm7 = vcmp.eq.s32.totalorder %v6072_v9, %v4974_v51  ;;  %vm4981_vm11 = vcmp.eq.s32.totalorder %v6408_v56, %v4974_v51 }
 0x40e   : > { %v4461_v16 = vpop.f32.mrb[76].mxu1  ;;  %v2351_v47 = vsub.f32 1.0, %v2347_v53  ;;  %v4978_v54 = vrot.slane %v5783_v13, %v6088_v15  ;;  %v2343_v60 = vadd.f32 1.0, %v2339_v23 }
 0x40f   : > { %v7303_v25 = vmul.f32 %v4461_v16, %v7268_v17  ;;  %v4463_v1 = vpop.f32.mrb[77].mxu1  ;;  %vm4955_vm9 = vcmp.eq.s32.totalorder %v6072_v9, %v4950_v36  ;;  %vm4957_vm13 = vcmp.eq.s32.totalorder %v6408_v56, %v4950_v36 }
 0x410   : > { %v7309_v27 = vmul.f32 %v4463_v1, %v7273_v6  ;;  %v2350_v1 = vsub.f32 1.0, %v2346_v29  ;;  %v4962_v29 = vrot.slane %v2342_v18, %v6088_v15  ;;  %vm4980_vm8 = vcmp.eq.s32.totalorder %v6072_v9, %v4978_v54 }
 0x411   : > { %v4966_v31 = vrot.slane %v2343_v60, %v6088_v15  ;;  %vm4982_vm12 = vcmp.eq.s32.totalorder %v6408_v56, %v4978_v54 }
 0x412   : > { %v4467_v2 = vpop.f32.mrb[78].mxu1  ;;  %v4986_v44 = vrot.slane %v2350_v1, %v6088_v15  ;;  %v4967_v1 = vsel %vm4955_vm9, %v4962_v29, 0.0 }
 0x413   : > { %v4469_v4 = vpop.f32.mrb[79].mxu1  ;;  %v7317_v5 = vmul.f32 %v4467_v2, %v7264_v34 }
 0x414   : > { %v7324_v3 = vmul.f32 %v4469_v4, %v7271_v19  ;;  %v4990_v4 = vrot.slane %v2351_v47, %v6088_v15  ;;  %v4991_v28 = vsel %vm4979_vm7, %v4986_v44, 0.0 }
 0x415   : > { %v4995_v18 = vadd.f32 %v4991_v28, %v4967_v1 }
 0x416   : > { %v4473_v61 = vpop.f32.mrb[80].mxu1  ;;  %v4992_v53 = vsel %vm4980_vm8, %v4990_v4, 0.0 }
 0x417   : > { %v7320_v45 = vmul.f32 %v4473_v61, %v7268_v17  ;;  %v4475_v16 = vpop.f32.mrb[81].mxu1  ;;  %v4954_v61 = vrot.slane %v5775_v49, %v6088_v15 }
 0x418   : > { %v7327_v30 = vmul.f32 %v4475_v16, %v7273_v6 }
 0x419   : > { %vm4956_vm10 = vcmp.eq.s32.totalorder %v6072_v9, %v4954_v61  ;;  %vm4958_vm14 = vcmp.eq.s32.totalorder %v6408_v56, %v4954_v61 }
 0x41a   : > { %v4479_v32 = vpop.f32.mrb[82].mxu1  ;;  %v4968_v60 = vsel %vm4956_vm10, %v4966_v31, 0.0  ;;  %v4970_v28 = vsel %vm4958_vm14, %v4966_v31, 0.0 }
 0x41b   : > { %v4481_v42 = vpop.f32.mrb[83].mxu1  ;;  %v7344_v49 = vmul.f32 %v4479_v32, %v7264_v34  ;;  %v4996_v32 = vadd.f32 %v4992_v53, %v4968_v60 }
 0x41c   : > { %v7351_v13 = vmul.f32 %v4481_v42, %v7271_v19  ;;  %v4993_v19 = vsel %vm4981_vm11, %v4986_v44, 0.0 }
 0x41e   : > { %v4485_v23 = vpop.f32.mrb[84].mxu1 }
 0x41f   : > { %v7347_v47 = vmul.f32 %v4485_v23, %v7268_v17  ;;  %v4487_v16 = vpop.f32.mrb[85].mxu1  ;;  %v4994_v23 = vsel %vm4982_vm12, %v4990_v4, 0.0 }
 0x420   : > { %v7354_v15 = vmul.f32 %v4487_v16, %v7273_v6  ;;  %v4969_v16 = vsel %vm4957_vm13, %v4962_v29, 0.0  ;;  %v4998_v2 = vadd.f32 %v4994_v23, %v4970_v28 }
 0x421   : > { %v4997_v34 = vadd.f32 %v4993_v19, %v4969_v16 }
 0x422   : > { %v5065_v51 = vpop.f32.mrb[86].mxu1 }
 0x423   : > { %v7363_v6 = vmul.f32 %v5065_v51, %v4995_v18  ;;  %v5067_v42 = vpop.f32.mrb[87].mxu1 }
 0x424   : > { %v7365_v54 = vmul.f32 %v5067_v42, %v4996_v32 }
 0x425   : > { %7748 = vst [vmem:[#allocation30_spill] sm:$0xff] %v7363_v6 }
 0x426   : > { %7749 = vst [vmem:[#allocation31_spill] sm:$0xff] %v7365_v54  ;;  %v5071_v1 = vpop.f32.mrb[88].mxu1 }
 0x427   : > { %v7367_v36 = vmul.f32 %v5071_v1, %v4997_v34  ;;  %v5073_v63 = vpop.f32.mrb[89].mxu1 }
 0x428   : > { %v7369_v17 = vmul.f32 %v5073_v63, %v4998_v2  ;;  %v3730_v63 = vrot.slane %v6560_v58, %v7734_v50 }
 0x429   : > { %7750 = vst [vmem:[#allocation32_spill] sm:$0xff] %v7367_v36 }
 0x42a   : > { %7751 = vst [vmem:[#allocation33_spill] sm:$0xff] %v7369_v17  ;;  %v5077_v53 = vpop.f32.mrb[90].mxu1  ;;  %vm3735_vm15 = vcmp.eq.s32.totalorder %v6072_v9, %v3730_v63  ;;  %vm3737_vm0 = vcmp.eq.s32.totalorder %v6408_v56, %v3730_v63 }
 0x42b   : > { %v7375_v4 = vmul.f32 %v5077_v53, %v4995_v18  ;;  %v5079_v60 = vpop.f32.mrb[91].mxu1 }
 0x42c   : > { %v7377_v29 = vmul.f32 %v5079_v60, %v4996_v32 }
 0x42d   : > { %7752 = vst [vmem:[#allocation34_spill] sm:$0xff] %v7375_v4 }
 0x42e   : > { %7753 = vst [vmem:[#allocation35_spill] sm:$0xff] %v7377_v29  ;;  %v5083_v31 = vpop.f32.mrb[92].mxu1 }
 0x42f   : > { %v7379_v51 = vmul.f32 %v5083_v31, %v4997_v34  ;;  %v5085_v19 = vpop.f32.mrb[93].mxu1 }
 0x430   : > { %v7381_v42 = vmul.f32 %v5085_v19, %v4998_v2 }
 0x431   : > { %7754 = vst [vmem:[#allocation36_spill] sm:$0xff] %v7379_v51 }
 0x432   : > { %7755 = vst [vmem:[#allocation37_spill] sm:$0xff] %v7381_v42  ;;  %v5089_v16 = vpop.f32.mrb[94].mxu1 }
 0x433   : > { %v7387_v28 = vmul.f32 %v5089_v16, %v4995_v18  ;;  %v5091_v1 = vpop.f32.mrb[95].mxu1 }
 0x434   : > { %v7389_v53 = vmul.f32 %v5091_v1, %v4996_v32 }
 0x435   : > { %7756 = vst [vmem:[#allocation38_spill] sm:$0xff] %v7387_v28 }
 0x436   : > { %7757 = vst [vmem:[#allocation39_spill] sm:$0xff] %v7389_v53  ;;  %v5095_v60 = vpop.f32.mrb[96].mxu1 }
 0x437   : > { %v7391_v44 = vmul.f32 %v5095_v60, %v4997_v34  ;;  %v5097_v31 = vpop.f32.mrb[97].mxu1 }
 0x438   : > { %v7393_v61 = vmul.f32 %v5097_v31, %v4998_v2 }
 0x439   : > { %7758 = vst [vmem:[#allocation40_spill] sm:$0xff] %v7391_v44 }
 0x43a   : > { %7759 = vst [vmem:[#allocation41_spill] sm:$0xff] %v7393_v61  ;;  %v5101_v4 = vpop.f32.mrb[98].mxu1 }
 0x43b   : > { %v7399_v23 = vmul.f32 %v5101_v4, %v4995_v18  ;;  %v5103_v16 = vpop.f32.mrb[99].mxu1  ;;  %v3734_v18 = vrot.slane %v6570_v37, %v7734_v50  ;;  %v3746_v4 = vrot.slane %v6578_v41, %v7734_v50 }
 0x43c   : > { %v7401_v51 = vmul.f32 %v5103_v16, %v4996_v32  ;;  %v3706_v32 = vrot.slane %v6558_v57, %v7734_v50  ;;  %v3718_v16 = vrot.slane %v7732_v55, %v7734_v50 }
 0x43d   : > { %7760 = vst [vmem:[#allocation42_spill] sm:$0xff] %v7399_v23  ;;  %vm3736_vm3 = vcmp.eq.s32.totalorder %v6072_v9, %v3734_v18  ;;  %vm3738_vm4 = vcmp.eq.s32.totalorder %v6408_v56, %v3734_v18 }
 0x43e   : > { %7761 = vst [vmem:[#allocation43_spill] sm:$0xff] %v7401_v51  ;;  %v5107_v1 = vpop.f32.mrb[100].mxu1  ;;  %vm3711_vm5 = vcmp.eq.s32.totalorder %v6072_v9, %v3706_v32  ;;  %vm3713_vm6 = vcmp.eq.s32.totalorder %v6408_v56, %v3706_v32  ;;  %v3748_v63 = vsel %vm3736_vm3, %v3746_v4, 0.0 }
 0x43f   : > { %v7403_v29 = vmul.f32 %v5107_v1, %v4997_v34  ;;  %v5109_v60 = vpop.f32.mrb[101].mxu1  ;;  %v3742_v34 = vrot.slane %v6564_v14, %v7734_v50  ;;  %v3722_v1 = vrot.slane %v7733_v39, %v7734_v50  ;;  %v3723_v51 = vsel %vm3711_vm5, %v3718_v16, 0.0 }
 0x440   : > { %v7405_v42 = vmul.f32 %v5109_v60, %v4998_v2  ;;  %v3710_v2 = vrot.slane %v6572_v38, %v7734_v50 }
 0x441   : > { %7762 = vst [vmem:[#allocation44_spill] sm:$0xff] %v7403_v29  ;;  %v3747_v60 = vsel %vm3735_vm15, %v3742_v34, 0.0  ;;  %v3749_v19 = vsel %vm3737_vm0, %v3742_v34, 0.0  ;;  %v3750_v29 = vsel %vm3738_vm4, %v3746_v4, 0.0 }
 0x442   : > { %7763 = vst [vmem:[#allocation45_spill] sm:$0xff] %v7405_v42  ;;  %vm3712_vm7 = vcmp.eq.s32.totalorder %v6072_v9, %v3710_v2  ;;  %vm3714_vm8 = vcmp.eq.s32.totalorder %v6408_v56, %v3710_v2  ;;  %v3725_v42 = vsel %vm3713_vm6, %v3718_v16, 0.0  ;;  %v3751_v18 = vadd.f32 %v3747_v60, %v3723_v51 }
 0x443   : > { %v3724_v28 = vsel %vm3712_vm7, %v3722_v1, 0.0  ;;  %v3753_v44 = vadd.f32 %v3749_v19, %v3725_v42  ;;  %v3726_v53 = vsel %vm3714_vm8, %v3722_v1, 0.0 }
 0x444   : > { %v3752_v61 = vadd.f32 %v3748_v63, %v3724_v28  ;;  %v3754_v6 = vadd.f32 %v3750_v29, %v3726_v53 }
 0x4bf   : > { %v3821_v31 = vpop.f32.mrb[24].mxu0 }
 0x4c0   : > { %v3823_v23 = vpop.f32.mrb[25].mxu0  ;;  %v3868_v32 = vmul.f32 %v3821_v31, %v3751_v18 }
 0x4c1   : > { %v3869_v17 = vmul.f32 %v3823_v23, %v3752_v61 }
 0x4c3   : > { %v3827_v50 = vpop.f32.mrb[26].mxu0 }
 0x4c4   : > { %v3870_v36 = vmul.f32 %v3827_v50, %v3753_v44  ;;  %v3829_v54 = vpop.f32.mrb[27].mxu0 }
 0x4c5   : > { %v3871_v39 = vmul.f32 %v3829_v54, %v3754_v6 }
 0x4c6   : > { %v5592_v34 = vpack.c.bf16 %v3870_v36, %v3868_v32 }
 0x4c7   : > { %v5590_v55 = vpack.c.bf16 %v3871_v39, %v3869_v17  ;;  %v3833_v2 = vpop.f32.mrb[28].mxu0 }
 0x4c8   : > { %v3835_v41 = vpop.f32.mrb[29].mxu0  ;;  %v3872_v16 = vmul.f32 %v3833_v2, %v3751_v18 }
 0x4c9   : > { %5591 = vmatprep.subr.bf16.mxu0 %v5590_v55  ;;  %v3873_v42 = vmul.f32 %v3835_v41, %v3752_v61 }
 0x4ca   : > { %5593 = vmatpush1.bf16.msra.mxu0 %v5592_v34 }
 0x4cb   : > { %v3839_v4 = vpop.f32.mrb[30].mxu0 }
 0x4cc   : > { %v3874_v51 = vmul.f32 %v3839_v4, %v3753_v44  ;;  %v3841_v60 = vpop.f32.mrb[31].mxu0 }
 0x4cd   : > { %v3875_v19 = vmul.f32 %v3841_v60, %v3754_v6 }
 0x4ce   : > { %v5596_v28 = vpack.c.bf16 %v3874_v51, %v3872_v16 }
 0x4cf   : > { %v5594_v1 = vpack.c.bf16 %v3875_v19, %v3873_v42  ;;  %v3845_v29 = vpop.f32.mrb[32].mxu0  ;;  %v5456_v19 = vld [vmem:[%s7661_s9 + $0x20] sm:$0xff] }
 0x4d0   : > { %v3847_v53 = vpop.f32.mrb[33].mxu0  ;;  %v3876_v54 = vmul.f32 %v3845_v29, %v3751_v18  ;;  %v7782_v29 = vpack.c.bf16 %v7309_v27, %v7306_v10  ;;  %v7786_v10 = vpack.c.bf16 %v7303_v25, %v7300_v11 }
 0x4d1   : > { %5595 = vmatprep.subr.bf16.mxu0 %v5594_v1  ;;  %v3877_v17 = vmul.f32 %v3847_v53, %v3752_v61  ;;  %v7783_v53 = vld [vmem:[#allocation10_spill] sm:$0xff] }
 0x4d2   : > { %5597 = vmatpush1.bf16.msra.mxu0 %v5596_v28  ;;  %v7764_v28 = vpack.c.bf16 %v7127_v48, %v7124_v0  ;;  %v7768_v0 = vpack.c.bf16 %v7187_v46, %v7184_v43  ;;  %v7769_v48 = vpack.c.bf16 %v7181_v20, %v7178_v12  ;;  %v7775_v43 = vld [vmem:[#allocation11_spill] sm:$0xff]  ;;  %v7778_v46 = vld [vmem:[#allocation26_spill] sm:$0xff] }
 0x4d3   : > { %v3851_v23 = vpop.f32.mrb[34].mxu0  ;;  %v7777_v20 = vld [vmem:[#allocation27_spill] sm:$0xff] }
 0x4d4   : > { %v3878_v36 = vmul.f32 %v3851_v23, %v3753_v44  ;;  %v3853_v39 = vpop.f32.mrb[35].mxu0 }
 0x4d5   : > { %v3879_v31 = vmul.f32 %v3853_v39, %v3754_v6  ;;  %v7785_v39 = vld [vmem:[#allocation15_spill] sm:$0xff] }
 0x4d6   : > { %v5600_v55 = vpack.c.bf16 %v3878_v36, %v3876_v54  ;;  %v7784_v54 = vld [vmem:[#allocation14_spill] sm:$0xff] }
 0x4d7   : > { %v5598_v63 = vpack.c.bf16 %v3879_v31, %v3877_v17  ;;  %v3857_v50 = vpop.f32.mrb[36].mxu0 }
 0x4d8   : > { %v3859_v32 = vpop.f32.mrb[37].mxu0  ;;  %v3880_v34 = vmul.f32 %v3857_v50, %v3751_v18 }
 0x4d9   : > { %5599 = vmatprep.subr.bf16.mxu0 %v5598_v63  ;;  %v3881_v16 = vmul.f32 %v3859_v32, %v3752_v61  ;;  %v7767_v61 = vpack.c.bf16 %v7145_v21, %v7142_v52  ;;  %v5466_v52 = vld [vmem:[%s7661_s9 + $0x28] sm:$0xff]  ;;  %v7772_v21 = vld [vmem:[#allocation28_spill] sm:$0xff]  ;;  %v7788_v63 = vld [vmem:[#allocation13_spill] sm:$0xff] }
 0x4da   : > { %5601 = vmatpush1.bf16.msra.mxu0 %v5600_v55  ;;  %v7787_v55 = vpack.c.bf16 %v7327_v30, %v7324_v3  ;;  %v7790_v3 = vpack.c.bf16 %v7354_v15, %v7351_v13  ;;  %v7793_v13 = vld [vmem:[#allocation22_spill] sm:$0xff]  ;;  %v7796_v15 = vld [vmem:[#allocation8_spill] sm:$0xff] }
 0x4db   : > { %v3863_v41 = vpop.f32.mrb[38].mxu0 }
 0x4dc   : > { %v3882_v2 = vmul.f32 %v3863_v41, %v3753_v44  ;;  %v3865_v4 = vpop.f32.mrb[39].mxu0  ;;  %v7765_v44 = vpack.c.bf16 %v7121_v59, %v7118_v33  ;;  %v7770_v33 = vpack.c.bf16 %v7238_v62, %v7235_v22  ;;  %v7771_v59 = vpack.c.bf16 %v7230_v8, %v7227_v26  ;;  %v7776_v22 = vld [vmem:[#allocation9_spill] sm:$0xff]  ;;  %v7780_v26 = vld [vmem:[#allocation12_spill] sm:$0xff] }
 0x4dd   : > { %v3883_v51 = vmul.f32 %v3865_v4, %v3754_v6  ;;  %v7766_v6 = vpack.c.bf16 %v7151_v24, %v7148_v35  ;;  %v7773_v35 = vpack.c.bf16 %v7285_v7, %v7772_v21  ;;  %v7774_v24 = vld [vmem:[#allocation6_spill] sm:$0xff]  ;;  %v7779_v8 = vpack.c.bf16 %v7777_v20, %v7778_v46  ;;  %v7781_v7 = vld [vmem:[#allocation16_spill] sm:$0xff] }
 0x4de   : > { %v5604_v60 = vpack.c.bf16 %v3882_v2, %v3880_v34  ;;  %v4615_v12 = vrot.slane %v7775_v43, %v7774_v24  ;;  %v4591_v62 = vrot.slane %v7776_v22, %v7774_v24  ;;  %v4627_v18 = vrot.slane %v7780_v26, %v7774_v24  ;;  %v7800_v21 = vld [vmem:[#allocation18_spill] sm:$0xff] }
 0x4df   : > { %v5602_v42 = vpack.c.bf16 %v3883_v51, %v3881_v16  ;;  %v4611_v1 = vrot.slane %v7781_v7, %v7774_v24  ;;  %v4603_v23 = vrot.slane %v7783_v53, %v7774_v24  ;;  %v4587_v36 = vrot.slane %v7784_v54, %v7774_v24 }
 0x4e0   : > { %vm4617_vm9 = vcmp.eq.s32.totalorder %v6072_v9, %v4615_v12  ;;  %vm4619_vm10 = vcmp.eq.s32.totalorder %v6408_v56, %v4615_v12  ;;  %vm4593_vm11 = vcmp.eq.s32.totalorder %v6072_v9, %v4591_v62  ;;  %vm4595_vm12 = vcmp.eq.s32.totalorder %v6408_v56, %v4591_v62 }
 0x4e1   : > { %5603 = vmatprep.subr.bf16.mxu0 %v5602_v42  ;;  %v4623_v17 = vrot.slane %v7785_v39, %v7774_v24  ;;  %v4629_v27 = vsel %vm4617_vm9, %v4627_v18, 0.0  ;;  %v4631_v31 = vsel %vm4619_vm10, %v4627_v18, 0.0  ;;  %vm4616_vm13 = vcmp.eq.s32.totalorder %v6072_v9, %v4611_v1 }
 0x4e2   : > { %5605 = vmatpush1.bf16.msra.mxu0 %v5604_v60  ;;  %vm4618_vm14 = vcmp.eq.s32.totalorder %v6408_v56, %v4611_v1  ;;  %v4599_v50 = vrot.slane %v7788_v63, %v7774_v24  ;;  %v4605_v32 = vsel %vm4593_vm11, %v4603_v23, 0.0  ;;  %v4607_v41 = vsel %vm4595_vm12, %v4603_v23, 0.0 }
 0x4e3   : > { %5611 = vmatprep.subr.bf16.mxu0 %v7764_v28  ;;  %vm4592_vm15 = vcmp.eq.s32.totalorder %v6072_v9, %v4587_v36  ;;  %vm4594_vm0 = vcmp.eq.s32.totalorder %v6408_v56, %v4587_v36  ;;  %v4633_v11 = vadd.f32 %v4629_v27, %v4605_v32  ;;  %v4635_v25 = vadd.f32 %v4631_v31, %v4607_v41  ;;  %v5476_v28 = vld [vmem:[%s7661_s9 + $0x30] sm:$0xff] }
 0x4e4   : > { %v4628_v34 = vsel %vm4616_vm13, %v4623_v17, 0.0  ;;  %v4630_v2 = vsel %vm4618_vm14, %v4623_v17, 0.0  ;;  %v7789_v4 = vpack.c.bf16 %v7320_v45, %v7317_v5  ;;  %v4604_v30 = vsel %vm4592_vm15, %v4599_v50, 0.0  ;;  %v7792_v5 = vld [vmem:[#allocation5_spill] sm:$0xff] }
 0x4e5   : > { %5457 = vmatmul.mubr.msk.f32.vlgmr.msra.gmra.mrb[22].mxu0 %vm2880_vm2, %v5456_v19  ;;  %v4606_v16 = vsel %vm4594_vm0, %v4599_v50, 0.0  ;;  %v4632_v51 = vadd.f32 %v4628_v34, %v4604_v30  ;;  %v5646_v42 = vpack.c.bf16 %v4635_v25, %v4633_v11  ;;  %v7791_v19 = vpack.c.bf16 %v7347_v47, %v7344_v49  ;;  %v7794_v49 = vld [vmem:[#allocation23_spill] sm:$0xff] }
 0x4e6   : > { %5613 = vmatpush1.bf16.msra.mxu0 %v7765_v44  ;;  %4264 = vmatprep.mubr.f32.mxu0 %v7729_v40  ;;  %v4634_v60 = vadd.f32 %v4630_v2, %v4606_v16  ;;  %v7795_v47 = vld [vmem:[#allocation7_spill] sm:$0xff]  ;;  %v7797_v44 = vld [vmem:[#allocation24_spill] sm:$0xff] }
 0x4e7   : > { %5615 = vmatprep.subr.bf16.mxu0 %v7766_v6  ;;  %v7798_v6 = vld [vmem:[#allocation25_spill] sm:$0xff] }
 0x4e8   : > { %v5648_v45 = vpack.c.bf16 %v4634_v60, %v4632_v51 }
 0x4ea   : > { %5617 = vmatpush1.bf16.msra.mxu0 %v7767_v61  ;;  %v7799_v61 = vld [vmem:[#allocation29_spill] sm:$0xff] }
 0x4eb   : > { %5619 = vmatprep.subr.bf16.mxu0 %v7768_v0  ;;  %v4663_v0 = vrot.slane %v6560_v58, %v7774_v24  ;;  %v7801_v58 = vld [vmem:[#allocation17_spill] sm:$0xff] }
 0x4ec   : > { %v4651_v43 = vrot.slane %v7801_v58, %v7774_v24  ;;  %v7809_v58 = vld [vmem:[#allocation37_spill] sm:$0xff] }
 0x4ed   : > { %vm4668_vm3 = vcmp.eq.s32.totalorder %v6072_v9, %v4663_v0 }
 0x4ee   : > { %5621 = vmatpush1.bf16.msra.mxu0 %v7769_v48  ;;  %v4667_v48 = vrot.slane %v6570_v37, %v7774_v24 }
 0x4ef   : > { %5623 = vmatprep.subr.bf16.mxu0 %v7770_v33  ;;  %v4639_v33 = vrot.slane %v6558_v57, %v7774_v24  ;;  %v7802_v57 = vld [vmem:[#allocation19_spill] sm:$0xff] }
 0x4f0   : > { %vm4669_vm4 = vcmp.eq.s32.totalorder %v6072_v9, %v4667_v48  ;;  %vm4671_vm5 = vcmp.eq.s32.totalorder %v6408_v56, %v4667_v48  ;;  %v7803_v48 = vld [vmem:[#allocation33_spill] sm:$0xff] }
 0x4f1   : > { %vm4644_vm6 = vcmp.eq.s32.totalorder %v6072_v9, %v4639_v33  ;;  %vm4646_vm7 = vcmp.eq.s32.totalorder %v6408_v56, %v4639_v33  ;;  %v7804_v33 = vld [vmem:[#allocation31_spill] sm:$0xff] }
 0x4f2   : > { %5625 = vmatpush1.bf16.msra.mxu0 %v7771_v59  ;;  %v4675_v59 = vrot.slane %v6564_v14, %v7774_v24  ;;  %v4655_v14 = vrot.slane %v7802_v57, %v7774_v24  ;;  %v4656_v46 = vsel %vm4644_vm6, %v4651_v43, 0.0 }
 0x4f3   : > { %5631 = vmatprep.subr.bf16.mxu0 %v7773_v35  ;;  %v4679_v35 = vrot.slane %v7800_v21, %v7774_v24  ;;  %v7807_v21 = vld [vmem:[#allocation30_spill] sm:$0xff] }
 0x4f4   : > { %v4680_v37 = vsel %vm4668_vm3, %v4675_v59, 0.0 }
 0x4f5   : > { %5467 = vmatmul.mubr.msk.f32.vlgmr.msra.gmra.mrb[22].mxu0 %vm2880_vm2, %v5466_v52  ;;  %v4643_v52 = vrot.slane %v6572_v38, %v7774_v24  ;;  %v4681_v22 = vsel %vm4669_vm4, %v4679_v35, 0.0  ;;  %v4683_v20 = vsel %vm4671_vm5, %v4679_v35, 0.0  ;;  %v4684_v26 = vadd.f32 %v4680_v37, %v4656_v46  ;;  %v7813_v37 = vld [vmem:[#allocation34_spill] sm:$0xff] }
 0x4f6   : > { %5633 = vmatpush1.bf16.msra.mxu0 %v7779_v8  ;;  %4575 = vmatprep.mubr.f32.mxu0 %v7729_v40  ;;  %v4658_v8 = vsel %vm4646_vm7, %v4651_v43, 0.0  ;;  %v7810_v43 = vld [vmem:[#allocation35_spill] sm:$0xff]  ;;  %v7819_v46 = vld [vmem:[#allocation38_spill] sm:$0xff] }
 0x4f7   : > { %5635 = vmatprep.subr.bf16.mxu0 %v7782_v29  ;;  %vm4645_vm8 = vcmp.eq.s32.totalorder %v6072_v9, %v4643_v52  ;;  %vm4647_vm9 = vcmp.eq.s32.totalorder %v6408_v56, %v4643_v52  ;;  %v7806_v52 = vld [vmem:[#allocation32_spill] sm:$0xff]  ;;  %v7811_v57 = vpack.c.bf16 %v7809_v58, %v7810_v43 }
 0x4f8   : > { %v4657_v18 = vsel %vm4645_vm8, %v4655_v14, 0.0  ;;  %v4659_v1 = vsel %vm4647_vm9, %v4655_v14, 0.0  ;;  %v7808_v35 = vpack.c.bf16 %v7806_v52, %v7807_v21  ;;  %v7812_v14 = vld [vmem:[#allocation36_spill] sm:$0xff] }
 0x4f9   : > { %v4685_v29 = vadd.f32 %v4681_v22, %v4657_v18  ;;  %v4687_v53 = vadd.f32 %v4683_v20, %v4659_v1  ;;  %v7816_v22 = vld [vmem:[#allocation39_spill] sm:$0xff]  ;;  %v7818_v20 = vld [vmem:[#allocation40_spill] sm:$0xff]  ;;  %v7825_v1 = vld [vmem:[#allocation42_spill] sm:$0xff] }
 0x4fa   : > { %5637 = vmatpush1.bf16.msra.mxu0 %v7786_v10  ;;  %v7822_v18 = vld [vmem:[#allocation43_spill] sm:$0xff] }
 0x4fb   : > { %5639 = vmatprep.subr.bf16.mxu0 %v7787_v55 }
 0x4fe   : > { %5641 = vmatpush1.bf16.msra.mxu0 %v7789_v4 }
 0x4ff   : > { %5643 = vmatprep.subr.bf16.mxu0 %v7790_v3 }
 0x502   : > { %5645 = vmatpush1.bf16.msra.mxu0 %v7791_v19 }
 0x503   : > { %5647 = vmatprep.subr.bf16.mxu0 %v5646_v42 }
 0x505   : > { %5477 = vmatmul.mubr.msk.f32.vlgmr.msra.gmra.mrb[22].mxu0 %vm2880_vm2, %v5476_v28 }
 0x506   : > { %5649 = vmatpush1.bf16.msra.mxu0 %v5648_v45  ;;  %4752 = vmatprep.mubr.f32.mxu0 %v7729_v40 }
 0x509   : > { %5478 = vmatmul.mubr.msk.f32.vlgmr.msra.gmra.mrb[40].mxu0 %vm422_vm1, %v7792_v5 }
 0x50a   : > { %4758 = vmatprep.mubr.f32.mxu0 %v7729_v40 }
 0x50d   : > { %5479 = vmatmul.mubr.msk.f32.gmra.mrb[42].mxu0 %vm422_vm1, %v7793_v13 }
 0x50e   : > { %4764 = vmatprep.mubr.f32.mxu0 %v7729_v40 }
 0x511   : > { %5480 = vmatmul.mubr.msk.f32.gmra.mrb[44].mxu0 %vm422_vm1, %v7794_v49 }
 0x512   : > { %4770 = vmatprep.mubr.f32.mxu0 %v7729_v40 }
 0x515   : > { %5481 = vmatmul.mubr.msk.f32.gmra.mrb[46].mxu0 %vm422_vm1, %v7795_v47 }
 0x516   : > { %4776 = vmatprep.mubr.f32.mxu0 %v7729_v40 }
 0x519   : > { %5482 = vmatmul.mubr.msk.f32.gmra.mrb[48].mxu0 %vm422_vm1, %v7796_v15 }
 0x51a   : > { %4782 = vmatprep.mubr.f32.mxu0 %v7729_v40 }
 0x51d   : > { %5483 = vmatmul.mubr.msk.f32.gmra.mrb[50].mxu0 %vm422_vm1, %v7797_v44 }
 0x51e   : > { %4788 = vmatprep.mubr.f32.mxu0 %v7729_v40 }
 0x521   : > { %5484 = vmatmul.mubr.msk.f32.gmra.mrb[52].mxu0 %vm422_vm1, %v7798_v6 }
 0x522   : > { %4794 = vmatprep.mubr.f32.mxu0 %v7729_v40 }
 0x525   : > { %5485 = vmatmul.mubr.msk.f32.gmra.mrb[54].mxu0 %vm422_vm1, %v7799_v61  ;;  %vm4670_vm1 = vcmp.eq.s32.totalorder %v6408_v56, %v4663_v0  ;;  %v5486_v0 = vld [vmem:[%s7661_s9 + $0x38] sm:$0xff] }
 0x526   : > { %4886 = vmatprep.mubr.f32.mxu0 %v7729_v40  ;;  %v4682_v12 = vsel %vm4670_vm1, %v4675_v59, 0.0  ;;  %v7805_v59 = vpack.c.bf16 %v7803_v48, %v7804_v33 }
 0x527   : > { %v4686_v7 = vadd.f32 %v4682_v12, %v4658_v8  ;;  %v7815_v12 = vld [vmem:[#allocation41_spill] sm:$0xff]  ;;  %v7820_v8 = vpack.c.bf16 %v7818_v20, %v7819_v46 }
 0x5dc   : > { %v4754_v38 = vpop.f32.mrb[40].mxu0 }
 0x5dd   : > { %v4756_v62 = vpop.f32.mrb[41].mxu0  ;;  %v4801_v23 = vmul.f32 %v4754_v38, %v4684_v26  ;;  %v7814_v38 = vpack.c.bf16 %v7812_v14, %v7813_v37 }
 0x5de   : > { %v4802_v39 = vmul.f32 %v4756_v62, %v4685_v29  ;;  %v7817_v62 = vpack.c.bf16 %v7815_v12, %v7816_v22 }
 0x5e0   : > { %v4760_v24 = vpop.f32.mrb[42].mxu0 }
 0x5e1   : > { %v4803_v54 = vmul.f32 %v4760_v24, %v4686_v7  ;;  %v4762_v36 = vpop.f32.mrb[43].mxu0  ;;  %v5496_v24 = vld [vmem:[%s7661_s9 + $0x40] sm:$0xff] }
 0x5e2   : > { %v4804_v9 = vmul.f32 %v4762_v36, %v4687_v53 }
 0x5e3   : > { %v5652_v17 = vpack.c.bf16 %v4803_v54, %v4801_v23  ;;  %v7827_v23 = vld [vmem:[#allocation20_spill] sm:$0xff] }
 0x5e4   : > { %v5650_v10 = vpack.c.bf16 %v4804_v9, %v4802_v39  ;;  %v4766_v56 = vpop.f32.mrb[44].mxu0  ;;  %v7828_v39 = vld [vmem:[#allocation21_spill] sm:$0xff] }
 0x5e5   : > { %v4768_v27 = vpop.f32.mrb[45].mxu0  ;;  %v4805_v55 = vmul.f32 %v4766_v56, %v4684_v26 }
 0x5e6   : > { %5651 = vmatprep.subr.bf16.mxu0 %v5650_v10  ;;  %v4806_v32 = vmul.f32 %v4768_v27, %v4685_v29 }
 0x5e7   : > { %5653 = vmatpush1.bf16.msra.mxu0 %v5652_v17 }
 0x5e8   : > { %v4772_v31 = vpop.f32.mrb[46].mxu0 }
 0x5e9   : > { %v4807_v63 = vmul.f32 %v4772_v31, %v4686_v7  ;;  %v4774_v50 = vpop.f32.mrb[47].mxu0 }
 0x5ea   : > { %v4808_v41 = vmul.f32 %v4774_v50, %v4687_v53 }
 0x5eb   : > { %v5656_v11 = vpack.c.bf16 %v4807_v63, %v4805_v55 }
 0x5ec   : > { %v5654_v25 = vpack.c.bf16 %v4808_v41, %v4806_v32  ;;  %v4778_v34 = vpop.f32.mrb[48].mxu0 }
 0x5ed   : > { %v4780_v2 = vpop.f32.mrb[49].mxu0  ;;  %v4809_v3 = vmul.f32 %v4778_v34, %v4684_v26 }
 0x5ee   : > { %5655 = vmatprep.subr.bf16.mxu0 %v5654_v25  ;;  %v4810_v51 = vmul.f32 %v4780_v2, %v4685_v29 }
 0x5ef   : > { %5657 = vmatpush1.bf16.msra.mxu0 %v5656_v11 }
 0x5f0   : > { %v4784_v4 = vpop.f32.mrb[50].mxu0 }
 0x5f1   : > { %v4811_v30 = vmul.f32 %v4784_v4, %v4686_v7  ;;  %v4786_v16 = vpop.f32.mrb[51].mxu0 }
 0x5f2   : > { %v4812_v60 = vmul.f32 %v4786_v16, %v4687_v53 }
 0x5f3   : > { %v5660_v42 = vpack.c.bf16 %v4811_v30, %v4809_v3 }
 0x5f4   : > { %v5658_v19 = vpack.c.bf16 %v4812_v60, %v4810_v51  ;;  %v4790_v28 = vpop.f32.mrb[52].mxu0 }
 0x5f5   : > { %v4792_v45 = vpop.f32.mrb[53].mxu0  ;;  %v4813_v13 = vmul.f32 %v4790_v28, %v4684_v26  ;;  %v7821_v26 = vld [vmem:[#allocation45_spill] sm:$0xff] }
 0x5f6   : > { %5659 = vmatprep.subr.bf16.mxu0 %v5658_v19  ;;  %v4814_v15 = vmul.f32 %v4792_v45, %v4685_v29 }
 0x5f7   : > { %5661 = vmatpush1.bf16.msra.mxu0 %v5660_v42 }
 0x5f8   : > { %v4796_v5 = vpop.f32.mrb[54].mxu0 }
 0x5f9   : > { %v4815_v49 = vmul.f32 %v4796_v5, %v4686_v7  ;;  %v4798_v47 = vpop.f32.mrb[55].mxu0  ;;  %v7823_v7 = vpack.c.bf16 %v7821_v26, %v7822_v18 }
 0x5fa   : > { %v4816_v44 = vmul.f32 %v4798_v47, %v4687_v53 }
 0x5fb   : > { %v5664_v6 = vpack.c.bf16 %v4815_v49, %v4813_v13 }
 0x5fc   : > { %v5662_v61 = vpack.c.bf16 %v4816_v44, %v4814_v15 }
 0x5fe   : > { %5663 = vmatprep.subr.bf16.mxu0 %v5662_v61 }
 0x5ff   : > { %5665 = vmatpush1.bf16.msra.mxu0 %v5664_v6 }
 0x600   : > { %5671 = vmatprep.subr.bf16.mxu0 %v7805_v59 }
 0x602   : > { %5487 = vmatmul.mubr.msk.f32.vlgmr.msra.gmra.mrb[22].mxu0 %vm2880_vm2, %v5486_v0 }
 0x603   : > { %5673 = vmatpush1.bf16.msra.mxu0 %v7808_v35  ;;  %5197 = vmatprep.mubr.f32.mxu0 %v7729_v40  ;;  %v7824_v40 = vld [vmem:[#allocation44_spill] sm:$0xff] }
 0x604   : > { %5675 = vmatprep.subr.bf16.mxu0 %v7811_v57  ;;  %v7826_v29 = vpack.c.bf16 %v7824_v40, %v7825_v1 }
 0x607   : > { %5677 = vmatpush1.bf16.msra.mxu0 %v7814_v38 }
 0x608   : > { %5679 = vmatprep.subr.bf16.mxu0 %v7817_v62 }
 0x60b   : > { %5681 = vmatpush1.bf16.msra.mxu0 %v7820_v8 }
 0x60c   : > { %5683 = vmatprep.subr.bf16.mxu0 %v7823_v7 }
 0x60f   : > { %5685 = vmatpush1.bf16.msra.mxu0 %v7826_v29 }
 0x612   : > { %5497 = vmatmul.mubr.msk.f32.vlgmr.msra.gmra.mrb[22].mxu0 %vm2880_vm2, %v5496_v24 }
 0x6e5   : > { %v5199_v53 = vpop.f32.mrb[22].mxu0 }
 0x6e6   : > { %v5690_v54 = vadd.f32 %v5199_v53, %v7827_v23  ;;  %v5201_v36 = vpop.f32.mrb[23].mxu0 }
 0x6e7   : > { %v5691_v9 = vadd.f32 %v5201_v36, %v7828_v39 }
 0x6e8   : > { %5206 = vst [vmem:[%s367_s20] sm:$0xff] %v5690_v54 }
 0x6e9   : > { %5207 = vst [vmem:[%s367_s20 + $0x8] sm:$0xff] %v5691_v9 }
 0x6ea   : > { %5873 = shalt.err (!%p5870_p3)
}
 0x6eb   : > { %s5874_s11 = scalar_lea.hbm %s7610_s28, 256  ;;  %s5878_s26 = scalar_lea.hbm %s7662_s10, 512 }
 0x6ec   : > { %p5875_p4 = scmp.ne.s32.totalorder %s7610_s28, %s5874_s11  ;;  %p5879_p9 = scmp.lt.u32.totalorder %s7610_s28, %s7662_s10 }
 0x6ed   : > { %p5880_p10 = scmp.lt.u32.totalorder %s5878_s26, %s5874_s11  ;;  %p5882_p12 = scmp.lt.u32.totalorder %s5874_s11, %s7610_s28 }
 0x6ee   : > { %p5876_p7 = pnand %p5875_p4, %p6028_p5 }
 0x6ef   : > { %p5881_p11 = por %p5880_p10, %p5879_p9 }
 0x6f0   : > { %p5877_p8 = pneg %p5876_p7 }
 0x6f1   : > { %p5883_p13 = por %p5882_p12, %p5881_p11 }
 0x6f3   : > { %p5884_p0 = pnand %p5883_p13, %p5877_p8 }
 0x6f5   : > { %5887 = shalt.err (!%p5884_p0)
}
 0x6f6   : > { %5800 = dma.vmem_to_hbm [thread:$0]  (%p6028_p5), %s7612_s21, 256, %s7610_s28, %s5209_s17  }
 0x6f7 PF: > { %p5806_p1 = scmp.ge.s32.totalorder %s5922_s16, 2  ;;  %s5235_s29 = sand.u32 1, %s5910_s13  }
 0x6f8   : > { %s5236_s25 = scalar_lea.sflag [#allocation3], %s5235_s29 }
 0x6f9   : > { %p5803_p2 = pnand %p5806_p1, %p6032_p6 }
 0x6fb   : > { %5905 = dma.done.wait (!%p5803_p2), %s5236_s25, 256  }
 0x6fc   : > { %5907 = vsyncadd (!%p5803_p2), %s5236_s25, 4294967040  ;;  %p20_p3 = scmp.ge.s32.totalorder %s6015_s19, 4   ;;  %s7829_s13 = smov %s5914_s14 }
 0x6fd   : > { %s7830_s14 = smov %s5918_s15  ;;  %s7831_s15 = smov %s6026_s22 }
 0x6fe   : > { %s7832_s16 = smov %s6015_s19  ;;  %22 = sbr.rel (!%p20_p3) target bundleno = 3 (0x3), region = 122 }
 0x705   :  { %5241 = vsyncpa [#allocation3], 1 }
 0x706   :  { %5243 = vsyncpa [#allocation3 + $0x1], 1 }

</bundles_post_ra>
